<compile_context>
chip_gen: v6e
topology: v6e:2x2x1
jax: 0.10.0
libtpu: 0.0.40
codegen_flags: <defaults>
</compile_context>

<pallas_src>
import functools

import jax
import jax.numpy as jnp
from jax.experimental import pallas as pl
from jax.experimental.pallas import tpu as pltpu


# ----------------------------------------------------------------------------
# helpers
# ----------------------------------------------------------------------------
def _relu(x):
    return jnp.maximum(x, 0.0)


def _pick_tile(hw, max_tile):
    """Largest multiple of 128 that divides hw and is <= max_tile."""
    assert hw % 128 == 0, "H*W must be a multiple of 128 (pad spatially otherwise)"
    best = 128
    t = 128
    while t <= min(hw, max_tile):
        if hw % t == 0:
            best = t
        t += 128
    return best


def _const_spec(arr):
    nd = arr.ndim
    return pl.BlockSpec(arr.shape, lambda *_, _nd=nd: (0,) * _nd)


def _group_avg_matrix(C, G):
    """[G, C] block-diagonal averaging matrix: sim[g] = mean_c_in_g(prod[c])."""
    cg = C // G
    group_of_c = jnp.arange(C) // cg
    return (jnp.arange(G)[:, None] == group_of_c[None, :]).astype(jnp.float32) / cg


# ----------------------------------------------------------------------------
# Pallas kernels
# ----------------------------------------------------------------------------
def _fused_eval_kernel(warped_ref, reff_ref, wstack_ref,
                       pb0_ref, pw1_ref, pb1_ref, pw2_ref, pb2_ref,
                       sw0_ref, sb0_ref, sw1_ref, sb1_ref, sw2_ref, sb2_ref,
                       vw_out, cost_out,
                       sim_view, sim_acc, w_acc,
                       *, num_depth, tile_hw, num_groups):
    """Fused per-(batch, spatial-tile) evaluation over the view axis.

    warped_ref: [C, X]  bf16, X = num_depth * tile_hw, lane order d*tile_hw + j
    reff_ref:   [C, tile_hw] bf16
    wstack_ref: [G+16, C] bf16 = concat([group-averaging matrix, pw0 @ avg])
    vw_out:     [1, tile_hw]   per-view pixel-wise view weight
    cost_out:   [D, tile_hw]   SimilarityNet cost (written at last view)
    sim_view:   [G, X] f32 scratch (this view's similarity)
    sim_acc:    [G, X] f32 scratch (view-weighted accumulator)
    w_acc:      [1, tile_hw] f32 scratch (view-weight sum, depth-invariant)
    """
    v = pl.program_id(2)

    @pl.when(v == 0)
    def _init():
        sim_acc[...] = jnp.zeros_like(sim_acc)
        w_acc[...] = jnp.full(w_acc.shape, 1e-5, dtype=jnp.float32)

    reff = reff_ref[...]                       # [C, tile] bf16 (no D-fold copy)
    wstack = wstack_ref[...]                   # [G+16, C] bf16
    pb0 = pb0_ref[...]
    pw1 = pw1_ref[...]
    pb1 = pb1_ref[...]
    pw2 = pw2_ref[...]
    pb2 = pb2_ref[...]

    # pass 1: per-depth similarity + PixelwiseNet logits (running max)
    mx = None
    for d in range(num_depth):
        lo, hi = d * tile_hw, (d + 1) * tile_hw
        # bf16 elementwise product (native VALU on v6e/v7x; emulated on v5e)
        prod_d = warped_ref[:, lo:hi] * reff                       # [C, tile] bf16
        # stacked matmul: rows 0..G-1 = group-avg similarity,
        #                 rows G..   = PixelwiseNet conv0 pre-activation
        z = jnp.dot(wstack, prod_d, preferred_element_type=jnp.float32)  # [G+16, tile]
        sim_view[:, lo:hi] = z[:num_groups, :]
        h = _relu(z[num_groups:, :] + pb0)
        h = _relu(jnp.dot(pw1, h, preferred_element_type=jnp.float32) + pb1)
        logit_d = jnp.dot(pw2, h, preferred_element_type=jnp.float32) + pb2  # [1, tile]
        mx = logit_d if mx is None else jnp.maximum(mx, logit_d)

    # ONE sigmoid (max-then-sigmoid == sigmoid-then-max, monotone)
    vw = jax.nn.sigmoid(mx)                                        # [1, tile]
    vw_out[...] = vw
    w_acc[...] += vw                                               # depth-invariant

    # pass 2: view-weighted accumulation per depth slice
    for d in range(num_depth):
        lo, hi = d * tile_hw, (d + 1) * tile_hw
        sim_acc[:, lo:hi] += sim_view[:, lo:hi] * vw

    @pl.when(v == pl.num_programs(2) - 1)
    def _finalize():
        inv = pl.reciprocal(w_acc[...], approx=True)               # [1, tile] (EUP)
        sw0 = sw0_ref[...]
        sb0 = sb0_ref[...]
        sw1 = sw1_ref[...]
        sb1 = sb1_ref[...]
        sw2 = sw2_ref[...]
        sb2 = sb2_ref[...]
        rows = []
        for d in range(num_depth):
            lo, hi = d * tile_hw, (d + 1) * tile_hw
            sim_avg_d = sim_acc[:, lo:hi] * inv                    # [G, tile]
            c = _relu(jnp.dot(sw0, sim_avg_d, preferred_element_type=jnp.float32) + sb0)
            c = _relu(jnp.dot(sw1, c, preferred_element_type=jnp.float32) + sb1)
            rows.append(jnp.dot(sw2, c, preferred_element_type=jnp.float32) + sb2)
        # cost written directly in [D, tile] layout -> output is [B, D, HW]
        cost_out[...] = jnp.concatenate(rows, axis=0)


def _score_regress_kernel(samp_ref, wgt_ref, depth_ref, score_out, depth_out):
    """Adaptive spatial aggregation (sum over K neighbors on a leading untiled
    axis), softmax over depth (== LogSoftmax + exp) and depth regression.

    samp_ref, wgt_ref: [K, D, TILE] bf16;  depth_ref: [D, TILE] f32
    score_out: [D, TILE];  depth_out: [1, TILE]
    """
    s = jnp.sum(samp_ref[...].astype(jnp.float32) * wgt_ref[...].astype(jnp.float32),
                axis=0)                                            # [D, TILE]
    m = jnp.max(s, axis=0, keepdims=True)
    e = jnp.exp(s - m)
    score = e / jnp.sum(e, axis=0, keepdims=True)   # exact denominator (sum-to-1)
    score_out[...] = score
    depth_out[...] = jnp.sum(depth_ref[...] * score, axis=0, keepdims=True)


# ----------------------------------------------------------------------------
# pallas_call wrappers
# ----------------------------------------------------------------------------
def run_fused_evaluation(warped_r, ref_r, wstack, pw_rest, sn_params,
                         *, num_depth, num_groups, tile_hw):
    B, V, T, C, X = warped_r.shape
    HW = T * tile_hw
    pb0, pw1, pb1, pw2, pb2 = pw_rest
    sw0, sb0, sw1, sb1, sw2, sb2 = sn_params
    kernel = functools.partial(_fused_eval_kernel, num_depth=num_depth,
                               tile_hw=tile_hw, num_groups=num_groups)
    vw, cost = pl.pallas_call(
        kernel,
        grid=(B, T, V),
        in_specs=[
            pl.BlockSpec((None, None, None, C, X), lambda b, t, v: (b, v, t, 0, 0)),
            pl.BlockSpec((None, None, C, tile_hw), lambda b, t, v: (b, t, 0, 0)),
            _const_spec(wstack),
            _const_spec(pb0), _const_spec(pw1), _const_spec(pb1),
            _const_spec(pw2), _const_spec(pb2),
            _const_spec(sw0), _const_spec(sb0),
            _const_spec(sw1), _const_spec(sb1),
            _const_spec(sw2), _const_spec(sb2),
        ],
        out_specs=(
            pl.BlockSpec((None, None, 1, tile_hw), lambda b, t, v: (b, v, 0, t)),
            pl.BlockSpec((None, num_depth, tile_hw), lambda b, t, v: (b, 0, t)),
        ),
        out_shape=(
            jax.ShapeDtypeStruct((B, V, 1, HW), jnp.float32),
            jax.ShapeDtypeStruct((B, num_depth, HW), jnp.float32),
        ),
        scratch_shapes=[
            pltpu.VMEM((num_groups, X), jnp.float32),   # this view's similarity
            pltpu.VMEM((num_groups, X), jnp.float32),   # similarity accumulator
            pltpu.VMEM((1, tile_hw), jnp.float32),      # view-weight accumulator
        ],
        compiler_params=pltpu.CompilerParams(
            dimension_semantics=("parallel", "parallel", "arbitrary")),
    )(warped_r, ref_r, wstack,
      pb0, pw1, pb1, pw2, pb2,
      sw0, sb0, sw1, sb1, sw2, sb2)
    return vw, cost


def run_score_regress(sampled, wgt, depth_flat, tile):
    B, K, D, HW = sampled.shape
    T = HW // tile
    score, depth = pl.pallas_call(
        _score_regress_kernel,
        grid=(B, T),
        in_specs=[
            pl.BlockSpec((None, K, D, tile), lambda b, t: (b, 0, 0, t)),
            pl.BlockSpec((None, K, D, tile), lambda b, t: (b, 0, 0, t)),
            pl.BlockSpec((None, D, tile), lambda b, t: (b, 0, t)),
        ],
        out_specs=(
            pl.BlockSpec((None, D, tile), lambda b, t: (b, 0, t)),
            pl.BlockSpec((None, 1, tile), lambda b, t: (b, 0, t)),
        ),
        out_shape=(
            jax.ShapeDtypeStruct((B, D, HW), jnp.float32),
            jax.ShapeDtypeStruct((B, 1, HW), jnp.float32),
        ),
        compiler_params=pltpu.CompilerParams(
            dimension_semantics=("parallel", "parallel")),
    )(sampled, wgt, depth_flat)
    return score, depth


# ----------------------------------------------------------------------------
# JAX glue: grid_sample and differentiable_warping (data-dependent gathers)
# TODO(synk): implement these gathers as a Pallas kernel (scalar-prefetched
# indices in SMEM + fused 4-corner bilinear interpolation feeding the fused
# evaluation kernel directly, producing the [B,V,T,C,X] bf16 layout in-place).
# ----------------------------------------------------------------------------
def grid_sample_jax(inp, grid, padding_mode, align_corners):
    """Matches torch.nn.functional.grid_sample (4D, bilinear)."""
    B, C, Hin, Win = inp.shape
    gx, gy = grid[..., 0], grid[..., 1]
    if align_corners:
        x = (gx + 1.0) * 0.5 * (Win - 1)
        y = (gy + 1.0) * 0.5 * (Hin - 1)
    else:
        x = ((gx + 1.0) * Win - 1.0) * 0.5
        y = ((gy + 1.0) * Hin - 1.0) * 0.5
    if padding_mode == "border":
        x = jnp.clip(x, 0.0, Win - 1)
        y = jnp.clip(y, 0.0, Hin - 1)
    x0 = jnp.floor(x)
    y0 = jnp.floor(y)
    x1 = x0 + 1.0
    y1 = y0 + 1.0
    wx1, wy1 = x - x0, y - y0
    wx0, wy0 = 1.0 - wx1, 1.0 - wy1

    inp_flat = inp.reshape(B, C, Hin * Win)
    out_sp = gx.shape[1:]

    def gather(ix, iy):
        ixc = jnp.clip(ix, 0, Win - 1).astype(jnp.int32)
        iyc = jnp.clip(iy, 0, Hin - 1).astype(jnp.int32)
        flat = (iyc * Win + ixc).reshape(B, -1)
        g = jax.vmap(lambda f, idx: f[:, idx])(inp_flat, flat)
        g = g.reshape(B, C, *out_sp)
        if padding_mode == "zeros":
            valid = ((ix >= 0) & (ix <= Win - 1) & (iy >= 0) & (iy <= Hin - 1))
            g = g * valid.astype(inp.dtype)[:, None]
        return g

    v00 = gather(x0, y0)
    v01 = gather(x1, y0)
    v10 = gather(x0, y1)
    v11 = gather(x1, y1)
    out = (v00 * (wx0 * wy0)[:, None] + v01 * (wx1 * wy0)[:, None]
           + v10 * (wx0 * wy1)[:, None] + v11 * (wx1 * wy1)[:, None])
    return out


def differentiable_warping(src_fea, src_proj, ref_proj, depth_samples):
    """Matches PatchmatchNet differentiable_warping (zeros padding, align_corners=True)."""
    B, C, H, W = src_fea.shape
    D = depth_samples.shape[1]
    proj = src_proj @ jnp.linalg.inv(ref_proj)
    rot = proj[:, :3, :3]
    trans = proj[:, :3, 3:4]

    yy, xx = jnp.meshgrid(jnp.arange(H, dtype=jnp.float32),
                          jnp.arange(W, dtype=jnp.float32), indexing="ij")
    xyz = jnp.stack([xx.ravel(), yy.ravel(), jnp.ones(H * W, jnp.float32)], axis=0)
    xyz = jnp.broadcast_to(xyz, (B, 3, H * W))
    rot_xyz = rot @ xyz                                           # [B,3,HW]
    rot_depth_xyz = rot_xyz[:, :, None, :] * depth_samples.reshape(B, 1, D, H * W)
    proj_xyz = rot_depth_xyz + trans.reshape(B, 3, 1, 1)          # [B,3,D,HW]
    neg = proj_xyz[:, 2] <= 1e-3                                  # [B,D,HW]
    px = jnp.where(neg, float(W), proj_xyz[:, 0])
    py = jnp.where(neg, float(H), proj_xyz[:, 1])
    pz = jnp.where(neg, 1.0, proj_xyz[:, 2])
    proj_x = px / pz / ((W - 1) / 2.0) - 1.0
    proj_y = py / pz / ((H - 1) / 2.0) - 1.0
    grid = jnp.stack([proj_x, proj_y], axis=-1).reshape(B, D * H, W, 2)
    warped = grid_sample_jax(src_fea, grid, padding_mode="zeros", align_corners=True)
    return warped.reshape(B, C, D, H, W)


# ----------------------------------------------------------------------------
# Parameter construction (deterministic, BatchNorm folded into conv weights)
# ----------------------------------------------------------------------------
def _conv_bn_folded(key, cout, cin):
    k1, k2, k3, k4, k5 = jax.random.split(key, 5)
    w = 0.2 * jax.random.normal(k1, (cout, cin), jnp.float32)
    gamma = 1.0 + 0.1 * jax.random.normal(k2, (cout, 1), jnp.float32)
    beta = 0.1 * jax.random.normal(k3, (cout, 1), jnp.float32)
    mean = 0.1 * jax.random.normal(k4, (cout, 1), jnp.float32)
    var = 1.0 + 0.1 * jnp.abs(jax.random.normal(k5, (cout, 1), jnp.float32))
    scale = gamma / jnp.sqrt(var + 1e-5)
    shift = beta - mean * scale
    # y = scale * (w @ x) + shift  ==  (scale * w) @ x + shift
    return scale * w, shift


def _head(key, cin):
    k1, k2 = jax.random.split(key)
    w = 0.2 * jax.random.normal(k1, (1, cin), jnp.float32)
    b = 0.1 * jax.random.normal(k2, (1, 1), jnp.float32)
    return w, b


def init_params(key, G):
    k = jax.random.split(key, 6)
    pw = _conv_bn_folded(k[0], 16, G) + _conv_bn_folded(k[1], 8, 16) + _head(k[2], 8)
    sn = _conv_bn_folded(k[3], 16, G) + _conv_bn_folded(k[4], 8, 16) + _head(k[5], 8)
    return {"pixelwise": pw, "simnet": sn}


# ----------------------------------------------------------------------------
# Evaluation.forward (stage=3, view_weights=None, eval mode)
# ----------------------------------------------------------------------------
def evaluation_forward(ref_feature, src_features, ref_proj, src_projs,
                       depth_sample, depth_min, depth_max, it,
                       grid, weight, params, G):
    del depth_min, depth_max, it  # unused in the stage-3 / first-iteration branch
    B, C, H, W = ref_feature.shape
    D = depth_sample.shape[1]
    HW = H * W
    V = len(src_features)

    # Larger spatial tiles (per perf review); per-step footprint stays small.
    # On v7x keep B*T >= 2 so both TensorCores get work.
    tile_hw = _pick_tile(HW, max_tile=2048)
    T = HW // tile_hw
    X = D * tile_hw

    # reference feature: [B, T, C, TILE_HW] bf16 (broadcast across depth
    # inside the kernel; NOT replicated D times in HBM)
    ref_r = ref_feature.reshape(B, C, T, tile_hw).transpose(0, 2, 1, 3).astype(jnp.bfloat16)

    # warp every source view; lay out as [B, V, T, C, D*TILE_HW] bf16
    # (lane order inside a tile: d*TILE_HW + j)
    warped_list = []
    for src_fea, src_proj in zip(src_features, src_projs):
        w5 = differentiable_warping(src_fea, src_proj, ref_proj, depth_sample)  # [B,C,D,H,W]
        w5 = w5.reshape(B, C, D, T, tile_hw).transpose(0, 3, 1, 2, 4)
        warped_list.append(w5.reshape(B, T, C, X).astype(jnp.bfloat16))
    warped_r = jnp.stack(warped_list, axis=1)                                    # [B,V,T,C,X]

    # group-averaging matrix stacked with PixelwiseNet conv0 (bf16 MXU weights)
    avg_mat = _group_avg_matrix(C, G)
    pw0, pb0, pw1, pb1, pw2, pb2 = params["pixelwise"]
    wstack = jnp.concatenate([avg_mat, pw0 @ avg_mat], axis=0).astype(jnp.bfloat16)

    vw, cost_flat = run_fused_evaluation(
        warped_r, ref_r, wstack, (pb0, pw1, pb1, pw2, pb2), params["simnet"],
        num_depth=D, num_groups=G, tile_hw=tile_hw)

    view_weights = vw.reshape(B, V, H, W)
    cost = cost_flat.reshape(B, D, H, W)            # already in [B, D, HW] layout

    # adaptive spatial cost aggregation sampling (bilinear, border padding)
    K = grid.shape[1] // H
    sampled = grid_sample_jax(cost, grid, padding_mode="border", align_corners=False)
    # bf16 DMA for the memory-bound score kernel (upcast to f32 inside)
    sampled = sampled.reshape(B, D, K, HW).transpose(0, 2, 1, 3).astype(jnp.bfloat16)
    wgt = weight.reshape(B, D, K, HW).transpose(0, 2, 1, 3).astype(jnp.bfloat16)
    ds_flat = depth_sample.reshape(B, D, HW)

    tile2 = _pick_tile(HW, max_tile=4096)
    score, depth = run_score_regress(sampled, wgt, ds_flat, tile2)
    return depth.reshape(B, H, W), score.reshape(B, D, H, W), view_weights


# ----------------------------------------------------------------------------
# main
# ----------------------------------------------------------------------------
if __name__ == "__main__":
    key = jax.random.PRNGKey(0)
    B, C, H, W = 2, 16, 16, 16
    G, D, K = 8, 8, 9
    num_src = 2

    ks = jax.random.split(key, 10)
    ref_feature = jax.random.normal(ks[0], (B, C, H, W), jnp.float32)
    src_features = [jax.random.normal(ks[1 + i], (B, C, H, W), jnp.float32)
                    for i in range(num_src)]

    f = 16.0
    Kmat = jnp.array([[f, 0.0, W / 2.0, 0.0],
                      [0.0, f, H / 2.0, 0.0],
                      [0.0, 0.0, 1.0, 0.0],
                      [0.0, 0.0, 0.0, 1.0]], jnp.float32)
    ref_proj = jnp.broadcast_to(Kmat, (B, 4, 4))
    src_projs = []
    for i in range(num_src):
        T4 = jnp.eye(4, dtype=jnp.float32).at[0, 3].set(0.3 * (i + 1)).at[1, 3].set(-0.2 * (i + 1))
        src_projs.append(jnp.broadcast_to(Kmat @ T4, (B, 4, 4)))

    depth_min, depth_max = 1.0, 4.0
    base = jnp.linspace(depth_min, depth_max, D, dtype=jnp.float32).reshape(1, D, 1, 1)
    depth_sample = base + 0.05 * jax.random.uniform(ks[4], (B, D, H, W), jnp.float32)

    grid = jax.random.uniform(ks[5], (B, K * H, W, 2), jnp.float32, minval=-1.0, maxval=1.0)
    weight = jax.random.uniform(ks[6], (B, D, K, H, W), jnp.float32)
    weight = weight / jnp.sum(weight, axis=2, keepdims=True)

    params = init_params(ks[7], G)

    depth, score, view_weights = evaluation_forward(
        ref_feature, src_features, ref_proj, src_projs,
        depth_sample, depth_min, depth_max, 1, grid, weight, params, G)

    jax.block_until_ready((depth, score, view_weights))
    assert depth.shape == (B, H, W)
    assert score.shape == (B, D, H, W)
    assert view_weights.shape == (B, num_src, H, W)
    assert bool(jnp.all(jnp.isfinite(depth)))
    assert bool(jnp.all(jnp.isfinite(score)))
    # score is a softmax over depth
    assert bool(jnp.allclose(jnp.sum(score, axis=1), 1.0, atol=1e-4))
    print("KERNEL_OK")
</pallas_src>

<mosaic_0001>
module attributes {stable_mosaic.version = 11 : i64} {
  func.func @_fused_eval_kernel(%arg0: i32, %arg1: i32, %arg2: i32, %arg3: memref<1x1x1x16x2048xbf16, #tpu.memory_space<vmem>>, %arg4: memref<1x1x16x256xbf16, #tpu.memory_space<vmem>>, %arg5: memref<24x16xbf16, #tpu.memory_space<vmem>>, %arg6: memref<16x1xf32, #tpu.memory_space<vmem>>, %arg7: memref<8x16xf32, #tpu.memory_space<vmem>>, %arg8: memref<8x1xf32, #tpu.memory_space<vmem>>, %arg9: memref<1x8xf32, #tpu.memory_space<vmem>>, %arg10: memref<1x1xf32, #tpu.memory_space<vmem>>, %arg11: memref<16x8xf32, #tpu.memory_space<vmem>>, %arg12: memref<16x1xf32, #tpu.memory_space<vmem>>, %arg13: memref<8x16xf32, #tpu.memory_space<vmem>>, %arg14: memref<8x1xf32, #tpu.memory_space<vmem>>, %arg15: memref<1x8xf32, #tpu.memory_space<vmem>>, %arg16: memref<1x1xf32, #tpu.memory_space<vmem>>, %arg17: memref<1x1x1x256xf32, #tpu.memory_space<vmem>>, %arg18: memref<1x8x256xf32, #tpu.memory_space<vmem>>, %arg19: memref<8x2048xf32, #tpu.memory_space<vmem>>, %arg20: memref<8x2048xf32, #tpu.memory_space<vmem>>, %arg21: memref<1x256xf32, #tpu.memory_space<vmem>>) attributes {dimension_semantics = [#tpu.dimension_semantics<parallel>, #tpu.dimension_semantics<parallel>, #tpu.dimension_semantics<arbitrary>], iteration_bounds = array<i64: 2, 1, 2>, scalar_prefetch = 0 : i64, scratch_operands = 3 : i64, tpu.core_type = #tpu.core_type<tc>, window_params = [{transform_indices = @transform_0, window_bounds = array<i64: 1, 1, 1, 16, 2048>}, {transform_indices = @transform_1, window_bounds = array<i64: 1, 1, 16, 256>}, {pipeline_mode = #tpu.pipeline_mode<synchronous>, transform_indices = @transform_2, window_bounds = array<i64: 24, 16>}, {pipeline_mode = #tpu.pipeline_mode<synchronous>, transform_indices = @transform_3, window_bounds = array<i64: 16, 1>}, {pipeline_mode = #tpu.pipeline_mode<synchronous>, transform_indices = @transform_4, window_bounds = array<i64: 8, 16>}, {pipeline_mode = #tpu.pipeline_mode<synchronous>, transform_indices = @transform_5, window_bounds = array<i64: 8, 1>}, {pipeline_mode = #tpu.pipeline_mode<synchronous>, transform_indices = @transform_6, window_bounds = array<i64: 1, 8>}, {pipeline_mode = #tpu.pipeline_mode<synchronous>, transform_indices = @transform_7, window_bounds = array<i64: 1, 1>}, {pipeline_mode = #tpu.pipeline_mode<synchronous>, transform_indices = @transform_8, window_bounds = array<i64: 16, 8>}, {pipeline_mode = #tpu.pipeline_mode<synchronous>, transform_indices = @transform_9, window_bounds = array<i64: 16, 1>}, {pipeline_mode = #tpu.pipeline_mode<synchronous>, transform_indices = @transform_10, window_bounds = array<i64: 8, 16>}, {pipeline_mode = #tpu.pipeline_mode<synchronous>, transform_indices = @transform_11, window_bounds = array<i64: 8, 1>}, {pipeline_mode = #tpu.pipeline_mode<synchronous>, transform_indices = @transform_12, window_bounds = array<i64: 1, 8>}, {pipeline_mode = #tpu.pipeline_mode<synchronous>, transform_indices = @transform_13, window_bounds = array<i64: 1, 1>}, {transform_indices = @transform_14, window_bounds = array<i64: 1, 1, 1, 256>}, {transform_indices = @transform_15, window_bounds = array<i64: 1, 8, 256>}]} {
    %c0_i32 = arith.constant 0 : i32
    %0 = arith.cmpi eq, %arg2, %c0_i32 : i32
    %1 = arith.extui %0 : i1 to i32
    %c0_i32_0 = arith.constant 0 : i32
    %2 = arith.cmpi ne, %1, %c0_i32_0 : i32
    scf.if %2 {
      %cst_162 = arith.constant 0.000000e+00 : f32
      %232 = vector.broadcast %cst_162 : f32 to vector<8x2048xf32>
      %c0_163 = arith.constant 0 : index
      %c0_164 = arith.constant 0 : index
      %233 = vector.load %arg20[%c0_163, %c0_164] : memref<8x2048xf32, #tpu.memory_space<vmem>>, vector<8x2048xf32>
      tpu.vector_store %arg20[%c0_163, %c0_164], %232 {strides = array<i32>} : memref<8x2048xf32, #tpu.memory_space<vmem>>, vector<8x2048xf32>,
      %cst_165 = arith.constant 9.99999974E-6 : f32
      %234 = vector.broadcast %cst_165 : f32 to vector<1x256xf32>
      %c0_166 = arith.constant 0 : index
      %c0_167 = arith.constant 0 : index
      %235 = vector.load %arg21[%c0_166, %c0_167] : memref<1x256xf32, #tpu.memory_space<vmem>>, vector<1x256xf32>
      tpu.vector_store %arg21[%c0_166, %c0_167], %234 {strides = array<i32>} : memref<1x256xf32, #tpu.memory_space<vmem>>, vector<1x256xf32>,
    } else {
    }
    %c0 = arith.constant 0 : index
    %c0_1 = arith.constant 0 : index
    %c0_2 = arith.constant 0 : index
    %c0_3 = arith.constant 0 : index
    %3 = vector.load %arg4[%c0, %c0_1, %c0_2, %c0_3] : memref<1x1x16x256xbf16, #tpu.memory_space<vmem>>, vector<1x1x16x256xbf16>
    %4 = vector.shape_cast %3 : vector<1x1x16x256xbf16> to vector<16x256xbf16>
    %c0_4 = arith.constant 0 : index
    %c0_5 = arith.constant 0 : index
    %5 = vector.load %arg5[%c0_4, %c0_5] : memref<24x16xbf16, #tpu.memory_space<vmem>>, vector<24x16xbf16>
    %c0_6 = arith.constant 0 : index
    %c0_7 = arith.constant 0 : index
    %6 = vector.load %arg6[%c0_6, %c0_7] : memref<16x1xf32, #tpu.memory_space<vmem>>, vector<16x1xf32>
    %c0_8 = arith.constant 0 : index
    %c0_9 = arith.constant 0 : index
    %7 = vector.load %arg7[%c0_8, %c0_9] : memref<8x16xf32, #tpu.memory_space<vmem>>, vector<8x16xf32>
    %c0_10 = arith.constant 0 : index
    %c0_11 = arith.constant 0 : index
    %8 = vector.load %arg8[%c0_10, %c0_11] : memref<8x1xf32, #tpu.memory_space<vmem>>, vector<8x1xf32>
    %c0_12 = arith.constant 0 : index
    %c0_13 = arith.constant 0 : index
    %9 = vector.load %arg9[%c0_12, %c0_13] : memref<1x8xf32, #tpu.memory_space<vmem>>, vector<1x8xf32>
    %c0_14 = arith.constant 0 : index
    %c0_15 = arith.constant 0 : index
    %10 = vector.load %arg10[%c0_14, %c0_15] : memref<1x1xf32, #tpu.memory_space<vmem>>, vector<1x1xf32>
    %c0_16 = arith.constant 0 : index
    %c0_17 = arith.constant 0 : index
    %c0_18 = arith.constant 0 : index
    %c0_19 = arith.constant 0 : index
    %c0_20 = arith.constant 0 : index
    %11 = vector.load %arg3[%c0_16, %c0_17, %c0_18, %c0_19, %c0_20] : memref<1x1x1x16x2048xbf16, #tpu.memory_space<vmem>>, vector<1x1x1x16x256xbf16>
    %12 = vector.shape_cast %11 : vector<1x1x1x16x256xbf16> to vector<16x256xbf16>
    %13 = arith.mulf %12, %4 : vector<16x256xbf16>
    %cst = arith.constant dense<0.000000e+00> : vector<24x256xf32>
    %14 = tpu.matmul %5, %13, %cst {dimension_numbers = #tpu.dot_dimension_numbers<[1], [0], [0], [1], [0, 0, 1, 1], [], []>} : vector<24x16xbf16>, vector<16x256xbf16>, vector<24x256xf32> -> vector<24x256xf32>
    %15 = vector.extract_strided_slice %14 {offsets = [0, 0], sizes = [8, 256], strides = [1, 1]} : vector<24x256xf32> to vector<8x256xf32>
    %c0_21 = arith.constant 0 : index
    %c0_22 = arith.constant 0 : index
    %16 = vector.load %arg19[%c0_21, %c0_22] : memref<8x2048xf32, #tpu.memory_space<vmem>>, vector<8x256xf32>
    tpu.vector_store %arg19[%c0_21, %c0_22], %15 {strides = array<i32>} : memref<8x2048xf32, #tpu.memory_space<vmem>>, vector<8x256xf32>,
    %17 = vector.extract_strided_slice %14 {offsets = [8, 0], sizes = [16, 256], strides = [1, 1]} : vector<24x256xf32> to vector<16x256xf32>
    %18 = vector.broadcast %6 : vector<16x1xf32> to vector<16x256xf32>
    %19 = arith.addf %17, %18 : vector<16x256xf32>
    %cst_23 = arith.constant 0.000000e+00 : f32
    %20 = vector.broadcast %cst_23 : f32 to vector<16x256xf32>
    %21 = arith.maximumf %19, %20 : vector<16x256xf32>
    %cst_24 = arith.constant dense<0.000000e+00> : vector<8x256xf32>
    %22 = tpu.matmul %7, %21, %cst_24 {dimension_numbers = #tpu.dot_dimension_numbers<[1], [0], [0], [1], [0, 0, 1, 1], [], []>} : vector<8x16xf32>, vector<16x256xf32>, vector<8x256xf32> -> vector<8x256xf32>
    %23 = vector.broadcast %8 : vector<8x1xf32> to vector<8x256xf32>
    %24 = arith.addf %22, %23 : vector<8x256xf32>
    %cst_25 = arith.constant 0.000000e+00 : f32
    %25 = vector.broadcast %cst_25 : f32 to vector<8x256xf32>
    %26 = arith.maximumf %24, %25 : vector<8x256xf32>
    %cst_26 = arith.constant dense<0.000000e+00> : vector<1x256xf32>
    %27 = tpu.matmul %9, %26, %cst_26 {dimension_numbers = #tpu.dot_dimension_numbers<[1], [0], [0], [1], [0, 0, 1, 1], [], []>} : vector<1x8xf32>, vector<8x256xf32>, vector<1x256xf32> -> vector<1x256xf32>
    %28 = vector.broadcast %10 : vector<1x1xf32> to vector<1x256xf32>
    %29 = arith.addf %27, %28 : vector<1x256xf32>
    %c0_27 = arith.constant 0 : index
    %c0_28 = arith.constant 0 : index
    %c0_29 = arith.constant 0 : index
    %c0_30 = arith.constant 0 : index
    %c256 = arith.constant 256 : index
    %30 = vector.load %arg3[%c0_27, %c0_28, %c0_29, %c0_30, %c256] : memref<1x1x1x16x2048xbf16, #tpu.memory_space<vmem>>, vector<1x1x1x16x256xbf16>
    %31 = vector.shape_cast %30 : vector<1x1x1x16x256xbf16> to vector<16x256xbf16>
    %32 = arith.mulf %31, %4 : vector<16x256xbf16>
    %cst_31 = arith.constant dense<0.000000e+00> : vector<24x256xf32>
    %33 = tpu.matmul %5, %32, %cst_31 {dimension_numbers = #tpu.dot_dimension_numbers<[1], [0], [0], [1], [0, 0, 1, 1], [], []>} : vector<24x16xbf16>, vector<16x256xbf16>, vector<24x256xf32> -> vector<24x256xf32>
    %34 = vector.extract_strided_slice %33 {offsets = [0, 0], sizes = [8, 256], strides = [1, 1]} : vector<24x256xf32> to vector<8x256xf32>
    %c0_32 = arith.constant 0 : index
    %c256_33 = arith.constant 256 : index
    %35 = vector.load %arg19[%c0_32, %c256_33] : memref<8x2048xf32, #tpu.memory_space<vmem>>, vector<8x256xf32>
    tpu.vector_store %arg19[%c0_32, %c256_33], %34 {strides = array<i32>} : memref<8x2048xf32, #tpu.memory_space<vmem>>, vector<8x256xf32>,
    %36 = vector.extract_strided_slice %33 {offsets = [8, 0], sizes = [16, 256], strides = [1, 1]} : vector<24x256xf32> to vector<16x256xf32>
    %37 = vector.broadcast %6 : vector<16x1xf32> to vector<16x256xf32>
    %38 = arith.addf %36, %37 : vector<16x256xf32>
    %cst_34 = arith.constant 0.000000e+00 : f32
    %39 = vector.broadcast %cst_34 : f32 to vector<16x256xf32>
    %40 = arith.maximumf %38, %39 : vector<16x256xf32>
    %cst_35 = arith.constant dense<0.000000e+00> : vector<8x256xf32>
    %41 = tpu.matmul %7, %40, %cst_35 {dimension_numbers = #tpu.dot_dimension_numbers<[1], [0], [0], [1], [0, 0, 1, 1], [], []>} : vector<8x16xf32>, vector<16x256xf32>, vector<8x256xf32> -> vector<8x256xf32>
    %42 = vector.broadcast %8 : vector<8x1xf32> to vector<8x256xf32>
    %43 = arith.addf %41, %42 : vector<8x256xf32>
    %cst_36 = arith.constant 0.000000e+00 : f32
    %44 = vector.broadcast %cst_36 : f32 to vector<8x256xf32>
    %45 = arith.maximumf %43, %44 : vector<8x256xf32>
    %cst_37 = arith.constant dense<0.000000e+00> : vector<1x256xf32>
    %46 = tpu.matmul %9, %45, %cst_37 {dimension_numbers = #tpu.dot_dimension_numbers<[1], [0], [0], [1], [0, 0, 1, 1], [], []>} : vector<1x8xf32>, vector<8x256xf32>, vector<1x256xf32> -> vector<1x256xf32>
    %47 = vector.broadcast %10 : vector<1x1xf32> to vector<1x256xf32>
    %48 = arith.addf %46, %47 : vector<1x256xf32>
    %49 = arith.maximumf %29, %48 : vector<1x256xf32>
    %c0_38 = arith.constant 0 : index
    %c0_39 = arith.constant 0 : index
    %c0_40 = arith.constant 0 : index
    %c0_41 = arith.constant 0 : index
    %c512 = arith.constant 512 : index
    %50 = vector.load %arg3[%c0_38, %c0_39, %c0_40, %c0_41, %c512] : memref<1x1x1x16x2048xbf16, #tpu.memory_space<vmem>>, vector<1x1x1x16x256xbf16>
    %51 = vector.shape_cast %50 : vector<1x1x1x16x256xbf16> to vector<16x256xbf16>
    %52 = arith.mulf %51, %4 : vector<16x256xbf16>
    %cst_42 = arith.constant dense<0.000000e+00> : vector<24x256xf32>
    %53 = tpu.matmul %5, %52, %cst_42 {dimension_numbers = #tpu.dot_dimension_numbers<[1], [0], [0], [1], [0, 0, 1, 1], [], []>} : vector<24x16xbf16>, vector<16x256xbf16>, vector<24x256xf32> -> vector<24x256xf32>
    %54 = vector.extract_strided_slice %53 {offsets = [0, 0], sizes = [8, 256], strides = [1, 1]} : vector<24x256xf32> to vector<8x256xf32>
    %c0_43 = arith.constant 0 : index
    %c512_44 = arith.constant 512 : index
    %55 = vector.load %arg19[%c0_43, %c512_44] : memref<8x2048xf32, #tpu.memory_space<vmem>>, vector<8x256xf32>
    tpu.vector_store %arg19[%c0_43, %c512_44], %54 {strides = array<i32>} : memref<8x2048xf32, #tpu.memory_space<vmem>>, vector<8x256xf32>,
    %56 = vector.extract_strided_slice %53 {offsets = [8, 0], sizes = [16, 256], strides = [1, 1]} : vector<24x256xf32> to vector<16x256xf32>
    %57 = vector.broadcast %6 : vector<16x1xf32> to vector<16x256xf32>
    %58 = arith.addf %56, %57 : vector<16x256xf32>
    %cst_45 = arith.constant 0.000000e+00 : f32
    %59 = vector.broadcast %cst_45 : f32 to vector<16x256xf32>
    %60 = arith.maximumf %58, %59 : vector<16x256xf32>
    %cst_46 = arith.constant dense<0.000000e+00> : vector<8x256xf32>
    %61 = tpu.matmul %7, %60, %cst_46 {dimension_numbers = #tpu.dot_dimension_numbers<[1], [0], [0], [1], [0, 0, 1, 1], [], []>} : vector<8x16xf32>, vector<16x256xf32>, vector<8x256xf32> -> vector<8x256xf32>
    %62 = vector.broadcast %8 : vector<8x1xf32> to vector<8x256xf32>
    %63 = arith.addf %61, %62 : vector<8x256xf32>
    %cst_47 = arith.constant 0.000000e+00 : f32
    %64 = vector.broadcast %cst_47 : f32 to vector<8x256xf32>
    %65 = arith.maximumf %63, %64 : vector<8x256xf32>
    %cst_48 = arith.constant dense<0.000000e+00> : vector<1x256xf32>
    %66 = tpu.matmul %9, %65, %cst_48 {dimension_numbers = #tpu.dot_dimension_numbers<[1], [0], [0], [1], [0, 0, 1, 1], [], []>} : vector<1x8xf32>, vector<8x256xf32>, vector<1x256xf32> -> vector<1x256xf32>
    %67 = vector.broadcast %10 : vector<1x1xf32> to vector<1x256xf32>
    %68 = arith.addf %66, %67 : vector<1x256xf32>
    %69 = arith.maximumf %49, %68 : vector<1x256xf32>
    %c0_49 = arith.constant 0 : index
    %c0_50 = arith.constant 0 : index
    %c0_51 = arith.constant 0 : index
    %c0_52 = arith.constant 0 : index
    %c768 = arith.constant 768 : index
    %70 = vector.load %arg3[%c0_49, %c0_50, %c0_51, %c0_52, %c768] : memref<1x1x1x16x2048xbf16, #tpu.memory_space<vmem>>, vector<1x1x1x16x256xbf16>
    %71 = vector.shape_cast %70 : vector<1x1x1x16x256xbf16> to vector<16x256xbf16>
    %72 = arith.mulf %71, %4 : vector<16x256xbf16>
    %cst_53 = arith.constant dense<0.000000e+00> : vector<24x256xf32>
    %73 = tpu.matmul %5, %72, %cst_53 {dimension_numbers = #tpu.dot_dimension_numbers<[1], [0], [0], [1], [0, 0, 1, 1], [], []>} : vector<24x16xbf16>, vector<16x256xbf16>, vector<24x256xf32> -> vector<24x256xf32>
    %74 = vector.extract_strided_slice %73 {offsets = [0, 0], sizes = [8, 256], strides = [1, 1]} : vector<24x256xf32> to vector<8x256xf32>
    %c0_54 = arith.constant 0 : index
    %c768_55 = arith.constant 768 : index
    %75 = vector.load %arg19[%c0_54, %c768_55] : memref<8x2048xf32, #tpu.memory_space<vmem>>, vector<8x256xf32>
    tpu.vector_store %arg19[%c0_54, %c768_55], %74 {strides = array<i32>} : memref<8x2048xf32, #tpu.memory_space<vmem>>, vector<8x256xf32>,
    %76 = vector.extract_strided_slice %73 {offsets = [8, 0], sizes = [16, 256], strides = [1, 1]} : vector<24x256xf32> to vector<16x256xf32>
    %77 = vector.broadcast %6 : vector<16x1xf32> to vector<16x256xf32>
    %78 = arith.addf %76, %77 : vector<16x256xf32>
    %cst_56 = arith.constant 0.000000e+00 : f32
    %79 = vector.broadcast %cst_56 : f32 to vector<16x256xf32>
    %80 = arith.maximumf %78, %79 : vector<16x256xf32>
    %cst_57 = arith.constant dense<0.000000e+00> : vector<8x256xf32>
    %81 = tpu.matmul %7, %80, %cst_57 {dimension_numbers = #tpu.dot_dimension_numbers<[1], [0], [0], [1], [0, 0, 1, 1], [], []>} : vector<8x16xf32>, vector<16x256xf32>, vector<8x256xf32> -> vector<8x256xf32>
    %82 = vector.broadcast %8 : vector<8x1xf32> to vector<8x256xf32>
    %83 = arith.addf %81, %82 : vector<8x256xf32>
    %cst_58 = arith.constant 0.000000e+00 : f32
    %84 = vector.broadcast %cst_58 : f32 to vector<8x256xf32>
    %85 = arith.maximumf %83, %84 : vector<8x256xf32>
    %cst_59 = arith.constant dense<0.000000e+00> : vector<1x256xf32>
    %86 = tpu.matmul %9, %85, %cst_59 {dimension_numbers = #tpu.dot_dimension_numbers<[1], [0], [0], [1], [0, 0, 1, 1], [], []>} : vector<1x8xf32>, vector<8x256xf32>, vector<1x256xf32> -> vector<1x256xf32>
    %87 = vector.broadcast %10 : vector<1x1xf32> to vector<1x256xf32>
    %88 = arith.addf %86, %87 : vector<1x256xf32>
    %89 = arith.maximumf %69, %88 : vector<1x256xf32>
    %c0_60 = arith.constant 0 : index
    %c0_61 = arith.constant 0 : index
    %c0_62 = arith.constant 0 : index
    %c0_63 = arith.constant 0 : index
    %c1024 = arith.constant 1024 : index
    %90 = vector.load %arg3[%c0_60, %c0_61, %c0_62, %c0_63, %c1024] : memref<1x1x1x16x2048xbf16, #tpu.memory_space<vmem>>, vector<1x1x1x16x256xbf16>
    %91 = vector.shape_cast %90 : vector<1x1x1x16x256xbf16> to vector<16x256xbf16>
    %92 = arith.mulf %91, %4 : vector<16x256xbf16>
    %cst_64 = arith.constant dense<0.000000e+00> : vector<24x256xf32>
    %93 = tpu.matmul %5, %92, %cst_64 {dimension_numbers = #tpu.dot_dimension_numbers<[1], [0], [0], [1], [0, 0, 1, 1], [], []>} : vector<24x16xbf16>, vector<16x256xbf16>, vector<24x256xf32> -> vector<24x256xf32>
    %94 = vector.extract_strided_slice %93 {offsets = [0, 0], sizes = [8, 256], strides = [1, 1]} : vector<24x256xf32> to vector<8x256xf32>
    %c0_65 = arith.constant 0 : index
    %c1024_66 = arith.constant 1024 : index
    %95 = vector.load %arg19[%c0_65, %c1024_66] : memref<8x2048xf32, #tpu.memory_space<vmem>>, vector<8x256xf32>
    tpu.vector_store %arg19[%c0_65, %c1024_66], %94 {strides = array<i32>} : memref<8x2048xf32, #tpu.memory_space<vmem>>, vector<8x256xf32>,
    %96 = vector.extract_strided_slice %93 {offsets = [8, 0], sizes = [16, 256], strides = [1, 1]} : vector<24x256xf32> to vector<16x256xf32>
    %97 = vector.broadcast %6 : vector<16x1xf32> to vector<16x256xf32>
    %98 = arith.addf %96, %97 : vector<16x256xf32>
    %cst_67 = arith.constant 0.000000e+00 : f32
    %99 = vector.broadcast %cst_67 : f32 to vector<16x256xf32>
    %100 = arith.maximumf %98, %99 : vector<16x256xf32>
    %cst_68 = arith.constant dense<0.000000e+00> : vector<8x256xf32>
    %101 = tpu.matmul %7, %100, %cst_68 {dimension_numbers = #tpu.dot_dimension_numbers<[1], [0], [0], [1], [0, 0, 1, 1], [], []>} : vector<8x16xf32>, vector<16x256xf32>, vector<8x256xf32> -> vector<8x256xf32>
    %102 = vector.broadcast %8 : vector<8x1xf32> to vector<8x256xf32>
    %103 = arith.addf %101, %102 : vector<8x256xf32>
    %cst_69 = arith.constant 0.000000e+00 : f32
    %104 = vector.broadcast %cst_69 : f32 to vector<8x256xf32>
    %105 = arith.maximumf %103, %104 : vector<8x256xf32>
    %cst_70 = arith.constant dense<0.000000e+00> : vector<1x256xf32>
    %106 = tpu.matmul %9, %105, %cst_70 {dimension_numbers = #tpu.dot_dimension_numbers<[1], [0], [0], [1], [0, 0, 1, 1], [], []>} : vector<1x8xf32>, vector<8x256xf32>, vector<1x256xf32> -> vector<1x256xf32>
    %107 = vector.broadcast %10 : vector<1x1xf32> to vector<1x256xf32>
    %108 = arith.addf %106, %107 : vector<1x256xf32>
    %109 = arith.maximumf %89, %108 : vector<1x256xf32>
    %c0_71 = arith.constant 0 : index
    %c0_72 = arith.constant 0 : index
    %c0_73 = arith.constant 0 : index
    %c0_74 = arith.constant 0 : index
    %c1280 = arith.constant 1280 : index
    %110 = vector.load %arg3[%c0_71, %c0_72, %c0_73, %c0_74, %c1280] : memref<1x1x1x16x2048xbf16, #tpu.memory_space<vmem>>, vector<1x1x1x16x256xbf16>
    %111 = vector.shape_cast %110 : vector<1x1x1x16x256xbf16> to vector<16x256xbf16>
    %112 = arith.mulf %111, %4 : vector<16x256xbf16>
    %cst_75 = arith.constant dense<0.000000e+00> : vector<24x256xf32>
    %113 = tpu.matmul %5, %112, %cst_75 {dimension_numbers = #tpu.dot_dimension_numbers<[1], [0], [0], [1], [0, 0, 1, 1], [], []>} : vector<24x16xbf16>, vector<16x256xbf16>, vector<24x256xf32> -> vector<24x256xf32>
    %114 = vector.extract_strided_slice %113 {offsets = [0, 0], sizes = [8, 256], strides = [1, 1]} : vector<24x256xf32> to vector<8x256xf32>
    %c0_76 = arith.constant 0 : index
    %c1280_77 = arith.constant 1280 : index
    %115 = vector.load %arg19[%c0_76, %c1280_77] : memref<8x2048xf32, #tpu.memory_space<vmem>>, vector<8x256xf32>
    tpu.vector_store %arg19[%c0_76, %c1280_77], %114 {strides = array<i32>} : memref<8x2048xf32, #tpu.memory_space<vmem>>, vector<8x256xf32>,
    %116 = vector.extract_strided_slice %113 {offsets = [8, 0], sizes = [16, 256], strides = [1, 1]} : vector<24x256xf32> to vector<16x256xf32>
    %117 = vector.broadcast %6 : vector<16x1xf32> to vector<16x256xf32>
    %118 = arith.addf %116, %117 : vector<16x256xf32>
    %cst_78 = arith.constant 0.000000e+00 : f32
    %119 = vector.broadcast %cst_78 : f32 to vector<16x256xf32>
    %120 = arith.maximumf %118, %119 : vector<16x256xf32>
    %cst_79 = arith.constant dense<0.000000e+00> : vector<8x256xf32>
    %121 = tpu.matmul %7, %120, %cst_79 {dimension_numbers = #tpu.dot_dimension_numbers<[1], [0], [0], [1], [0, 0, 1, 1], [], []>} : vector<8x16xf32>, vector<16x256xf32>, vector<8x256xf32> -> vector<8x256xf32>
    %122 = vector.broadcast %8 : vector<8x1xf32> to vector<8x256xf32>
    %123 = arith.addf %121, %122 : vector<8x256xf32>
    %cst_80 = arith.constant 0.000000e+00 : f32
    %124 = vector.broadcast %cst_80 : f32 to vector<8x256xf32>
    %125 = arith.maximumf %123, %124 : vector<8x256xf32>
    %cst_81 = arith.constant dense<0.000000e+00> : vector<1x256xf32>
    %126 = tpu.matmul %9, %125, %cst_81 {dimension_numbers = #tpu.dot_dimension_numbers<[1], [0], [0], [1], [0, 0, 1, 1], [], []>} : vector<1x8xf32>, vector<8x256xf32>, vector<1x256xf32> -> vector<1x256xf32>
    %127 = vector.broadcast %10 : vector<1x1xf32> to vector<1x256xf32>
    %128 = arith.addf %126, %127 : vector<1x256xf32>
    %129 = arith.maximumf %109, %128 : vector<1x256xf32>
    %c0_82 = arith.constant 0 : index
    %c0_83 = arith.constant 0 : index
    %c0_84 = arith.constant 0 : index
    %c0_85 = arith.constant 0 : index
    %c1536 = arith.constant 1536 : index
    %130 = vector.load %arg3[%c0_82, %c0_83, %c0_84, %c0_85, %c1536] : memref<1x1x1x16x2048xbf16, #tpu.memory_space<vmem>>, vector<1x1x1x16x256xbf16>
    %131 = vector.shape_cast %130 : vector<1x1x1x16x256xbf16> to vector<16x256xbf16>
    %132 = arith.mulf %131, %4 : vector<16x256xbf16>
    %cst_86 = arith.constant dense<0.000000e+00> : vector<24x256xf32>
    %133 = tpu.matmul %5, %132, %cst_86 {dimension_numbers = #tpu.dot_dimension_numbers<[1], [0], [0], [1], [0, 0, 1, 1], [], []>} : vector<24x16xbf16>, vector<16x256xbf16>, vector<24x256xf32> -> vector<24x256xf32>
    %134 = vector.extract_strided_slice %133 {offsets = [0, 0], sizes = [8, 256], strides = [1, 1]} : vector<24x256xf32> to vector<8x256xf32>
    %c0_87 = arith.constant 0 : index
    %c1536_88 = arith.constant 1536 : index
    %135 = vector.load %arg19[%c0_87, %c1536_88] : memref<8x2048xf32, #tpu.memory_space<vmem>>, vector<8x256xf32>
    tpu.vector_store %arg19[%c0_87, %c1536_88], %134 {strides = array<i32>} : memref<8x2048xf32, #tpu.memory_space<vmem>>, vector<8x256xf32>,
    %136 = vector.extract_strided_slice %133 {offsets = [8, 0], sizes = [16, 256], strides = [1, 1]} : vector<24x256xf32> to vector<16x256xf32>
    %137 = vector.broadcast %6 : vector<16x1xf32> to vector<16x256xf32>
    %138 = arith.addf %136, %137 : vector<16x256xf32>
    %cst_89 = arith.constant 0.000000e+00 : f32
    %139 = vector.broadcast %cst_89 : f32 to vector<16x256xf32>
    %140 = arith.maximumf %138, %139 : vector<16x256xf32>
    %cst_90 = arith.constant dense<0.000000e+00> : vector<8x256xf32>
    %141 = tpu.matmul %7, %140, %cst_90 {dimension_numbers = #tpu.dot_dimension_numbers<[1], [0], [0], [1], [0, 0, 1, 1], [], []>} : vector<8x16xf32>, vector<16x256xf32>, vector<8x256xf32> -> vector<8x256xf32>
    %142 = vector.broadcast %8 : vector<8x1xf32> to vector<8x256xf32>
    %143 = arith.addf %141, %142 : vector<8x256xf32>
    %cst_91 = arith.constant 0.000000e+00 : f32
    %144 = vector.broadcast %cst_91 : f32 to vector<8x256xf32>
    %145 = arith.maximumf %143, %144 : vector<8x256xf32>
    %cst_92 = arith.constant dense<0.000000e+00> : vector<1x256xf32>
    %146 = tpu.matmul %9, %145, %cst_92 {dimension_numbers = #tpu.dot_dimension_numbers<[1], [0], [0], [1], [0, 0, 1, 1], [], []>} : vector<1x8xf32>, vector<8x256xf32>, vector<1x256xf32> -> vector<1x256xf32>
    %147 = vector.broadcast %10 : vector<1x1xf32> to vector<1x256xf32>
    %148 = arith.addf %146, %147 : vector<1x256xf32>
    %149 = arith.maximumf %129, %148 : vector<1x256xf32>
    %c0_93 = arith.constant 0 : index
    %c0_94 = arith.constant 0 : index
    %c0_95 = arith.constant 0 : index
    %c0_96 = arith.constant 0 : index
    %c1792 = arith.constant 1792 : index
    %150 = vector.load %arg3[%c0_93, %c0_94, %c0_95, %c0_96, %c1792] : memref<1x1x1x16x2048xbf16, #tpu.memory_space<vmem>>, vector<1x1x1x16x256xbf16>
    %151 = vector.shape_cast %150 : vector<1x1x1x16x256xbf16> to vector<16x256xbf16>
    %152 = arith.mulf %151, %4 : vector<16x256xbf16>
    %cst_97 = arith.constant dense<0.000000e+00> : vector<24x256xf32>
    %153 = tpu.matmul %5, %152, %cst_97 {dimension_numbers = #tpu.dot_dimension_numbers<[1], [0], [0], [1], [0, 0, 1, 1], [], []>} : vector<24x16xbf16>, vector<16x256xbf16>, vector<24x256xf32> -> vector<24x256xf32>
    %154 = vector.extract_strided_slice %153 {offsets = [0, 0], sizes = [8, 256], strides = [1, 1]} : vector<24x256xf32> to vector<8x256xf32>
    %c0_98 = arith.constant 0 : index
    %c1792_99 = arith.constant 1792 : index
    %155 = vector.load %arg19[%c0_98, %c1792_99] : memref<8x2048xf32, #tpu.memory_space<vmem>>, vector<8x256xf32>
    tpu.vector_store %arg19[%c0_98, %c1792_99], %154 {strides = array<i32>} : memref<8x2048xf32, #tpu.memory_space<vmem>>, vector<8x256xf32>,
    %156 = vector.extract_strided_slice %153 {offsets = [8, 0], sizes = [16, 256], strides = [1, 1]} : vector<24x256xf32> to vector<16x256xf32>
    %157 = vector.broadcast %6 : vector<16x1xf32> to vector<16x256xf32>
    %158 = arith.addf %156, %157 : vector<16x256xf32>
    %cst_100 = arith.constant 0.000000e+00 : f32
    %159 = vector.broadcast %cst_100 : f32 to vector<16x256xf32>
    %160 = arith.maximumf %158, %159 : vector<16x256xf32>
    %cst_101 = arith.constant dense<0.000000e+00> : vector<8x256xf32>
    %161 = tpu.matmul %7, %160, %cst_101 {dimension_numbers = #tpu.dot_dimension_numbers<[1], [0], [0], [1], [0, 0, 1, 1], [], []>} : vector<8x16xf32>, vector<16x256xf32>, vector<8x256xf32> -> vector<8x256xf32>
    %162 = vector.broadcast %8 : vector<8x1xf32> to vector<8x256xf32>
    %163 = arith.addf %161, %162 : vector<8x256xf32>
    %cst_102 = arith.constant 0.000000e+00 : f32
    %164 = vector.broadcast %cst_102 : f32 to vector<8x256xf32>
    %165 = arith.maximumf %163, %164 : vector<8x256xf32>
    %cst_103 = arith.constant dense<0.000000e+00> : vector<1x256xf32>
    %166 = tpu.matmul %9, %165, %cst_103 {dimension_numbers = #tpu.dot_dimension_numbers<[1], [0], [0], [1], [0, 0, 1, 1], [], []>} : vector<1x8xf32>, vector<8x256xf32>, vector<1x256xf32> -> vector<1x256xf32>
    %167 = vector.broadcast %10 : vector<1x1xf32> to vector<1x256xf32>
    %168 = arith.addf %166, %167 : vector<1x256xf32>
    %169 = arith.maximumf %149, %168 : vector<1x256xf32>
    %170 = arith.negf %169 : vector<1x256xf32>
    %171 = math.exp %170 : vector<1x256xf32>
    %cst_104 = arith.constant 1.000000e+00 : f32
    %172 = vector.broadcast %cst_104 : f32 to vector<1x256xf32>
    %173 = arith.addf %172, %171 : vector<1x256xf32>
    %174 = arith.divf %172, %173 : vector<1x256xf32>
    %c0_105 = arith.constant 0 : index
    %c0_106 = arith.constant 0 : index
    %c0_107 = arith.constant 0 : index
    %c0_108 = arith.constant 0 : index
    %175 = vector.load %arg17[%c0_105, %c0_106, %c0_107, %c0_108] : memref<1x1x1x256xf32, #tpu.memory_space<vmem>>, vector<1x1x1x256xf32>
    %176 = vector.shape_cast %175 : vector<1x1x1x256xf32> to vector<1x256xf32>
    %177 = vector.shape_cast %174 : vector<1x256xf32> to vector<1x1x1x256xf32>
    tpu.vector_store %arg17[%c0_105, %c0_106, %c0_107, %c0_108], %177 {strides = array<i32>} : memref<1x1x1x256xf32, #tpu.memory_space<vmem>>, vector<1x1x1x256xf32>,
    %c0_109 = arith.constant 0 : index
    %c0_110 = arith.constant 0 : index
    %178 = vector.load %arg21[%c0_109, %c0_110] : memref<1x256xf32, #tpu.memory_space<vmem>>, vector<1x256xf32>
    %179 = arith.addf %178, %174 : vector<1x256xf32>
    %c0_111 = arith.constant 0 : index
    %c0_112 = arith.constant 0 : index
    %180 = vector.load %arg21[%c0_111, %c0_112] : memref<1x256xf32, #tpu.memory_space<vmem>>, vector<1x256xf32>
    tpu.vector_store %arg21[%c0_111, %c0_112], %179 {strides = array<i32>} : memref<1x256xf32, #tpu.memory_space<vmem>>, vector<1x256xf32>,
    %c0_113 = arith.constant 0 : index
    %c0_114 = arith.constant 0 : index
    %181 = vector.load %arg20[%c0_113, %c0_114] : memref<8x2048xf32, #tpu.memory_space<vmem>>, vector<8x256xf32>
    %c0_115 = arith.constant 0 : index
    %c0_116 = arith.constant 0 : index
    %182 = vector.load %arg19[%c0_115, %c0_116] : memref<8x2048xf32, #tpu.memory_space<vmem>>, vector<8x256xf32>
    %183 = vector.broadcast %174 : vector<1x256xf32> to vector<8x256xf32>
    %184 = arith.mulf %182, %183 : vector<8x256xf32>
    %185 = arith.addf %181, %184 : vector<8x256xf32>
    %c0_117 = arith.constant 0 : index
    %c0_118 = arith.constant 0 : index
    %186 = vector.load %arg20[%c0_117, %c0_118] : memref<8x2048xf32, #tpu.memory_space<vmem>>, vector<8x256xf32>
    tpu.vector_store %arg20[%c0_117, %c0_118], %185 {strides = array<i32>} : memref<8x2048xf32, #tpu.memory_space<vmem>>, vector<8x256xf32>,
    %c0_119 = arith.constant 0 : index
    %c256_120 = arith.constant 256 : index
    %187 = vector.load %arg20[%c0_119, %c256_120] : memref<8x2048xf32, #tpu.memory_space<vmem>>, vector<8x256xf32>
    %c0_121 = arith.constant 0 : index
    %c256_122 = arith.constant 256 : index
    %188 = vector.load %arg19[%c0_121, %c256_122] : memref<8x2048xf32, #tpu.memory_space<vmem>>, vector<8x256xf32>
    %189 = vector.broadcast %174 : vector<1x256xf32> to vector<8x256xf32>
    %190 = arith.mulf %188, %189 : vector<8x256xf32>
    %191 = arith.addf %187, %190 : vector<8x256xf32>
    %c0_123 = arith.constant 0 : index
    %c256_124 = arith.constant 256 : index
    %192 = vector.load %arg20[%c0_123, %c256_124] : memref<8x2048xf32, #tpu.memory_space<vmem>>, vector<8x256xf32>
    tpu.vector_store %arg20[%c0_123, %c256_124], %191 {strides = array<i32>} : memref<8x2048xf32, #tpu.memory_space<vmem>>, vector<8x256xf32>,
    %c0_125 = arith.constant 0 : index
    %c512_126 = arith.constant 512 : index
    %193 = vector.load %arg20[%c0_125, %c512_126] : memref<8x2048xf32, #tpu.memory_space<vmem>>, vector<8x256xf32>
    %c0_127 = arith.constant 0 : index
    %c512_128 = arith.constant 512 : index
    %194 = vector.load %arg19[%c0_127, %c512_128] : memref<8x2048xf32, #tpu.memory_space<vmem>>, vector<8x256xf32>
    %195 = vector.broadcast %174 : vector<1x256xf32> to vector<8x256xf32>
    %196 = arith.mulf %194, %195 : vector<8x256xf32>
    %197 = arith.addf %193, %196 : vector<8x256xf32>
    %c0_129 = arith.constant 0 : index
    %c512_130 = arith.constant 512 : index
    %198 = vector.load %arg20[%c0_129, %c512_130] : memref<8x2048xf32, #tpu.memory_space<vmem>>, vector<8x256xf32>
    tpu.vector_store %arg20[%c0_129, %c512_130], %197 {strides = array<i32>} : memref<8x2048xf32, #tpu.memory_space<vmem>>, vector<8x256xf32>,
    %c0_131 = arith.constant 0 : index
    %c768_132 = arith.constant 768 : index
    %199 = vector.load %arg20[%c0_131, %c768_132] : memref<8x2048xf32, #tpu.memory_space<vmem>>, vector<8x256xf32>
    %c0_133 = arith.constant 0 : index
    %c768_134 = arith.constant 768 : index
    %200 = vector.load %arg19[%c0_133, %c768_134] : memref<8x2048xf32, #tpu.memory_space<vmem>>, vector<8x256xf32>
    %201 = vector.broadcast %174 : vector<1x256xf32> to vector<8x256xf32>
    %202 = arith.mulf %200, %201 : vector<8x256xf32>
    %203 = arith.addf %199, %202 : vector<8x256xf32>
    %c0_135 = arith.constant 0 : index
    %c768_136 = arith.constant 768 : index
    %204 = vector.load %arg20[%c0_135, %c768_136] : memref<8x2048xf32, #tpu.memory_space<vmem>>, vector<8x256xf32>
    tpu.vector_store %arg20[%c0_135, %c768_136], %203 {strides = array<i32>} : memref<8x2048xf32, #tpu.memory_space<vmem>>, vector<8x256xf32>,
    %c0_137 = arith.constant 0 : index
    %c1024_138 = arith.constant 1024 : index
    %205 = vector.load %arg20[%c0_137, %c1024_138] : memref<8x2048xf32, #tpu.memory_space<vmem>>, vector<8x256xf32>
    %c0_139 = arith.constant 0 : index
    %c1024_140 = arith.constant 1024 : index
    %206 = vector.load %arg19[%c0_139, %c1024_140] : memref<8x2048xf32, #tpu.memory_space<vmem>>, vector<8x256xf32>
    %207 = vector.broadcast %174 : vector<1x256xf32> to vector<8x256xf32>
    %208 = arith.mulf %206, %207 : vector<8x256xf32>
    %209 = arith.addf %205, %208 : vector<8x256xf32>
    %c0_141 = arith.constant 0 : index
    %c1024_142 = arith.constant 1024 : index
    %210 = vector.load %arg20[%c0_141, %c1024_142] : memref<8x2048xf32, #tpu.memory_space<vmem>>, vector<8x256xf32>
    tpu.vector_store %arg20[%c0_141, %c1024_142], %209 {strides = array<i32>} : memref<8x2048xf32, #tpu.memory_space<vmem>>, vector<8x256xf32>,
    %c0_143 = arith.constant 0 : index
    %c1280_144 = arith.constant 1280 : index
    %211 = vector.load %arg20[%c0_143, %c1280_144] : memref<8x2048xf32, #tpu.memory_space<vmem>>, vector<8x256xf32>
    %c0_145 = arith.constant 0 : index
    %c1280_146 = arith.constant 1280 : index
    %212 = vector.load %arg19[%c0_145, %c1280_146] : memref<8x2048xf32, #tpu.memory_space<vmem>>, vector<8x256xf32>
    %213 = vector.broadcast %174 : vector<1x256xf32> to vector<8x256xf32>
    %214 = arith.mulf %212, %213 : vector<8x256xf32>
    %215 = arith.addf %211, %214 : vector<8x256xf32>
    %c0_147 = arith.constant 0 : index
    %c1280_148 = arith.constant 1280 : index
    %216 = vector.load %arg20[%c0_147, %c1280_148] : memref<8x2048xf32, #tpu.memory_space<vmem>>, vector<8x256xf32>
    tpu.vector_store %arg20[%c0_147, %c1280_148], %215 {strides = array<i32>} : memref<8x2048xf32, #tpu.memory_space<vmem>>, vector<8x256xf32>,
    %c0_149 = arith.constant 0 : index
    %c1536_150 = arith.constant 1536 : index
    %217 = vector.load %arg20[%c0_149, %c1536_150] : memref<8x2048xf32, #tpu.memory_space<vmem>>, vector<8x256xf32>
    %c0_151 = arith.constant 0 : index
    %c1536_152 = arith.constant 1536 : index
    %218 = vector.load %arg19[%c0_151, %c1536_152] : memref<8x2048xf32, #tpu.memory_space<vmem>>, vector<8x256xf32>
    %219 = vector.broadcast %174 : vector<1x256xf32> to vector<8x256xf32>
    %220 = arith.mulf %218, %219 : vector<8x256xf32>
    %221 = arith.addf %217, %220 : vector<8x256xf32>
    %c0_153 = arith.constant 0 : index
    %c1536_154 = arith.constant 1536 : index
    %222 = vector.load %arg20[%c0_153, %c1536_154] : memref<8x2048xf32, #tpu.memory_space<vmem>>, vector<8x256xf32>
    tpu.vector_store %arg20[%c0_153, %c1536_154], %221 {strides = array<i32>} : memref<8x2048xf32, #tpu.memory_space<vmem>>, vector<8x256xf32>,
    %c0_155 = arith.constant 0 : index
    %c1792_156 = arith.constant 1792 : index
    %223 = vector.load %arg20[%c0_155, %c1792_156] : memref<8x2048xf32, #tpu.memory_space<vmem>>, vector<8x256xf32>
    %c0_157 = arith.constant 0 : index
    %c1792_158 = arith.constant 1792 : index
    %224 = vector.load %arg19[%c0_157, %c1792_158] : memref<8x2048xf32, #tpu.memory_space<vmem>>, vector<8x256xf32>
    %225 = vector.broadcast %174 : vector<1x256xf32> to vector<8x256xf32>
    %226 = arith.mulf %224, %225 : vector<8x256xf32>
    %227 = arith.addf %223, %226 : vector<8x256xf32>
    %c0_159 = arith.constant 0 : index
    %c1792_160 = arith.constant 1792 : index
    %228 = vector.load %arg20[%c0_159, %c1792_160] : memref<8x2048xf32, #tpu.memory_space<vmem>>, vector<8x256xf32>
    tpu.vector_store %arg20[%c0_159, %c1792_160], %227 {strides = array<i32>} : memref<8x2048xf32, #tpu.memory_space<vmem>>, vector<8x256xf32>,
    %c1_i32 = arith.constant 1 : i32
    %229 = arith.cmpi eq, %arg2, %c1_i32 : i32
    %230 = arith.extui %229 : i1 to i32
    %c0_i32_161 = arith.constant 0 : i32
    %231 = arith.cmpi ne, %230, %c0_i32_161 : i32
    scf.if %231 {
      %c0_162 = arith.constant 0 : index
      %c0_163 = arith.constant 0 : index
      %232 = vector.load %arg21[%c0_162, %c0_163] : memref<1x256xf32, #tpu.memory_space<vmem>>, vector<1x256xf32>
      %233 = tpu.reciprocal %232 {approx = true} : vector<1x256xf32> -> vector<1x256xf32>
      %c0_164 = arith.constant 0 : index
      %c0_165 = arith.constant 0 : index
      %234 = vector.load %arg11[%c0_164, %c0_165] : memref<16x8xf32, #tpu.memory_space<vmem>>, vector<16x8xf32>
      %c0_166 = arith.constant 0 : index
      %c0_167 = arith.constant 0 : index
      %235 = vector.load %arg12[%c0_166, %c0_167] : memref<16x1xf32, #tpu.memory_space<vmem>>, vector<16x1xf32>
      %c0_168 = arith.constant 0 : index
      %c0_169 = arith.constant 0 : index
      %236 = vector.load %arg13[%c0_168, %c0_169] : memref<8x16xf32, #tpu.memory_space<vmem>>, vector<8x16xf32>
      %c0_170 = arith.constant 0 : index
      %c0_171 = arith.constant 0 : index
      %237 = vector.load %arg14[%c0_170, %c0_171] : memref<8x1xf32, #tpu.memory_space<vmem>>, vector<8x1xf32>
      %c0_172 = arith.constant 0 : index
      %c0_173 = arith.constant 0 : index
      %238 = vector.load %arg15[%c0_172, %c0_173] : memref<1x8xf32, #tpu.memory_space<vmem>>, vector<1x8xf32>
      %c0_174 = arith.constant 0 : index
      %c0_175 = arith.constant 0 : index
      %239 = vector.load %arg16[%c0_174, %c0_175] : memref<1x1xf32, #tpu.memory_space<vmem>>, vector<1x1xf32>
      %c0_176 = arith.constant 0 : index
      %c0_177 = arith.constant 0 : index
      %240 = vector.load %arg20[%c0_176, %c0_177] : memref<8x2048xf32, #tpu.memory_space<vmem>>, vector<8x256xf32>
      %241 = vector.broadcast %233 : vector<1x256xf32> to vector<8x256xf32>
      %242 = arith.mulf %240, %241 : vector<8x256xf32>
      %cst_178 = arith.constant dense<0.000000e+00> : vector<16x256xf32>
      %243 = tpu.matmul %234, %242, %cst_178 {dimension_numbers = #tpu.dot_dimension_numbers<[1], [0], [0], [1], [0, 0, 1, 1], [], []>} : vector<16x8xf32>, vector<8x256xf32>, vector<16x256xf32> -> vector<16x256xf32>
      %244 = vector.broadcast %235 : vector<16x1xf32> to vector<16x256xf32>
      %245 = arith.addf %243, %244 : vector<16x256xf32>
      %cst_179 = arith.constant 0.000000e+00 : f32
      %246 = vector.broadcast %cst_179 : f32 to vector<16x256xf32>
      %247 = arith.maximumf %245, %246 : vector<16x256xf32>
      %cst_180 = arith.constant dense<0.000000e+00> : vector<8x256xf32>
      %248 = tpu.matmul %236, %247, %cst_180 {dimension_numbers = #tpu.dot_dimension_numbers<[1], [0], [0], [1], [0, 0, 1, 1], [], []>} : vector<8x16xf32>, vector<16x256xf32>, vector<8x256xf32> -> vector<8x256xf32>
      %249 = vector.broadcast %237 : vector<8x1xf32> to vector<8x256xf32>
      %250 = arith.addf %248, %249 : vector<8x256xf32>
      %cst_181 = arith.constant 0.000000e+00 : f32
      %251 = vector.broadcast %cst_181 : f32 to vector<8x256xf32>
      %252 = arith.maximumf %250, %251 : vector<8x256xf32>
      %cst_182 = arith.constant dense<0.000000e+00> : vector<1x256xf32>
      %253 = tpu.matmul %238, %252, %cst_182 {dimension_numbers = #tpu.dot_dimension_numbers<[1], [0], [0], [1], [0, 0, 1, 1], [], []>} : vector<1x8xf32>, vector<8x256xf32>, vector<1x256xf32> -> vector<1x256xf32>
      %254 = vector.broadcast %239 : vector<1x1xf32> to vector<1x256xf32>
      %255 = arith.addf %253, %254 : vector<1x256xf32>
      %c0_183 = arith.constant 0 : index
      %c256_184 = arith.constant 256 : index
      %256 = vector.load %arg20[%c0_183, %c256_184] : memref<8x2048xf32, #tpu.memory_space<vmem>>, vector<8x256xf32>
      %257 = vector.broadcast %233 : vector<1x256xf32> to vector<8x256xf32>
      %258 = arith.mulf %256, %257 : vector<8x256xf32>
      %cst_185 = arith.constant dense<0.000000e+00> : vector<16x256xf32>
      %259 = tpu.matmul %234, %258, %cst_185 {dimension_numbers = #tpu.dot_dimension_numbers<[1], [0], [0], [1], [0, 0, 1, 1], [], []>} : vector<16x8xf32>, vector<8x256xf32>, vector<16x256xf32> -> vector<16x256xf32>
      %260 = vector.broadcast %235 : vector<16x1xf32> to vector<16x256xf32>
      %261 = arith.addf %259, %260 : vector<16x256xf32>
      %cst_186 = arith.constant 0.000000e+00 : f32
      %262 = vector.broadcast %cst_186 : f32 to vector<16x256xf32>
      %263 = arith.maximumf %261, %262 : vector<16x256xf32>
      %cst_187 = arith.constant dense<0.000000e+00> : vector<8x256xf32>
      %264 = tpu.matmul %236, %263, %cst_187 {dimension_numbers = #tpu.dot_dimension_numbers<[1], [0], [0], [1], [0, 0, 1, 1], [], []>} : vector<8x16xf32>, vector<16x256xf32>, vector<8x256xf32> -> vector<8x256xf32>
      %265 = vector.broadcast %237 : vector<8x1xf32> to vector<8x256xf32>
      %266 = arith.addf %264, %265 : vector<8x256xf32>
      %cst_188 = arith.constant 0.000000e+00 : f32
      %267 = vector.broadcast %cst_188 : f32 to vector<8x256xf32>
      %268 = arith.maximumf %266, %267 : vector<8x256xf32>
      %cst_189 = arith.constant dense<0.000000e+00> : vector<1x256xf32>
      %269 = tpu.matmul %238, %268, %cst_189 {dimension_numbers = #tpu.dot_dimension_numbers<[1], [0], [0], [1], [0, 0, 1, 1], [], []>} : vector<1x8xf32>, vector<8x256xf32>, vector<1x256xf32> -> vector<1x256xf32>
      %270 = vector.broadcast %239 : vector<1x1xf32> to vector<1x256xf32>
      %271 = arith.addf %269, %270 : vector<1x256xf32>
      %c0_190 = arith.constant 0 : index
      %c512_191 = arith.constant 512 : index
      %272 = vector.load %arg20[%c0_190, %c512_191] : memref<8x2048xf32, #tpu.memory_space<vmem>>, vector<8x256xf32>
      %273 = vector.broadcast %233 : vector<1x256xf32> to vector<8x256xf32>
      %274 = arith.mulf %272, %273 : vector<8x256xf32>
      %cst_192 = arith.constant dense<0.000000e+00> : vector<16x256xf32>
      %275 = tpu.matmul %234, %274, %cst_192 {dimension_numbers = #tpu.dot_dimension_numbers<[1], [0], [0], [1], [0, 0, 1, 1], [], []>} : vector<16x8xf32>, vector<8x256xf32>, vector<16x256xf32> -> vector<16x256xf32>
      %276 = vector.broadcast %235 : vector<16x1xf32> to vector<16x256xf32>
      %277 = arith.addf %275, %276 : vector<16x256xf32>
      %cst_193 = arith.constant 0.000000e+00 : f32
      %278 = vector.broadcast %cst_193 : f32 to vector<16x256xf32>
      %279 = arith.maximumf %277, %278 : vector<16x256xf32>
      %cst_194 = arith.constant dense<0.000000e+00> : vector<8x256xf32>
      %280 = tpu.matmul %236, %279, %cst_194 {dimension_numbers = #tpu.dot_dimension_numbers<[1], [0], [0], [1], [0, 0, 1, 1], [], []>} : vector<8x16xf32>, vector<16x256xf32>, vector<8x256xf32> -> vector<8x256xf32>
      %281 = vector.broadcast %237 : vector<8x1xf32> to vector<8x256xf32>
      %282 = arith.addf %280, %281 : vector<8x256xf32>
      %cst_195 = arith.constant 0.000000e+00 : f32
      %283 = vector.broadcast %cst_195 : f32 to vector<8x256xf32>
      %284 = arith.maximumf %282, %283 : vector<8x256xf32>
      %cst_196 = arith.constant dense<0.000000e+00> : vector<1x256xf32>
      %285 = tpu.matmul %238, %284, %cst_196 {dimension_numbers = #tpu.dot_dimension_numbers<[1], [0], [0], [1], [0, 0, 1, 1], [], []>} : vector<1x8xf32>, vector<8x256xf32>, vector<1x256xf32> -> vector<1x256xf32>
      %286 = vector.broadcast %239 : vector<1x1xf32> to vector<1x256xf32>
      %287 = arith.addf %285, %286 : vector<1x256xf32>
      %c0_197 = arith.constant 0 : index
      %c768_198 = arith.constant 768 : index
      %288 = vector.load %arg20[%c0_197, %c768_198] : memref<8x2048xf32, #tpu.memory_space<vmem>>, vector<8x256xf32>
      %289 = vector.broadcast %233 : vector<1x256xf32> to vector<8x256xf32>
      %290 = arith.mulf %288, %289 : vector<8x256xf32>
      %cst_199 = arith.constant dense<0.000000e+00> : vector<16x256xf32>
      %291 = tpu.matmul %234, %290, %cst_199 {dimension_numbers = #tpu.dot_dimension_numbers<[1], [0], [0], [1], [0, 0, 1, 1], [], []>} : vector<16x8xf32>, vector<8x256xf32>, vector<16x256xf32> -> vector<16x256xf32>
      %292 = vector.broadcast %235 : vector<16x1xf32> to vector<16x256xf32>
      %293 = arith.addf %291, %292 : vector<16x256xf32>
      %cst_200 = arith.constant 0.000000e+00 : f32
      %294 = vector.broadcast %cst_200 : f32 to vector<16x256xf32>
      %295 = arith.maximumf %293, %294 : vector<16x256xf32>
      %cst_201 = arith.constant dense<0.000000e+00> : vector<8x256xf32>
      %296 = tpu.matmul %236, %295, %cst_201 {dimension_numbers = #tpu.dot_dimension_numbers<[1], [0], [0], [1], [0, 0, 1, 1], [], []>} : vector<8x16xf32>, vector<16x256xf32>, vector<8x256xf32> -> vector<8x256xf32>
      %297 = vector.broadcast %237 : vector<8x1xf32> to vector<8x256xf32>
      %298 = arith.addf %296, %297 : vector<8x256xf32>
      %cst_202 = arith.constant 0.000000e+00 : f32
      %299 = vector.broadcast %cst_202 : f32 to vector<8x256xf32>
      %300 = arith.maximumf %298, %299 : vector<8x256xf32>
      %cst_203 = arith.constant dense<0.000000e+00> : vector<1x256xf32>
      %301 = tpu.matmul %238, %300, %cst_203 {dimension_numbers = #tpu.dot_dimension_numbers<[1], [0], [0], [1], [0, 0, 1, 1], [], []>} : vector<1x8xf32>, vector<8x256xf32>, vector<1x256xf32> -> vector<1x256xf32>
      %302 = vector.broadcast %239 : vector<1x1xf32> to vector<1x256xf32>
      %303 = arith.addf %301, %302 : vector<1x256xf32>
      %c0_204 = arith.constant 0 : index
      %c1024_205 = arith.constant 1024 : index
      %304 = vector.load %arg20[%c0_204, %c1024_205] : memref<8x2048xf32, #tpu.memory_space<vmem>>, vector<8x256xf32>
      %305 = vector.broadcast %233 : vector<1x256xf32> to vector<8x256xf32>
      %306 = arith.mulf %304, %305 : vector<8x256xf32>
      %cst_206 = arith.constant dense<0.000000e+00> : vector<16x256xf32>
      %307 = tpu.matmul %234, %306, %cst_206 {dimension_numbers = #tpu.dot_dimension_numbers<[1], [0], [0], [1], [0, 0, 1, 1], [], []>} : vector<16x8xf32>, vector<8x256xf32>, vector<16x256xf32> -> vector<16x256xf32>
      %308 = vector.broadcast %235 : vector<16x1xf32> to vector<16x256xf32>
      %309 = arith.addf %307, %308 : vector<16x256xf32>
      %cst_207 = arith.constant 0.000000e+00 : f32
      %310 = vector.broadcast %cst_207 : f32 to vector<16x256xf32>
      %311 = arith.maximumf %309, %310 : vector<16x256xf32>
      %cst_208 = arith.constant dense<0.000000e+00> : vector<8x256xf32>
      %312 = tpu.matmul %236, %311, %cst_208 {dimension_numbers = #tpu.dot_dimension_numbers<[1], [0], [0], [1], [0, 0, 1, 1], [], []>} : vector<8x16xf32>, vector<16x256xf32>, vector<8x256xf32> -> vector<8x256xf32>
      %313 = vector.broadcast %237 : vector<8x1xf32> to vector<8x256xf32>
      %314 = arith.addf %312, %313 : vector<8x256xf32>
      %cst_209 = arith.constant 0.000000e+00 : f32
      %315 = vector.broadcast %cst_209 : f32 to vector<8x256xf32>
      %316 = arith.maximumf %314, %315 : vector<8x256xf32>
      %cst_210 = arith.constant dense<0.000000e+00> : vector<1x256xf32>
      %317 = tpu.matmul %238, %316, %cst_210 {dimension_numbers = #tpu.dot_dimension_numbers<[1], [0], [0], [1], [0, 0, 1, 1], [], []>} : vector<1x8xf32>, vector<8x256xf32>, vector<1x256xf32> -> vector<1x256xf32>
      %318 = vector.broadcast %239 : vector<1x1xf32> to vector<1x256xf32>
      %319 = arith.addf %317, %318 : vector<1x256xf32>
      %c0_211 = arith.constant 0 : index
      %c1280_212 = arith.constant 1280 : index
      %320 = vector.load %arg20[%c0_211, %c1280_212] : memref<8x2048xf32, #tpu.memory_space<vmem>>, vector<8x256xf32>
      %321 = vector.broadcast %233 : vector<1x256xf32> to vector<8x256xf32>
      %322 = arith.mulf %320, %321 : vector<8x256xf32>
      %cst_213 = arith.constant dense<0.000000e+00> : vector<16x256xf32>
      %323 = tpu.matmul %234, %322, %cst_213 {dimension_numbers = #tpu.dot_dimension_numbers<[1], [0], [0], [1], [0, 0, 1, 1], [], []>} : vector<16x8xf32>, vector<8x256xf32>, vector<16x256xf32> -> vector<16x256xf32>
      %324 = vector.broadcast %235 : vector<16x1xf32> to vector<16x256xf32>
      %325 = arith.addf %323, %324 : vector<16x256xf32>
      %cst_214 = arith.constant 0.000000e+00 : f32
      %326 = vector.broadcast %cst_214 : f32 to vector<16x256xf32>
      %327 = arith.maximumf %325, %326 : vector<16x256xf32>
      %cst_215 = arith.constant dense<0.000000e+00> : vector<8x256xf32>
      %328 = tpu.matmul %236, %327, %cst_215 {dimension_numbers = #tpu.dot_dimension_numbers<[1], [0], [0], [1], [0, 0, 1, 1], [], []>} : vector<8x16xf32>, vector<16x256xf32>, vector<8x256xf32> -> vector<8x256xf32>
      %329 = vector.broadcast %237 : vector<8x1xf32> to vector<8x256xf32>
      %330 = arith.addf %328, %329 : vector<8x256xf32>
      %cst_216 = arith.constant 0.000000e+00 : f32
      %331 = vector.broadcast %cst_216 : f32 to vector<8x256xf32>
      %332 = arith.maximumf %330, %331 : vector<8x256xf32>
      %cst_217 = arith.constant dense<0.000000e+00> : vector<1x256xf32>
      %333 = tpu.matmul %238, %332, %cst_217 {dimension_numbers = #tpu.dot_dimension_numbers<[1], [0], [0], [1], [0, 0, 1, 1], [], []>} : vector<1x8xf32>, vector<8x256xf32>, vector<1x256xf32> -> vector<1x256xf32>
      %334 = vector.broadcast %239 : vector<1x1xf32> to vector<1x256xf32>
      %335 = arith.addf %333, %334 : vector<1x256xf32>
      %c0_218 = arith.constant 0 : index
      %c1536_219 = arith.constant 1536 : index
      %336 = vector.load %arg20[%c0_218, %c1536_219] : memref<8x2048xf32, #tpu.memory_space<vmem>>, vector<8x256xf32>
      %337 = vector.broadcast %233 : vector<1x256xf32> to vector<8x256xf32>
      %338 = arith.mulf %336, %337 : vector<8x256xf32>
      %cst_220 = arith.constant dense<0.000000e+00> : vector<16x256xf32>
      %339 = tpu.matmul %234, %338, %cst_220 {dimension_numbers = #tpu.dot_dimension_numbers<[1], [0], [0], [1], [0, 0, 1, 1], [], []>} : vector<16x8xf32>, vector<8x256xf32>, vector<16x256xf32> -> vector<16x256xf32>
      %340 = vector.broadcast %235 : vector<16x1xf32> to vector<16x256xf32>
      %341 = arith.addf %339, %340 : vector<16x256xf32>
      %cst_221 = arith.constant 0.000000e+00 : f32
      %342 = vector.broadcast %cst_221 : f32 to vector<16x256xf32>
      %343 = arith.maximumf %341, %342 : vector<16x256xf32>
      %cst_222 = arith.constant dense<0.000000e+00> : vector<8x256xf32>
      %344 = tpu.matmul %236, %343, %cst_222 {dimension_numbers = #tpu.dot_dimension_numbers<[1], [0], [0], [1], [0, 0, 1, 1], [], []>} : vector<8x16xf32>, vector<16x256xf32>, vector<8x256xf32> -> vector<8x256xf32>
      %345 = vector.broadcast %237 : vector<8x1xf32> to vector<8x256xf32>
      %346 = arith.addf %344, %345 : vector<8x256xf32>
      %cst_223 = arith.constant 0.000000e+00 : f32
      %347 = vector.broadcast %cst_223 : f32 to vector<8x256xf32>
      %348 = arith.maximumf %346, %347 : vector<8x256xf32>
      %cst_224 = arith.constant dense<0.000000e+00> : vector<1x256xf32>
      %349 = tpu.matmul %238, %348, %cst_224 {dimension_numbers = #tpu.dot_dimension_numbers<[1], [0], [0], [1], [0, 0, 1, 1], [], []>} : vector<1x8xf32>, vector<8x256xf32>, vector<1x256xf32> -> vector<1x256xf32>
      %350 = vector.broadcast %239 : vector<1x1xf32> to vector<1x256xf32>
      %351 = arith.addf %349, %350 : vector<1x256xf32>
      %c0_225 = arith.constant 0 : index
      %c1792_226 = arith.constant 1792 : index
      %352 = vector.load %arg20[%c0_225, %c1792_226] : memref<8x2048xf32, #tpu.memory_space<vmem>>, vector<8x256xf32>
      %353 = vector.broadcast %233 : vector<1x256xf32> to vector<8x256xf32>
      %354 = arith.mulf %352, %353 : vector<8x256xf32>
      %cst_227 = arith.constant dense<0.000000e+00> : vector<16x256xf32>
      %355 = tpu.matmul %234, %354, %cst_227 {dimension_numbers = #tpu.dot_dimension_numbers<[1], [0], [0], [1], [0, 0, 1, 1], [], []>} : vector<16x8xf32>, vector<8x256xf32>, vector<16x256xf32> -> vector<16x256xf32>
      %356 = vector.broadcast %235 : vector<16x1xf32> to vector<16x256xf32>
      %357 = arith.addf %355, %356 : vector<16x256xf32>
      %cst_228 = arith.constant 0.000000e+00 : f32
      %358 = vector.broadcast %cst_228 : f32 to vector<16x256xf32>
      %359 = arith.maximumf %357, %358 : vector<16x256xf32>
      %cst_229 = arith.constant dense<0.000000e+00> : vector<8x256xf32>
      %360 = tpu.matmul %236, %359, %cst_229 {dimension_numbers = #tpu.dot_dimension_numbers<[1], [0], [0], [1], [0, 0, 1, 1], [], []>} : vector<8x16xf32>, vector<16x256xf32>, vector<8x256xf32> -> vector<8x256xf32>
      %361 = vector.broadcast %237 : vector<8x1xf32> to vector<8x256xf32>
      %362 = arith.addf %360, %361 : vector<8x256xf32>
      %cst_230 = arith.constant 0.000000e+00 : f32
      %363 = vector.broadcast %cst_230 : f32 to vector<8x256xf32>
      %364 = arith.maximumf %362, %363 : vector<8x256xf32>
      %cst_231 = arith.constant dense<0.000000e+00> : vector<1x256xf32>
      %365 = tpu.matmul %238, %364, %cst_231 {dimension_numbers = #tpu.dot_dimension_numbers<[1], [0], [0], [1], [0, 0, 1, 1], [], []>} : vector<1x8xf32>, vector<8x256xf32>, vector<1x256xf32> -> vector<1x256xf32>
      %366 = vector.broadcast %239 : vector<1x1xf32> to vector<1x256xf32>
      %367 = arith.addf %365, %366 : vector<1x256xf32>
      %368 = tpu.concatenate %255, %271, %287, %303, %319, %335, %351, %367 in 0 : vector<1x256xf32>, vector<1x256xf32>, vector<1x256xf32>, vector<1x256xf32>, vector<1x256xf32>, vector<1x256xf32>, vector<1x256xf32>, vector<1x256xf32> -> vector<8x256xf32>
      %c0_232 = arith.constant 0 : index
      %c0_233 = arith.constant 0 : index
      %c0_234 = arith.constant 0 : index
      %369 = vector.load %arg18[%c0_232, %c0_233, %c0_234] : memref<1x8x256xf32, #tpu.memory_space<vmem>>, vector<1x8x256xf32>
      %370 = vector.shape_cast %369 : vector<1x8x256xf32> to vector<8x256xf32>
      %371 = vector.shape_cast %368 : vector<8x256xf32> to vector<1x8x256xf32>
      tpu.vector_store %arg18[%c0_232, %c0_233, %c0_234], %371 {strides = array<i32>} : memref<1x8x256xf32, #tpu.memory_space<vmem>>, vector<1x8x256xf32>,
    } else {
    }
    return
  }
  func.func @transform_0(%arg0: i32, %arg1: i32, %arg2: i32) -> (i32, i32, i32, i32, i32) {
    %c0_i32 = arith.constant 0 : i32
    %c0_i32_0 = arith.constant 0 : i32
    %c0_i32_1 = arith.constant 0 : i32
    return %arg0, %arg2, %arg1, %c0_i32, %c0_i32_0 : i32, i32, i32, i32, i32
  }
  func.func @transform_1(%arg0: i32, %arg1: i32, %arg2: i32) -> (i32, i32, i32, i32) {
    %c0_i32 = arith.constant 0 : i32
    %c0_i32_0 = arith.constant 0 : i32
    %c0_i32_1 = arith.constant 0 : i32
    return %arg0, %arg1, %c0_i32, %c0_i32_0 : i32, i32, i32, i32
  }
  func.func @transform_2(%arg0: i32, %arg1: i32, %arg2: i32) -> (i32, i32) {
    %c0_i32 = arith.constant 0 : i32
    %c0_i32_0 = arith.constant 0 : i32
    %c0_i32_1 = arith.constant 0 : i32
    return %c0_i32, %c0_i32_0 : i32, i32
  }
  func.func @transform_3(%arg0: i32, %arg1: i32, %arg2: i32) -> (i32, i32) {
    %c0_i32 = arith.constant 0 : i32
    %c0_i32_0 = arith.constant 0 : i32
    %c0_i32_1 = arith.constant 0 : i32
    return %c0_i32, %c0_i32_0 : i32, i32
  }
  func.func @transform_4(%arg0: i32, %arg1: i32, %arg2: i32) -> (i32, i32) {
    %c0_i32 = arith.constant 0 : i32
    %c0_i32_0 = arith.constant 0 : i32
    %c0_i32_1 = arith.constant 0 : i32
    return %c0_i32, %c0_i32_0 : i32, i32
  }
  func.func @transform_5(%arg0: i32, %arg1: i32, %arg2: i32) -> (i32, i32) {
    %c0_i32 = arith.constant 0 : i32
    %c0_i32_0 = arith.constant 0 : i32
    %c0_i32_1 = arith.constant 0 : i32
    return %c0_i32, %c0_i32_0 : i32, i32
  }
  func.func @transform_6(%arg0: i32, %arg1: i32, %arg2: i32) -> (i32, i32) {
    %c0_i32 = arith.constant 0 : i32
    %c0_i32_0 = arith.constant 0 : i32
    %c0_i32_1 = arith.constant 0 : i32
    return %c0_i32, %c0_i32_0 : i32, i32
  }
  func.func @transform_7(%arg0: i32, %arg1: i32, %arg2: i32) -> (i32, i32) {
    %c0_i32 = arith.constant 0 : i32
    %c0_i32_0 = arith.constant 0 : i32
    %c0_i32_1 = arith.constant 0 : i32
    return %c0_i32, %c0_i32_0 : i32, i32
  }
  func.func @transform_8(%arg0: i32, %arg1: i32, %arg2: i32) -> (i32, i32) {
    %c0_i32 = arith.constant 0 : i32
    %c0_i32_0 = arith.constant 0 : i32
    %c0_i32_1 = arith.constant 0 : i32
    return %c0_i32, %c0_i32_0 : i32, i32
  }
  func.func @transform_9(%arg0: i32, %arg1: i32, %arg2: i32) -> (i32, i32) {
    %c0_i32 = arith.constant 0 : i32
    %c0_i32_0 = arith.constant 0 : i32
    %c0_i32_1 = arith.constant 0 : i32
    return %c0_i32, %c0_i32_0 : i32, i32
  }
  func.func @transform_10(%arg0: i32, %arg1: i32, %arg2: i32) -> (i32, i32) {
    %c0_i32 = arith.constant 0 : i32
    %c0_i32_0 = arith.constant 0 : i32
    %c0_i32_1 = arith.constant 0 : i32
    return %c0_i32, %c0_i32_0 : i32, i32
  }
  func.func @transform_11(%arg0: i32, %arg1: i32, %arg2: i32) -> (i32, i32) {
    %c0_i32 = arith.constant 0 : i32
    %c0_i32_0 = arith.constant 0 : i32
    %c0_i32_1 = arith.constant 0 : i32
    return %c0_i32, %c0_i32_0 : i32, i32
  }
  func.func @transform_12(%arg0: i32, %arg1: i32, %arg2: i32) -> (i32, i32) {
    %c0_i32 = arith.constant 0 : i32
    %c0_i32_0 = arith.constant 0 : i32
    %c0_i32_1 = arith.constant 0 : i32
    return %c0_i32, %c0_i32_0 : i32, i32
  }
  func.func @transform_13(%arg0: i32, %arg1: i32, %arg2: i32) -> (i32, i32) {
    %c0_i32 = arith.constant 0 : i32
    %c0_i32_0 = arith.constant 0 : i32
    %c0_i32_1 = arith.constant 0 : i32
    return %c0_i32, %c0_i32_0 : i32, i32
  }
  func.func @transform_14(%arg0: i32, %arg1: i32, %arg2: i32) -> (i32, i32, i32, i32) {
    %c0_i32 = arith.constant 0 : i32
    %c0_i32_0 = arith.constant 0 : i32
    return %arg0, %arg2, %c0_i32, %arg1 : i32, i32, i32, i32
  }
  func.func @transform_15(%arg0: i32, %arg1: i32, %arg2: i32) -> (i32, i32, i32) {
    %c0_i32 = arith.constant 0 : i32
    %c0_i32_0 = arith.constant 0 : i32
    return %arg0, %c0_i32, %arg1 : i32, i32, i32
  }
}

</mosaic_0001>

<bundles_post_ra>
// kernel: tpu_custom_call.1
= control target key start
LH: loop header
LB: loop body
LE: loop exit
PB: predicated region body
PF: predicated region fallthrough
CT: control target
= control target key end

     0   :  { %s6024_s0 = inlined_call_operand.hbm [shape: bf16[2,2,1,16,2048], index: 0, kind: input, shape index: {}]   ;;  %s6025_s1 = inlined_call_operand.vmem [shape: bf16[2,1,16,256], index: 1, kind: input, shape index: {}]   ;;  %s6026_s2 = inlined_call_operand.vmem [shape: bf16[24,16], index: 2, kind: input, shape index: {}]   ;;  %s6027_s3 = inlined_call_operand.vmem [shape: f32[16,1], index: 3, kind: input, shape index: {}]   ;;  %s6028_s4 = inlined_call_operand.vmem [shape: f32[8,16], index: 4, kind: input, shape index: {}]   ;;  %s6029_s5 = inlined_call_operand.vmem [shape: f32[8,1], index: 5, kind: input, shape index: {}]   ;;  %s6030_s6 = inlined_call_operand.vmem [shape: f32[1,8], index: 6, kind: input, shape index: {}]   ;;  %s6031_s7 = inlined_call_operand.<no memory space> [shape: f32[1,1], index: 7, kind: input, shape index: {}]   ;;  %s6032_s8 = inlined_call_operand.vmem [shape: f32[16,8], index: 8, kind: input, shape index: {}]   ;;  %s6033_s9 = inlined_call_operand.vmem [shape: f32[16,1], index: 9, kind: input, shape index: {}]   ;;  %s6034_s10 = inlined_call_operand.vmem [shape: f32[8,16], index: 10, kind: input, shape index: {}]   ;;  %s6035_s11 = inlined_call_operand.vmem [shape: f32[8,1], index: 11, kind: input, shape index: {}]   ;;  %s6036_s12 = inlined_call_operand.vmem [shape: f32[1,8], index: 12, kind: input, shape index: {}]   ;;  %s6037_s14 = inlined_call_operand.hbm [shape: f32[2,2,1,256], index: 14, kind: output, shape index: {0}]   ;;  %s6038_s15 = inlined_call_operand.hbm [shape: f32[2,8,256], index: 15, kind: output, shape index: {1}]   ;;  %s6039_s13 = inlined_call_operand.<no memory space> [shape: f32[1,1], index: 13, kind: input, shape index: {}]  }
   0x1   :  { %6055 = sst [smem:[#allocation27_spill]] %s6024_s0  ;;  %v21_v0 = vstv %s6031_s7  ;;  %v23_v1 = vstv %s6039_s13 }
   0x2   :  { %6056 = sst [smem:[#allocation28_spill]] %s6025_s1  ;;  %22 = vst [vmem:[#allocation5] sm:$0x1] %v21_v0  ;;  %24 = vst [vmem:[#allocation6] sm:$0x1] %v23_v1 }
   0x3   :  { %6057 = sst [smem:[#allocation29_spill]] %s6026_s2 }
   0x4   :  { %6058 = sst [smem:[#allocation30_spill]] %s6032_s8 }
   0x5   :  { %6059 = sst [smem:[#allocation31_spill]] %s6033_s9 }
   0x6   :  { %6060 = sst [smem:[#allocation32_spill]] %s6034_s10 }
   0x7   :  { %6061 = sst [smem:[#allocation33_spill]] %s6035_s11 }
   0x8   :  { %6062 = sst [smem:[#allocation34_spill]] %s6036_s12 }
   0x9   :  { %6063 = sst [smem:[#allocation35_spill]] %s6037_s14 }
   0xa   :  { %6064 = sst [smem:[#allocation36_spill]] %s6038_s15 }
   0xb   :  { %25 = vsyncpa [#allocation8], 0 }
   0xc   :  { %27 = vsyncpa [#allocation8 + $0x1], 0 }
   0xd   :  { %28 = vsyncpa [#allocation9], 0 }
   0xe   :  { %30 = vsyncpa [#allocation9 + $0x1], 0 }
   0xf   :  { %31 = vsyncpa [#allocation12], 0 }
  0x10   :  { %33 = vsyncpa [#allocation12 + $0x1], 0  ;;  %s5241_s22 = smov 0   ;;  %s5243_s23 = smov 0  }
  0x11   :  { %s5245_s24 = smov 0   ;;  %s5247_s25 = smov 0  }
  0x12   :  { %s5249_s7 = smov 0   ;;  %s5251_s26 = smov 0  }
  0x13   :  { %s5253_s13 = smov 0   ;;  %s5255_s27 = smov 0  }
  0x14   :  { %s5257_s28 = smov 0   ;;  %s5259_s29 = smov 0  }
  0x15   :  { %s5261_s30 = smov 0  }
  0x16 LB: > { %6065 = sst [smem:[#allocation16_spill]] %s5101_s22  ;;  %s4720_s16 = sadd.s32 4294967295, %s5141_s30   ;;  %s5141_s30 = sphi %s5261_s30, %s39_s30   ;;  %s5137_s29 = sphi %s5259_s29, %s6121_s29   ;;  %s5133_s28 = sphi %s5257_s28, %s6112_s28   ;;  %s5129_s27 = sphi %s5255_s27, %s6120_s27   ;;  %s5125_s13 = sphi %s5253_s13, %s6119_s13   ;;  %s5121_s26 = sphi %s5251_s26, %s6118_s26   ;;  %s5117_s7 = sphi %s5249_s7, %s6117_s7   ;;  %s5113_s25 = sphi %s5247_s25, %s6116_s25   ;;  %s5109_s24 = sphi %s5245_s24, %s6109_s24   ;;  %s5105_s23 = sphi %s5243_s23, %s6115_s23   ;;  %s5101_s22 = sphi %s5241_s22, %s6114_s22  }
  0x17   : > { %6066 = sst [smem:[#allocation17_spill]] %s5109_s24  ;;  %s4721_s17 = sadd.s32 4294967294, %s5141_s30  }
  0x18   : > { %6067 = sst [smem:[#allocation18_spill]] %s5113_s25  ;;  %s51_s18 = sadd.s32 1, %s5133_s28 }
  0x19   : > { %6068 = sst [smem:[#allocation19_spill]] %s5133_s28  ;;  %s58_s19 = sadd.s32 1, %s5137_s29 }
  0x1a   : > { %p52_p0 = scmp.ge.s32.totalorder %s51_s18, 2  ;;  %s69_s20 = sadd.s32 1, %s5121_s26 }
  0x1b   : > { %p76_p1 = scmp.ne.s32.totalorder %s5121_s26, %s5117_s7  ;;  %p77_p2 = scmp.eq.s32.totalorder %s5141_s30, 0 }
  0x1c   : > { %s6123_s18 = smov (%p52_p0, %s51_s18), 0  ;;  %s6125_s19 = smov (!%p52_p0, %s58_s19), %s5137_s29 }
  0x1d   : > { %6069 = sst [smem:[#allocation20_spill]] %s6123_s18  ;;  %s63_s21 = ssub.s32 %s5133_s28, %s6123_s18 }
  0x1e   : > { %p5309_p3 = por %p77_p2, %p76_p1  ;;  %p60_p4 = scmp.ge.s32.totalorder %s6125_s19, 2 }
  0x1f   : > { %p82_p5 = scmp.ne.s32.totalorder %s5117_s7, %s5113_s25  ;;  %p83_p6 = scmp.eq.s32.totalorder %s4720_s16, 0 }
  0x20   : > { %p5315_p7 = scmp.eq.s32.totalorder %s4720_s16, 3  ;;  %s6127_s19 = smov (%p60_p4, %s6125_s19), 0 }
  0x21   : > { %6072 = sst [smem:[#allocation21_spill]] %s6127_s19  ;;  %p5321_p8 = por %p83_p6, %p82_p5 }
  0x22   : > { %p5327_p9 = por %p5315_p7, %p76_p1  ;;  %s62_s16 = ssub.s32 %s5137_s29, %s6127_s19 }
  0x23   : > { %p396_p10 = scmp.eq.s32.totalorder %s4721_s17, 3  ;;  %s64_s12 = sor.u32 %s63_s21, %s62_s16 }
  0x24   : > { %s6074_s25 = scalar_select %p5327_p9, 1, 0 }
  0x25   : > { %p405_p11 = scmp.eq.s32.totalorder %s62_s16, 0  ;;  %p67_p12 = scmp.eq.s32.totalorder %s64_s12, 0 }
  0x26   : > { %6075 = sst [smem:[#allocation22_spill]] %s6074_s25  ;;  %p5333_p13 = por %p396_p10, %p82_p5 }
  0x27   : > { %s407_s11 = sadd.s32 1, %s5109_s24  ;;  %p417_p0 = scmp.ne.s32.totalorder %s5109_s24, %s5105_s23 }
  0x28   : > { %s6076_s10 = scalar_select %p5333_p13, 1, 0 }
  0x29   : > { %s5341_s8 = scalar_select %p67_p12, %s5121_s26, %s69_s20  }
  0x2a   : > { %6077 = sst [smem:[#allocation23_spill]] %s6076_s10  ;;  %p5348_p1 = por %p417_p0, %p5315_p7 }
  0x2b   : > { %6078 = sst [smem:[#allocation24_spill]] %s5341_s8  ;;  %p423_p2 = scmp.ne.s32.totalorder %s5105_s23, %s5101_s22 }
  0x2c   : > { %s5344_s9 = scalar_select %p405_p11, %s5109_s24, %s407_s11  }
  0x2d   : > { %p4848_p4 = scmp.lt.s32.totalorder %s5141_s30, 4  ;;  %p5355_p6 = por %p423_p2, %p396_p10 }
  0x2e   : > { %6079 = sst [smem:[#allocation25_spill]] %s5344_s9  ;;  %s480_s17 = sand.u32 1, %s5121_s26  }
  0x2f   : > { %s6081_s12 = scalar_select %p5355_p6, 1, 0 }
  0x30   : > { %s4724_s21 = sshll.u32 %s480_s17, 7  ;;  %s4725_s16 = sshll.u32 %s5133_s28, 5 }
  0x31   : > { %6082 = sst [smem:[#allocation26_spill]] %s6081_s12  ;;  %s4726_s10 = sshll.u32 %s5137_s29, 6 }
  0x32   : > { %s484_s25 = scalar_lea.vmem [#allocation7], %s4724_s21  ;;  %s492_s8 = sadd.s32 %s4726_s10, %s4725_s16 }
  0x33   : > { %s495_s20 = sshll.u32 %s484_s25, 4  ;;  %s4727_s11 = sshll.u32 %s492_s8, 6  ;;  %s496_s20 = int_to_ptr.vmem [resolvable:$true] %s495_s20 }
  0x34   : > { %p5364_p5 = pnand %p4848_p4, %p5309_p3  ;;  %s6084_s0 = sld [smem:[#allocation27_spill]] }
  0x35   : > { %s481_s12 = scalar_lea.sflag [#allocation8], %s480_s17  ;;  %s4976_s28 = scalar_lea.vmem %s496_s20, 2048 }
  0x36   : > { %p4965_p7 = pneg %p5364_p5  ;;  %p4977_p10 = scmp.ne.s32.totalorder %s496_s20, %s4976_s28 }
  0x37   : > { %s5143_s10 = smov [#allocation7]  }
  0x38   : > { %p4979_p11 = pnand %p4977_p10, %p4965_p7  ;;  %s4981_s25 = sshll.u32 %s5143_s10, 4  ;;  %s4982_s25 = int_to_ptr.vmem [resolvable:$false] %s4981_s25 }
  0x39   : > { %s4983_s8 = scalar_lea.vmem %s4982_s25, 4096  ;;  %p4984_p3 = scmp.lt.s32.totalorder %s496_s20, %s4982_s25 }
  0x3a   : > { %s494_s22 = scalar_lea.hbm %s6084_s0, %s4727_s11  ;;  %p4980_p12 = pneg %p4979_p11 }
  0x3b   : > { %p4985_p0 = scmp.lt.s32.totalorder %s4983_s8, %s4976_s28 }
  0x3d   : > { %p4986_p2 = por %p4985_p0, %p4984_p3 }
  0x3f   : > { %p4987_p4 = pnand %p4986_p2, %p4980_p12 }
  0x41   : > { %4990 = shalt.err (!%p4987_p4)
}
  0x42   : > { %s5144_s15 = smov 1024   ;;  %s5145_s9 = smov 64  }
  0x43   : > { %4840 = dma.hbm_to_vmem [thread:$0]  (!%p5364_p5), %s494_s22, 2048, %s496_s20, %s481_s12, %s5144_s15, %s5144_s15, %s5145_s9  }
  0x44   : > { %p4728_p6 = scmp.ge.s32.totalorder %s5141_s30, 1  ;;  %p515_p13 = scmp.lt.s32.totalorder %s5141_s30, 5 }
  0x46   : > { %p516_p7 = pnand %p4728_p6, %p515_p13 }
  0x47   : > { %s5378_s24 = sand.u32 (!%p516_p7), 1, %s5117_s7  }
  0x48   : > { %519 = sbr.rel (%p516_p7) target bundleno = 5801 (0x16a9), region = 76  ;;  %s4729_s28 = sshll.u32 (!%p516_p7), %s5378_s24, 7 }
  0x49   : > { %s522_s17 = scalar_lea.sflag (!%p516_p7), [#allocation8], %s5378_s24  ;;  %s5382_s21 = scalar_lea.vmem (!%p516_p7), [#allocation7], %s4729_s28 }
  0x4d   : > { %5088 = dma.done.wait (%p5321_p8), %s522_s17, 2048  }
  0x4e   : > { %5090 = vsyncadd (%p5321_p8), %s522_s17, 4294965248  ;;  %s4730_s22 = sshll.u32 %s5378_s24, 1  ;;  %s6054_s12 = sand.u32 1, %s5105_s23  }
  0x4f   : > { %s4731_s16 = sshll.u32 %s6054_s12, 4  ;;  %p586_p13 = scmp.lt.s32.totalorder %s5129_s27, 1 }
  0x50   : > { %s6085_s1 = sld [smem:[#allocation28_spill]]  ;;  %s5397_s8 = scalar_lea.vmem [#allocation10], %s4730_s22 }
  0x51   : > { %s587_s20 = scalar_select %p586_p13, %s5129_s27, 1 }
  0x52   : > { %s5399_s18 = scalar_lea.vmem [#allocation11], %s4731_s16  ;;  %p4734_p8 = scmp.ne.s32.totalorder %s5125_s13, 0 }
  0x53   : > { %s4829_s11 = sshll.u32 %s587_s20, 4 }
  0x54   : > { %601 = sbr.rel (%p4734_p8) target bundleno = 99 (0x63), region = 84 }
  0x56   : > { %s594_s25 = scalar_lea.vmem %s6085_s1, %s4829_s11 }
  0x59   : > { %v618_v2 = vlaneseq  ;;  %v5146_v3 = vmov 0.0   ;;  %v5147_v4 = vmov 1e-05  }
  0x5a   : > { %602 = vst [vmem:[#allocation3 + $0x30] sm:$0xff] %v5146_v3  ;;  %603 = vst [vmem:[#allocation3] sm:$0xff] %v5146_v3 }
  0x5b   : > { %604 = vst [vmem:[#allocation3 + $0x58] sm:$0xff] %v5146_v3  ;;  %605 = vst [vmem:[#allocation3 + $0x18] sm:$0xff] %v5146_v3  ;;  %vm620_vm0 = vcmp.lt.s32.totalorder %v618_v2, 256 }
  0x5c   : > { %606 = vst [vmem:[#allocation3 + $0x50] sm:$0xff] %v5146_v3  ;;  %607 = vst [vmem:[#allocation3 + $0x68] sm:$0xff] %v5146_v3 }
  0x5d   : > { %608 = vst [vmem:[#allocation3 + $0x8] sm:$0xff] %v5146_v3  ;;  %609 = vst [vmem:[#allocation3 + $0x48] sm:$0xff] %v5146_v3 }
  0x5e   : > { %610 = vst [vmem:[#allocation3 + $0x40] sm:$0xff] %v5146_v3  ;;  %611 = vst [vmem:[#allocation3 + $0x20] sm:$0xff] %v5146_v3 }
  0x5f   : > { %612 = vst [vmem:[#allocation3 + $0x10] sm:$0xff] %v5146_v3  ;;  %613 = vst [vmem:[#allocation3 + $0x38] sm:$0xff] %v5146_v3 }
  0x60   : > { %614 = vst [vmem:[#allocation3 + $0x60] sm:$0xff] %v5146_v3  ;;  %615 = vst [vmem:[#allocation3 + $0x70] sm:$0xff] %v5146_v3 }
  0x61   : > { %616 = vst [vmem:[#allocation3 + $0x78] sm:$0xff] %v5146_v3  ;;  %617 = vst [vmem:[#allocation3 + $0x28] sm:$0xff] %v5146_v3 }
  0x62   : > { %622 = vst.msk [vmem:[#allocation4] sm:$0x3] %vm620_vm0, %v5147_v4 }
  0x63 PF: > { %v5402_v5 = vld [vmem:[%s594_s25] sm:$0xff]  ;;  %v5404_v6 = vld [vmem:[%s594_s25 + $0x8] sm:$0xff]  ;;  %v5148_v10 = vmov 0   ;;  %s6086_s2 = sld [smem:[#allocation29_spill]]  ;;  %vm656_vm1 = vcmask 130048   ;;  %v5149_v18 = vmov 0.0  }
  0x64   : > { %v634_v7 = vld [vmem:[%s5382_s21] sm:$0xff]  ;;  %695 = vmatprep.mubr.bf16.mxu0 %v5148_v10  ;;  %4947 = vset.pattern.permute.xlu0 %v5148_v10  ;;  %v633_v20 = vld [vmem:[#allocation5] sm:$0x1]  ;;  %v899_v40 = vld [vmem:[%s5382_s21 + $0x8] sm:$0xff]  ;;  %vm824_vm2 = vcmask 64512   ;;  %p4787_p6 = scmp.ne.s32.totalorder %s5125_s13, 1 }
  0x65   : > { %v635_v8 = vld [vmem:[%s5382_s21 + $0x40] sm:$0xff]  ;;  %v636_v9 = vmul.bf16 %v634_v7, %v5402_v5  ;;  %4948 = vset.pattern.permute.xlu1 %v5148_v10  ;;  %806 = vmatprep.mubr.f32.mxu1 %v5149_v18  ;;  %v900_v41 = vld [vmem:[%s5382_s21 + $0x48] sm:$0xff]  ;;  %v901_v44 = vmul.bf16 %v899_v40, %v5402_v5  ;;  %v5470_v52 = vld [vmem:[%s6030_s6] sm:$0x1]  ;;  %s6089_s22 = sld [smem:[#allocation31_spill]] (!%p4787_p6) }
  0x66   : > { %v637_v11 = vmul.bf16 %v635_v8, %v5404_v6  ;;  %v629_v12 = vld [vmem:[%s6027_s3 + $0x8] sm:$0xff]  ;;  %v628_v15 = vld [vmem:[%s6027_s3] sm:$0xff]  ;;  %v902_v45 = vmul.bf16 %v900_v41, %v5404_v6  ;;  %s6091_s25 = sld [smem:[#allocation30_spill]] (!%p4787_p6) }
  0x67   : > { %723 = vperm.xlu0 %4947, %v629_v12   ;;  %v631_v19 = vld [vmem:[%s6029_s5] sm:$0xff]  ;;  %v1121_v12 = vld [vmem:[%s5382_s21 + $0x50] sm:$0xff]  ;;  %s6094_s14 = sld [smem:[#allocation32_spill]] (!%p4787_p6) }
  0x68   : > { %v4738_v13 = vcombine.high %v636_v9, %v637_v11  ;;  %v4737_v14 = vcombine.low %v636_v9, %v637_v11  ;;  %736 = vperm.xlu1 %4948, %v631_v19   ;;  %v5454_v39 = vld [vmem:[%s6028_s4] sm:$0xff]  ;;  %v4744_v50 = vcombine.high %v901_v44, %v902_v45  ;;  %v4743_v53 = vcombine.low %v901_v44, %v902_v45  ;;  %v1120_v11 = vld [vmem:[%s5382_s21 + $0x10] sm:$0xff]  ;;  %s6095_s9 = sld [smem:[#allocation34_spill]] (!%p4787_p6) }
  0x69   : > { %v5422_v16 = vld [vmem:[%s6086_s2] sm:$0xff]   ;;  %v5430_v17 = vld [vmem:[%s6086_s2 + $0x8] ss:$0 sps:$4 sm:$0xff]  }
  0x6a   : > { %677 = vmatprep.subr.bf16.mxu0 %v4738_v13 }
  0x6b   : > { %678 = vmatpush1.bf16.msra.mxu0 %v4737_v14  ;;  %718 = vperm.xlu0 %4947, %v628_v15   ;;  %v1122_v14 = vmul.bf16 %v1120_v11, %v5402_v5  ;;  %v1123_v15 = vmul.bf16 %v1121_v12, %v5404_v6  ;;  %s6090_s16 = smov (!%p4787_p6), %s6089_s22 }
  0x6c   : > { %817 = vperm.xlu1 %4948, %v633_v20   ;;  %s6092_s15 = smov (!%p4787_p6), %s6091_s25 }
  0x6e   : > { %4739 = vmatmul.mubr.msk.bf16.vlgmr.msra.gmra.mxu0 %vm656_vm1, %v5422_v16 }
  0x6f   : > { %705 = vmatprep.mubr.bf16.mxu0 %v5148_v10 }
  0x76   : > { %4740 = vmatmul.mubr.msk.bf16.gmra.mxu0 %vm656_vm1, %v5430_v17 }
  0x77   : > { %1038 = vmatprep.mubr.f32.mxu0 %v5149_v18 }
  0xe2   : > { %v5443_v23 = vpop.permute.xlu0 %723 }
  0xe3   : > { %v5461_v43 = vpop.permute.xlu1 %736 }
  0xe6   : > { %v5445_v27 = vpop.permute.xlu0 %718 }
 0x12e   : > { %v5439_v21 = vpop.f32.mrf.mxu0 }
 0x130   : > { %v5441_v22 = vpop.f32.mrf.mxu0 }
 0x132   : > { %v701_v24 = vpop.f32.mrf.mxu0 }
 0x133   : > { %v726_v32 = vadd.f32 %v5445_v27, %v701_v24 }
 0x134   : > { %v703_v25 = vpop.f32.mrf.mxu0 }
 0x135   : > { %v727_v30 = vadd.f32 %v5445_v27, %v703_v25  ;;  %v730_v38 = vmax.f32 %v726_v32, 0.0 }
 0x136   : > { %v707_v26 = vpop.f32.mrf.mxu0 }
 0x137   : > { %v728_v28 = vadd.f32 %v5443_v23, %v707_v26  ;;  %v731_v37 = vmax.f32 %v727_v30, 0.0  ;;  %v4750_v26 = vcombine.high %v1122_v14, %v1123_v15  ;;  %v820_v30 = vlaneseq }
 0x138   : > { %v709_v29 = vpop.f32.mrf.mxu0 }
 0x139   : > { %v729_v31 = vadd.f32 %v5443_v23, %v709_v29  ;;  %v732_v35 = vmax.f32 %v728_v28, 0.0  ;;  %v4749_v29 = vcombine.low %v1122_v14, %v1123_v15  ;;  %vm5700_vm3 = vcmp.lt.s32.totalorder %v820_v30, 256 }
 0x13a   : > { %v711_v33 = vpop.f32.mrf.mxu0 }
 0x13b   : > { %v733_v34 = vmax.f32 %v729_v31, 0.0  ;;  %v5508_v31 = vshrl.u32 %v820_v30, 7  ;;  %v818_v33 = vpop.permute.xlu1 %817  ;;  %v2553_v30 = vld [vmem:[#allocation3 + $0x70] sm:$0xff] }
 0x13c   : > { %v712_v36 = vpop.f32.mrf.mxu0 }
 0x13d   : > { %770 = vmatprep.subr.mxu1 %v733_v34  ;;  %v5511_v32 = vsub.s32 0, %v5508_v31 }
 0x13e   : > { %771 = vmatpush1.msra.mxu1 %v732_v35 }
 0x13f   : > { %772 = vmatprep.subr.mxu1 %v731_v37  ;;  %v5514_v34 = vrot.slane %v818_v33, %v5511_v32 }
 0x140   : > { %773 = vmatpush1.msra.mxu1 %v730_v38 }
 0x141   : > { %4741 = vmatmul.mubr.msk.f32.vlgmr.msra.gmra.mxu1 %vm656_vm1, %v5454_v39 }
 0x142   : > { %892 = vmatprep.mubr.f32.mxu1 %v5149_v18 }
 0x201   : > { %v808_v42 = vpop.f32.mrf.mxu1 }
 0x202   : > { %v809_v46 = vadd.f32 %v808_v42, %v5461_v43 }
 0x203   : > { %v810_v47 = vpop.f32.mrf.mxu1 }
 0x204   : > { %v811_v48 = vadd.f32 %v810_v47, %v5461_v43  ;;  %v813_v51 = vmax.f32 %v809_v46, 0.0 }
 0x206   : > { %v814_v49 = vmax.f32 %v811_v48, 0.0 }
 0x208   : > { %858 = vmatprep.subr.mxu1 %v814_v49 }
 0x209   : > { %859 = vmatpush1.msra.mxu1 %v813_v51 }
 0x20a   : > { %4742 = vmatmul.mubr.msk.f32.vlgmr.msra.gmra.mxu1 %vm824_vm2, %v5470_v52  ;;  %927 = vmatprep.subr.bf16.mxu1 %v4744_v50 }
 0x20b   : > { %928 = vmatpush1.bf16.msra.mxu1 %v4743_v53  ;;  %945 = vmatprep.mubr.bf16.mxu1 %v5148_v10 }
 0x20e   : > { %4745 = vmatmul.mubr.msk.bf16.vlgmr.msra.gmra.mxu1 %vm656_vm1, %v5422_v16 }
 0x20f   : > { %955 = vmatprep.mubr.bf16.mxu1 %v5148_v10 }
 0x216   : > { %4746 = vmatmul.mubr.msk.bf16.gmra.mxu1 %vm656_vm1, %v5430_v17 }
 0x217   : > { %1259 = vmatprep.mubr.f32.mxu1 %v5149_v18 }
 0x2ca   : > { %v894_v54 = vpop.f32.mrf.mxu1 }
 0x2cb   : > { %v895_v36 = vadd.f32 %v894_v54, %v5514_v34 }
 0x2cc   : > { %v896_v55 = vpop.f32.mrf.mxu1 }
 0x2cd   : > { %v897_v40 = vadd.f32 %v896_v55, %v5514_v34 }
 0x2ce   : > { %v5481_v56 = vpop.f32.mrf.mxu1 }
 0x2d0   : > { %v5483_v57 = vpop.f32.mrf.mxu1 }
 0x2d2   : > { %v951_v58 = vpop.f32.mrf.mxu1 }
 0x2d3   : > { %v966_v1 = vadd.f32 %v951_v58, %v5445_v27 }
 0x2d4   : > { %v953_v59 = vpop.f32.mrf.mxu1 }
 0x2d5   : > { %v967_v63 = vadd.f32 %v953_v59, %v5445_v27  ;;  %v970_v9 = vmax.f32 %v966_v1, 0.0  ;;  %v1342_v1 = vld [vmem:[%s5382_s21 + $0x58] sm:$0xff] }
 0x2d6   : > { %v957_v60 = vpop.f32.mrf.mxu1 }
 0x2d7   : > { %v968_v61 = vadd.f32 %v957_v60, %v5443_v23  ;;  %v971_v8 = vmax.f32 %v967_v63, 0.0 }
 0x2d8   : > { %v959_v62 = vpop.f32.mrf.mxu1 }
 0x2d9   : > { %v969_v0 = vadd.f32 %v959_v62, %v5443_v23  ;;  %v972_v4 = vmax.f32 %v968_v61, 0.0 }
 0x2da   : > { %v961_v2 = vpop.f32.mrf.mxu1 }
 0x2db   : > { %v973_v3 = vmax.f32 %v969_v0, 0.0  ;;  %v1341_v0 = vld [vmem:[%s5382_s21 + $0x18] sm:$0xff] }
 0x2dc   : > { %v962_v7 = vpop.f32.mrf.mxu1 }
 0x2dd   : > { %1002 = vmatprep.subr.mxu0 %v973_v3  ;;  %v1343_v3 = vmul.bf16 %v1341_v0, %v5402_v5 }
 0x2de   : > { %1003 = vmatpush1.msra.mxu0 %v972_v4  ;;  %v1344_v4 = vmul.bf16 %v1342_v1, %v5404_v6 }
 0x2df   : > { %1004 = vmatprep.subr.mxu0 %v971_v8 }
 0x2e0   : > { %1005 = vmatpush1.msra.mxu0 %v970_v9  ;;  %v4756_v12 = vcombine.high %v1343_v3, %v1344_v4  ;;  %v4755_v14 = vcombine.low %v1343_v3, %v1344_v4 }
 0x2e1   : > { %4747 = vmatmul.mubr.msk.f32.vlgmr.msra.gmra.mxu0 %vm656_vm1, %v5454_v39 }
 0x2e2   : > { %1111 = vmatprep.mubr.f32.mxu0 %v5149_v18 }
 0x3a1   : > { %v1040_v13 = vpop.f32.mrf.mxu0 }
 0x3a2   : > { %v1041_v19 = vadd.f32 %v1040_v13, %v5461_v43 }
 0x3a3   : > { %v1042_v20 = vpop.f32.mrf.mxu0 }
 0x3a4   : > { %v1043_v24 = vadd.f32 %v1042_v20, %v5461_v43  ;;  %v1045_v28 = vmax.f32 %v1041_v19, 0.0 }
 0x3a6   : > { %v1046_v25 = vmax.f32 %v1043_v24, 0.0 }
 0x3a8   : > { %1077 = vmatprep.subr.mxu0 %v1046_v25 }
 0x3a9   : > { %1078 = vmatpush1.msra.mxu0 %v1045_v28 }
 0x3aa   : > { %4748 = vmatmul.mubr.msk.f32.vlgmr.msra.gmra.mxu0 %vm824_vm2, %v5470_v52  ;;  %1148 = vmatprep.subr.bf16.mxu0 %v4750_v26 }
 0x3ab   : > { %1149 = vmatpush1.bf16.msra.mxu0 %v4749_v29  ;;  %1166 = vmatprep.mubr.bf16.mxu0 %v5148_v10 }
 0x3ae   : > { %4751 = vmatmul.mubr.msk.bf16.vlgmr.msra.gmra.mxu0 %vm656_vm1, %v5422_v16 }
 0x3af   : > { %1176 = vmatprep.mubr.bf16.mxu0 %v5148_v10 }
 0x3b6   : > { %4752 = vmatmul.mubr.msk.bf16.gmra.mxu0 %vm656_vm1, %v5430_v17 }
 0x3b7   : > { %1480 = vmatprep.mubr.f32.mxu0 %v5149_v18 }
 0x46a   : > { %v1113_v35 = vpop.f32.mrf.mxu0 }
 0x46b   : > { %v1114_v37 = vadd.f32 %v1113_v35, %v5514_v34 }
 0x46c   : > { %v1115_v38 = vpop.f32.mrf.mxu0 }
 0x46d   : > { %v1118_v41 = vmax.f32 %v895_v36, %v1114_v37  ;;  %v1116_v42 = vadd.f32 %v1115_v38, %v5514_v34 }
 0x46e   : > { %v5520_v44 = vpop.f32.mrf.mxu0 }
 0x46f   : > { %v1119_v45 = vmax.f32 %v897_v40, %v1116_v42 }
 0x470   : > { %v5522_v46 = vpop.f32.mrf.mxu0 }
 0x472   : > { %v1172_v47 = vpop.f32.mrf.mxu0 }
 0x473   : > { %v1187_v55 = vadd.f32 %v1172_v47, %v5445_v27 }
 0x474   : > { %v1174_v48 = vpop.f32.mrf.mxu0 }
 0x475   : > { %v1188_v53 = vadd.f32 %v1174_v48, %v5445_v27  ;;  %v1191_v63 = vmax.f32 %v1187_v55, 0.0 }
 0x476   : > { %v1178_v49 = vpop.f32.mrf.mxu0 }
 0x477   : > { %v1189_v50 = vadd.f32 %v1178_v49, %v5443_v23  ;;  %v1192_v62 = vmax.f32 %v1188_v53, 0.0  ;;  %v1562_v53 = vld [vmem:[%s5382_s21 + $0x20] sm:$0xff] }
 0x478   : > { %v1180_v51 = vpop.f32.mrf.mxu0 }
 0x479   : > { %v1190_v54 = vadd.f32 %v1180_v51, %v5443_v23  ;;  %v1193_v60 = vmax.f32 %v1189_v50, 0.0 }
 0x47a   : > { %v1182_v58 = vpop.f32.mrf.mxu0 }
 0x47b   : > { %v1194_v59 = vmax.f32 %v1190_v54, 0.0  ;;  %v1563_v54 = vld [vmem:[%s5382_s21 + $0x60] sm:$0xff]  ;;  %v1564_v58 = vmul.bf16 %v1562_v53, %v5402_v5 }
 0x47c   : > { %v1183_v61 = vpop.f32.mrf.mxu0 }
 0x47d   : > { %1223 = vmatprep.subr.mxu1 %v1194_v59  ;;  %v1565_v59 = vmul.bf16 %v1563_v54, %v5404_v6 }
 0x47e   : > { %1224 = vmatpush1.msra.mxu1 %v1193_v60 }
 0x47f   : > { %1225 = vmatprep.subr.mxu1 %v1192_v62  ;;  %v4762_v0 = vcombine.high %v1564_v58, %v1565_v59 }
 0x480   : > { %1226 = vmatpush1.msra.mxu1 %v1191_v63 }
 0x481   : > { %4753 = vmatmul.mubr.msk.f32.vlgmr.msra.gmra.mxu1 %vm656_vm1, %v5454_v39 }
 0x482   : > { %1332 = vmatprep.mubr.f32.mxu1 %v5149_v18 }
 0x541   : > { %v1261_v2 = vpop.f32.mrf.mxu1 }
 0x542   : > { %v1262_v7 = vadd.f32 %v1261_v2, %v5461_v43  ;;  %v4761_v2 = vcombine.low %v1564_v58, %v1565_v59 }
 0x543   : > { %v1263_v8 = vpop.f32.mrf.mxu1 }
 0x544   : > { %v1264_v9 = vadd.f32 %v1263_v8, %v5461_v43  ;;  %v1266_v13 = vmax.f32 %v1262_v7, 0.0 }
 0x546   : > { %v1267_v11 = vmax.f32 %v1264_v9, 0.0 }
 0x548   : > { %1298 = vmatprep.subr.mxu1 %v1267_v11 }
 0x549   : > { %1299 = vmatpush1.msra.mxu1 %v1266_v13 }
 0x54a   : > { %4754 = vmatmul.mubr.msk.f32.vlgmr.msra.gmra.mxu1 %vm824_vm2, %v5470_v52  ;;  %1369 = vmatprep.subr.bf16.mxu1 %v4756_v12 }
 0x54b   : > { %1370 = vmatpush1.bf16.msra.mxu1 %v4755_v14  ;;  %1387 = vmatprep.mubr.bf16.mxu1 %v5148_v10 }
 0x54e   : > { %4757 = vmatmul.mubr.msk.bf16.vlgmr.msra.gmra.mxu1 %vm656_vm1, %v5422_v16 }
 0x54f   : > { %1397 = vmatprep.mubr.bf16.mxu1 %v5148_v10 }
 0x556   : > { %4758 = vmatmul.mubr.msk.bf16.gmra.mxu1 %vm656_vm1, %v5430_v17 }
 0x557   : > { %1701 = vmatprep.mubr.f32.mxu1 %v5149_v18 }
 0x60a   : > { %v1334_v15 = vpop.f32.mrf.mxu1 }
 0x60b   : > { %v1335_v19 = vadd.f32 %v1334_v15, %v5514_v34 }
 0x60c   : > { %v1336_v20 = vpop.f32.mrf.mxu1 }
 0x60d   : > { %v5547_v24 = vmax.f32 %v1118_v41, %v1335_v19  ;;  %v1337_v25 = vadd.f32 %v1336_v20, %v5514_v34 }
 0x60e   : > { %v5550_v26 = vpop.f32.mrf.mxu1 }
 0x60f   : > { %v5552_v28 = vmax.f32 %v1119_v45, %v1337_v25 }
 0x610   : > { %v5554_v29 = vpop.f32.mrf.mxu1 }
 0x612   : > { %v1393_v33 = vpop.f32.mrf.mxu1 }
 0x613   : > { %v1408_v42 = vadd.f32 %v1393_v33, %v5445_v27 }
 0x614   : > { %v1395_v35 = vpop.f32.mrf.mxu1 }
 0x615   : > { %v1409_v40 = vadd.f32 %v1395_v35, %v5445_v27  ;;  %v1412_v51 = vmax.f32 %v1408_v42, 0.0  ;;  %v1783_v42 = vld [vmem:[%s5382_s21 + $0x28] sm:$0xff] }
 0x616   : > { %v1399_v36 = vpop.f32.mrf.mxu1 }
 0x617   : > { %v1410_v37 = vadd.f32 %v1399_v36, %v5443_v23  ;;  %v1413_v50 = vmax.f32 %v1409_v40, 0.0 }
 0x618   : > { %v1401_v38 = vpop.f32.mrf.mxu1 }
 0x619   : > { %v1411_v41 = vadd.f32 %v1401_v38, %v5443_v23  ;;  %v1414_v45 = vmax.f32 %v1410_v37, 0.0 }
 0x61a   : > { %v1403_v47 = vpop.f32.mrf.mxu1 }
 0x61b   : > { %v1415_v48 = vmax.f32 %v1411_v41, 0.0  ;;  %v1784_v47 = vld [vmem:[%s5382_s21 + $0x68] sm:$0xff] }
 0x61c   : > { %v1404_v49 = vpop.f32.mrf.mxu1 }
 0x61d   : > { %1444 = vmatprep.subr.mxu0 %v1415_v48  ;;  %v1786_v49 = vmul.bf16 %v1784_v47, %v5404_v6 }
 0x61e   : > { %1445 = vmatpush1.msra.mxu0 %v1414_v45  ;;  %v1785_v45 = vmul.bf16 %v1783_v42, %v5402_v5 }
 0x61f   : > { %1446 = vmatprep.subr.mxu0 %v1413_v50 }
 0x620   : > { %1447 = vmatpush1.msra.mxu0 %v1412_v51  ;;  %v4767_v59 = vcombine.low %v1785_v45, %v1786_v49 }
 0x621   : > { %4759 = vmatmul.mubr.msk.f32.vlgmr.msra.gmra.mxu0 %vm656_vm1, %v5454_v39 }
 0x622   : > { %1553 = vmatprep.mubr.f32.mxu0 %v5149_v18 }
 0x6e1   : > { %v1482_v55 = vpop.f32.mrf.mxu0 }
 0x6e2   : > { %v1483_v60 = vadd.f32 %v1482_v55, %v5461_v43  ;;  %v4768_v55 = vcombine.high %v1785_v45, %v1786_v49 }
 0x6e3   : > { %v1484_v61 = vpop.f32.mrf.mxu0 }
 0x6e4   : > { %v1485_v62 = vadd.f32 %v1484_v61, %v5461_v43  ;;  %v1487_v1 = vmax.f32 %v1483_v60, 0.0 }
 0x6e6   : > { %v1488_v63 = vmax.f32 %v1485_v62, 0.0 }
 0x6e8   : > { %1519 = vmatprep.subr.mxu0 %v1488_v63 }
 0x6e9   : > { %1520 = vmatpush1.msra.mxu0 %v1487_v1 }
 0x6ea   : > { %4760 = vmatmul.mubr.msk.f32.vlgmr.msra.gmra.mxu0 %vm824_vm2, %v5470_v52  ;;  %1590 = vmatprep.subr.bf16.mxu0 %v4762_v0 }
 0x6eb   : > { %1591 = vmatpush1.bf16.msra.mxu0 %v4761_v2  ;;  %1608 = vmatprep.mubr.bf16.mxu0 %v5148_v10 }
 0x6ee   : > { %4763 = vmatmul.mubr.msk.bf16.vlgmr.msra.gmra.mxu0 %vm656_vm1, %v5422_v16 }
 0x6ef   : > { %1618 = vmatprep.mubr.bf16.mxu0 %v5148_v10 }
 0x6f6   : > { %4764 = vmatmul.mubr.msk.bf16.gmra.mxu0 %vm656_vm1, %v5430_v17 }
 0x6f7   : > { %1922 = vmatprep.mubr.f32.mxu0 %v5149_v18 }
 0x7aa   : > { %v1555_v3 = vpop.f32.mrf.mxu0 }
 0x7ab   : > { %v1556_v4 = vadd.f32 %v1555_v3, %v5514_v34 }
 0x7ac   : > { %v1557_v7 = vpop.f32.mrf.mxu0 }
 0x7ad   : > { %v1560_v8 = vmax.f32 %v5547_v24, %v1556_v4  ;;  %v1558_v9 = vadd.f32 %v1557_v7, %v5514_v34 }
 0x7ae   : > { %v5581_v11 = vpop.f32.mrf.mxu0 }
 0x7af   : > { %v1561_v12 = vmax.f32 %v5552_v28, %v1558_v9 }
 0x7b0   : > { %v5584_v13 = vpop.f32.mrf.mxu0 }
 0x7b2   : > { %v1614_v14 = vpop.f32.mrf.mxu0 }
 0x7b3   : > { %v1629_v35 = vadd.f32 %v1614_v14, %v5445_v27 }
 0x7b4   : > { %v1616_v15 = vpop.f32.mrf.mxu0 }
 0x7b5   : > { %v1630_v33 = vadd.f32 %v1616_v15, %v5445_v27  ;;  %v1633_v41 = vmax.f32 %v1629_v35, 0.0 }
 0x7b6   : > { %v1620_v19 = vpop.f32.mrf.mxu0 }
 0x7b7   : > { %v1631_v20 = vadd.f32 %v1620_v19, %v5443_v23  ;;  %v1634_v40 = vmax.f32 %v1630_v33, 0.0 }
 0x7b8   : > { %v1622_v25 = vpop.f32.mrf.mxu0 }
 0x7b9   : > { %v1632_v24 = vadd.f32 %v1622_v25, %v5443_v23  ;;  %v1635_v38 = vmax.f32 %v1631_v20, 0.0 }
 0x7ba   : > { %v1624_v36 = vpop.f32.mrf.mxu0 }
 0x7bb   : > { %v1636_v37 = vmax.f32 %v1632_v24, 0.0 }
 0x7bc   : > { %v1625_v28 = vpop.f32.mrf.mxu0 }
 0x7bd   : > { %1665 = vmatprep.subr.mxu1 %v1636_v37  ;;  %v2004_v37 = vld [vmem:[%s5382_s21 + $0x30] sm:$0xff] }
 0x7be   : > { %1666 = vmatpush1.msra.mxu1 %v1635_v38  ;;  %v2005_v38 = vld [vmem:[%s5382_s21 + $0x70] sm:$0xff] }
 0x7bf   : > { %1667 = vmatprep.subr.mxu1 %v1634_v40  ;;  %v2006_v40 = vmul.bf16 %v2004_v37, %v5402_v5 }
 0x7c0   : > { %1668 = vmatpush1.msra.mxu1 %v1633_v41  ;;  %v2007_v41 = vmul.bf16 %v2005_v38, %v5404_v6 }
 0x7c1   : > { %4765 = vmatmul.mubr.msk.f32.vlgmr.msra.gmra.mxu1 %vm656_vm1, %v5454_v39 }
 0x7c2   : > { %1774 = vmatprep.mubr.f32.mxu1 %v5149_v18  ;;  %v4774_v49 = vcombine.high %v2006_v40, %v2007_v41 }
 0x881   : > { %v1703_v48 = vpop.f32.mrf.mxu1 }
 0x882   : > { %v1704_v50 = vadd.f32 %v1703_v48, %v5461_v43 }
 0x883   : > { %v1705_v51 = vpop.f32.mrf.mxu1 }
 0x884   : > { %v1706_v53 = vadd.f32 %v1705_v51, %v5461_v43  ;;  %v1708_v58 = vmax.f32 %v1704_v50, 0.0  ;;  %v4773_v51 = vcombine.low %v2006_v40, %v2007_v41 }
 0x886   : > { %v1709_v54 = vmax.f32 %v1706_v53, 0.0 }
 0x888   : > { %1740 = vmatprep.subr.mxu1 %v1709_v54 }
 0x889   : > { %1741 = vmatpush1.msra.mxu1 %v1708_v58 }
 0x88a   : > { %4766 = vmatmul.mubr.msk.f32.vlgmr.msra.gmra.mxu1 %vm824_vm2, %v5470_v52  ;;  %1811 = vmatprep.subr.bf16.mxu1 %v4768_v55 }
 0x88b   : > { %1812 = vmatpush1.bf16.msra.mxu1 %v4767_v59  ;;  %1829 = vmatprep.mubr.bf16.mxu1 %v5148_v10 }
 0x88e   : > { %4769 = vmatmul.mubr.msk.bf16.vlgmr.msra.gmra.mxu1 %vm656_vm1, %v5422_v16 }
 0x88f   : > { %1839 = vmatprep.mubr.bf16.mxu1 %v5148_v10 }
 0x896   : > { %4770 = vmatmul.mubr.msk.bf16.gmra.mxu1 %vm656_vm1, %v5430_v17 }
 0x897   : > { %2143 = vmatprep.mubr.f32.mxu1 %v5149_v18 }
 0x94a   : > { %v1776_v60 = vpop.f32.mrf.mxu1 }
 0x94b   : > { %v1777_v61 = vadd.f32 %v1776_v60, %v5514_v34 }
 0x94c   : > { %v1778_v62 = vpop.f32.mrf.mxu1 }
 0x94d   : > { %v5609_v63 = vmax.f32 %v1560_v8, %v1777_v61  ;;  %v1779_v0 = vadd.f32 %v1778_v62, %v5514_v34 }
 0x94e   : > { %v5612_v1 = vpop.f32.mrf.mxu1 }
 0x94f   : > { %v5614_v2 = vmax.f32 %v1561_v12, %v1779_v0 }
 0x950   : > { %v5616_v3 = vpop.f32.mrf.mxu1 }
 0x952   : > { %v1835_v4 = vpop.f32.mrf.mxu1 }
 0x953   : > { %v1850_v20 = vadd.f32 %v1835_v4, %v5445_v27 }
 0x954   : > { %v1837_v7 = vpop.f32.mrf.mxu1 }
 0x955   : > { %v1851_v19 = vadd.f32 %v1837_v7, %v5445_v27  ;;  %v1854_v36 = vmax.f32 %v1850_v20, 0.0 }
 0x956   : > { %v1841_v9 = vpop.f32.mrf.mxu1 }
 0x957   : > { %v1852_v14 = vadd.f32 %v1841_v9, %v5443_v23  ;;  %v1855_v35 = vmax.f32 %v1851_v19, 0.0 }
 0x958   : > { %v1843_v15 = vpop.f32.mrf.mxu1 }
 0x959   : > { %v1853_v8 = vadd.f32 %v1843_v15, %v5443_v23  ;;  %v1856_v12 = vmax.f32 %v1852_v14, 0.0 }
 0x95a   : > { %v1845_v25 = vpop.f32.mrf.mxu1 }
 0x95b   : > { %v1857_v33 = vmax.f32 %v1853_v8, 0.0 }
 0x95c   : > { %v1846_v24 = vpop.f32.mrf.mxu1 }
 0x95d   : > { %1886 = vmatprep.subr.mxu0 %v1857_v33  ;;  %v2225_v24 = vld [vmem:[%s5382_s21 + $0x38] sm:$0xff] }
 0x95e   : > { %1887 = vmatpush1.msra.mxu0 %v1856_v12  ;;  %v2227_v37 = vmul.bf16 %v2225_v24, %v5402_v5 }
 0x95f   : > { %1888 = vmatprep.subr.mxu0 %v1855_v35  ;;  %v2226_v35 = vld [vmem:[%s5382_s21 + $0x78] sm:$0xff] }
 0x960   : > { %1889 = vmatpush1.msra.mxu0 %v1854_v36  ;;  %v2228_v38 = vmul.bf16 %v2226_v35, %v5404_v6 }
 0x961   : > { %4771 = vmatmul.mubr.msk.f32.vlgmr.msra.gmra.mxu0 %vm656_vm1, %v5454_v39 }
 0x962   : > { %1995 = vmatprep.mubr.f32.mxu0 %v5149_v18 }
 0xa21   : > { %v1924_v28 = vpop.f32.mrf.mxu0 }
 0xa22   : > { %v1925_v42 = vadd.f32 %v1924_v28, %v5461_v43 }
 0xa23   : > { %v1926_v47 = vpop.f32.mrf.mxu0 }
 0xa24   : > { %v1927_v48 = vadd.f32 %v1926_v47, %v5461_v43  ;;  %v1929_v50 = vmax.f32 %v1925_v42, 0.0  ;;  %v4780_v47 = vcombine.high %v2227_v37, %v2228_v38 }
 0xa26   : > { %v1930_v45 = vmax.f32 %v1927_v48, 0.0 }
 0xa28   : > { %1961 = vmatprep.subr.mxu0 %v1930_v45  ;;  %v4779_v45 = vcombine.low %v2227_v37, %v2228_v38 }
 0xa29   : > { %1962 = vmatpush1.msra.mxu0 %v1929_v50 }
 0xa2a   : > { %4772 = vmatmul.mubr.msk.f32.vlgmr.msra.gmra.mxu0 %vm824_vm2, %v5470_v52  ;;  %2032 = vmatprep.subr.bf16.mxu0 %v4774_v49 }
 0xa2b   : > { %2033 = vmatpush1.bf16.msra.mxu0 %v4773_v51  ;;  %2050 = vmatprep.mubr.bf16.mxu0 %v5148_v10 }
 0xa2e   : > { %4775 = vmatmul.mubr.msk.bf16.vlgmr.msra.gmra.mxu0 %vm656_vm1, %v5422_v16 }
 0xa2f   : > { %2060 = vmatprep.mubr.bf16.mxu0 %v5148_v10 }
 0xa36   : > { %4776 = vmatmul.mubr.msk.bf16.gmra.mxu0 %vm656_vm1, %v5430_v17 }
 0xa37   : > { %2364 = vmatprep.mubr.f32.mxu0 %v5149_v18 }
 0xaea   : > { %v1997_v53 = vpop.f32.mrf.mxu0 }
 0xaeb   : > { %v1998_v54 = vadd.f32 %v1997_v53, %v5514_v34 }
 0xaec   : > { %v1999_v55 = vpop.f32.mrf.mxu0 }
 0xaed   : > { %v2002_v58 = vmax.f32 %v5609_v63, %v1998_v54  ;;  %v2000_v59 = vadd.f32 %v1999_v55, %v5514_v34 }
 0xaee   : > { %v5643_v60 = vpop.f32.mrf.mxu0 }
 0xaef   : > { %v2003_v61 = vmax.f32 %v5614_v2, %v2000_v59 }
 0xaf0   : > { %v5646_v62 = vpop.f32.mrf.mxu0 }
 0xaf2   : > { %v2056_v0 = vpop.f32.mrf.mxu0 }
 0xaf3   : > { %v2071_v19 = vadd.f32 %v2056_v0, %v5445_v27 }
 0xaf4   : > { %v2058_v4 = vpop.f32.mrf.mxu0 }
 0xaf5   : > { %v2072_v15 = vadd.f32 %v2058_v4, %v5445_v27  ;;  %v2075_v12 = vmax.f32 %v2071_v19, 0.0 }
 0xaf6   : > { %v2062_v7 = vpop.f32.mrf.mxu0 }
 0xaf7   : > { %v2073_v9 = vadd.f32 %v2062_v7, %v5443_v23  ;;  %v2076_v33 = vmax.f32 %v2072_v15, 0.0 }
 0xaf8   : > { %v2064_v14 = vpop.f32.mrf.mxu0 }
 0xaf9   : > { %v2074_v63 = vadd.f32 %v2064_v14, %v5443_v23  ;;  %v2077_v25 = vmax.f32 %v2073_v9, 0.0 }
 0xafa   : > { %v2066_v8 = vpop.f32.mrf.mxu0 }
 0xafb   : > { %v2078_v20 = vmax.f32 %v2074_v63, 0.0 }
 0xafc   : > { %v2067_v2 = vpop.f32.mrf.mxu0 }
 0xafd   : > { %2107 = vmatprep.subr.mxu1 %v2078_v20 }
 0xafe   : > { %2108 = vmatpush1.msra.mxu1 %v2077_v25 }
 0xaff   : > { %2109 = vmatprep.subr.mxu1 %v2076_v33 }
 0xb00   : > { %2110 = vmatpush1.msra.mxu1 %v2075_v12 }
 0xb01   : > { %4777 = vmatmul.mubr.msk.f32.vlgmr.msra.gmra.mxu1 %vm656_vm1, %v5454_v39 }
 0xb02   : > { %2216 = vmatprep.mubr.f32.mxu1 %v5149_v18 }
 0xbc1   : > { %v2145_v36 = vpop.f32.mrf.mxu1 }
 0xbc2   : > { %v2146_v28 = vadd.f32 %v2145_v36, %v5461_v43 }
 0xbc3   : > { %v2147_v40 = vpop.f32.mrf.mxu1 }
 0xbc4   : > { %v2148_v41 = vadd.f32 %v2147_v40, %v5461_v43  ;;  %v2150_v48 = vmax.f32 %v2146_v28, 0.0 }
 0xbc6   : > { %v2151_v42 = vmax.f32 %v2148_v41, 0.0  ;;  %v5150_v41 = vmov 1966171168  }
 0xbc8   : > { %2182 = vmatprep.subr.mxu1 %v2151_v42 }
 0xbc9   : > { %2183 = vmatpush1.msra.mxu1 %v2150_v48  ;;  %v2484_v48 = vld [vmem:[#allocation3 + $0x30] sm:$0xff] }
 0xbca   : > { %4778 = vmatmul.mubr.msk.f32.vlgmr.msra.gmra.mxu1 %vm824_vm2, %v5470_v52  ;;  %2253 = vmatprep.subr.bf16.mxu1 %v4780_v47 }
 0xbcb   : > { %2254 = vmatpush1.bf16.msra.mxu1 %v4779_v45  ;;  %2271 = vmatprep.mubr.bf16.mxu1 %v5148_v10 }
 0xbce   : > { %4781 = vmatmul.mubr.msk.bf16.vlgmr.msra.gmra.mxu1 %vm656_vm1, %v5422_v16 }
 0xbcf   : > { %2281 = vmatprep.mubr.bf16.mxu1 %v5148_v10 }
 0xbd6   : > { %4782 = vmatmul.mubr.msk.bf16.gmra.mxu1 %vm656_vm1, %v5430_v17 }
 0xc8a   : > { %v2218_v5 = vpop.f32.mrf.mxu1 }
 0xc8b   : > { %v2219_v6 = vadd.f32 %v2218_v5, %v5514_v34  ;;  %v2502_v5 = vld [vmem:[#allocation3 + $0x58] sm:$0xff] }
 0xc8c   : > { %v2220_v49 = vpop.f32.mrf.mxu1 }
 0xc8d   : > { %v2223_v50 = vmax.f32 %v2002_v58, %v2219_v6  ;;  %v2221_v51 = vadd.f32 %v2220_v49, %v5514_v34  ;;  %v2512_v6 = vld [vmem:[#allocation3 + $0x50] sm:$0xff]  ;;  %v2522_v49 = vld [vmem:[#allocation3 + $0x8] sm:$0xff] }
 0xc8e   : > { %v5671_v53 = vpop.f32.mrf.mxu1 }
 0xc8f   : > { %v2224_v54 = vmax.f32 %v2003_v61, %v2221_v51 }
 0xc90   : > { %v5673_v55 = vpop.f32.mrf.mxu1 }
 0xc92   : > { %v2277_v59 = vpop.f32.mrf.mxu1 }
 0xc93   : > { %v2292_v9 = vadd.f32 %v2277_v59, %v5445_v27 }
 0xc94   : > { %v2279_v0 = vpop.f32.mrf.mxu1 }
 0xc95   : > { %v2293_v17 = vadd.f32 %v2279_v0, %v5445_v27  ;;  %v2296_v61 = vmax.f32 %v2292_v9, 0.0 }
 0xc96   : > { %v2283_v16 = vpop.f32.mrf.mxu1 }
 0xc97   : > { %v2294_v10 = vadd.f32 %v2283_v16, %v5443_v23  ;;  %v2297_v19 = vmax.f32 %v2293_v17, 0.0  ;;  %v2542_v16 = vld [vmem:[#allocation3 + $0x10] sm:$0xff] }
 0xc98   : > { %v2285_v4 = vpop.f32.mrf.mxu1 }
 0xc99   : > { %v2295_v7 = vadd.f32 %v2285_v4, %v5443_v23  ;;  %v2298_v15 = vmax.f32 %v2294_v10, 0.0  ;;  %v2552_v10 = vld [vmem:[#allocation3 + $0x60] sm:$0xff]  ;;  %v2562_v4 = vld [vmem:[#allocation3 + $0x78] sm:$0xff] }
 0xc9a   : > { %v2287_v58 = vpop.f32.mrf.mxu1 }
 0xc9b   : > { %v2299_v14 = vmax.f32 %v2295_v7, 0.0 }
 0xc9c   : > { %v2288_v63 = vpop.f32.mrf.mxu1 }
 0xc9d   : > { %2328 = vmatprep.subr.mxu0 %v2299_v14 }
 0xc9e   : > { %2329 = vmatpush1.msra.mxu0 %v2298_v15 }
 0xc9f   : > { %2330 = vmatprep.subr.mxu0 %v2297_v19 }
 0xca0   : > { %2331 = vmatpush1.msra.mxu0 %v2296_v61 }
 0xca1   : > { %4783 = vmatmul.mubr.msk.f32.vlgmr.msra.gmra.mxu0 %vm656_vm1, %v5454_v39 }
 0xca2   : > { %2437 = vmatprep.mubr.f32.mxu0 %v5149_v18 }
 0xd61   : > { %v2366_v8 = vpop.f32.mrf.mxu0 }
 0xd62   : > { %v2367_v23 = vadd.f32 %v2366_v8, %v5461_v43 }
 0xd63   : > { %v2368_v20 = vpop.f32.mrf.mxu0 }
 0xd64   : > { %v2369_v27 = vadd.f32 %v2368_v20, %v5461_v43  ;;  %v2371_v2 = vmax.f32 %v2367_v23, 0.0  ;;  %v2513_v23 = vld [vmem:[#allocation3 + $0x68] sm:$0xff] }
 0xd65   : > { %v2523_v20 = vld [vmem:[#allocation3 + $0x48] sm:$0xff] }
 0xd66   : > { %v2372_v25 = vmax.f32 %v2369_v27, 0.0 }
 0xd68   : > { %2403 = vmatprep.subr.mxu0 %v2372_v25 }
 0xd69   : > { %2404 = vmatpush1.msra.mxu0 %v2371_v2 }
 0xd6a   : > { %4784 = vmatmul.mubr.msk.f32.vlgmr.msra.gmra.mxu0 %vm824_vm2, %v5470_v52  ;;  %v2462_v52 = vunpack.c.l.s4 %v5150_v41 }
 0xd6c   : > { %v2463_v42 = vunpack.c.0.s8 %v2462_v52  ;;  %v2563_v52 = vld [vmem:[#allocation3 + $0x28] sm:$0xff] }
 0xe2a   : > { %v2439_v33 = vpop.f32.mrf.mxu0 }
 0xe2b   : > { %v2440_v12 = vadd.f32 %v2439_v33, %v5514_v34 }
 0xe2c   : > { %v2441_v24 = vpop.f32.mrf.mxu0 }
 0xe2d   : > { %v2444_v39 = vmax.f32 %v2223_v50, %v2440_v12  ;;  %v2442_v18 = vadd.f32 %v2441_v24, %v5514_v34  ;;  %v2466_v34 = vsub.s32 %v2463_v42, %v5508_v31  ;;  %v2532_v50 = vld [vmem:[#allocation3 + $0x40] sm:$0xff]  ;;  %v2543_v24 = vld [vmem:[#allocation3 + $0x38] sm:$0xff] }
 0xe2e   : > { %v2533_v12 = vld [vmem:[#allocation3 + $0x20] sm:$0xff] }
 0xe2f   : > { %v4785_v35 = vmul.f32 -1.442695, %v2444_v39  ;;  %v2445_v36 = vmax.f32 %v2224_v54, %v2442_v18  ;;  %v2481_v39 = vld [vmem:[#allocation4] sm:$0x3] }
 0xe31   : > { %4951 = vpow2.f32 %v4785_v35  ;;  %v4786_v37 = vmul.f32 -1.442695, %v2445_v36 }
 0xe33   : > { %4953 = vpow2.f32 %v4786_v37 }
 0xe3e   : > { %v4952_v43 = vpop.eup %4951 }
 0xe3f   : > { %v2452_v38 = vadd.f32 1.0, %v4952_v43 }
 0xe40   : > { %v4954_v28 = vpop.eup %4953 }
 0xe41   : > { %4955 = vrcp.f32 %v2452_v38  ;;  %v2453_v40 = vadd.f32 1.0, %v4954_v28 }
 0xe43   : > { %4957 = vrcp.f32 %v2453_v40 }
 0xe4e   : > { %v4956_v47 = vpop.eup %4955 }
 0xe4f   : > { %v2491_v45 = vrot.slane %v4956_v47, %v5511_v32 }
 0xe50   : > { %v4958_v17 = vpop.eup %4957 }
 0xe51   : > { %v2496_v51 = vmul.f32 %v2491_v45, %v5439_v21  ;;  %v2506_v54 = vmul.f32 %v2491_v45, %v5481_v56  ;;  %v2516_v59 = vmul.f32 %v2491_v45, %v5520_v44  ;;  %v2526_v0 = vmul.f32 %v2491_v45, %v5550_v26 }
 0xe52   : > { %v2536_v7 = vmul.f32 %v2491_v45, %v5581_v11  ;;  %v2546_v9 = vmul.f32 %v2491_v45, %v5612_v1  ;;  %v2556_v58 = vmul.f32 %v2491_v45, %v5643_v60  ;;  %v2566_v14 = vmul.f32 %v2491_v45, %v5671_v53  ;;  %v2485_v11 = vld [vmem:[#allocation3] sm:$0xff]  ;;  %v2503_v53 = vld [vmem:[#allocation3 + $0x18] sm:$0xff] }
 0xe53   : > { %v2498_v15 = vadd.f32 %v2496_v51, %v2484_v48  ;;  %v2508_v21 = vadd.f32 %v2506_v54, %v2502_v5  ;;  %v2518_v63 = vadd.f32 %v2516_v59, %v2512_v6  ;;  %v2528_v56 = vadd.f32 %v2526_v0, %v2522_v49 }
 0xe54   : > { %v2538_v19 = vadd.f32 %v2536_v7, %v2532_v50  ;;  %v2548_v44 = vadd.f32 %v2546_v9, %v2542_v16  ;;  %v2558_v61 = vadd.f32 %v2556_v58, %v2552_v10  ;;  %v2568_v26 = vadd.f32 %v2566_v14, %v2562_v4 }
 0xe55   : > { %2500 = vst [vmem:[#allocation3 + $0x30] sm:$0xff] %v2498_v15  ;;  %2510 = vst [vmem:[#allocation3 + $0x58] sm:$0xff] %v2508_v21  ;;  %v2460_v8 = vcombine.low %v4956_v47, %v4958_v17  ;;  %v2495_v1 = vrot.slane %v4958_v17, %v5511_v32 }
 0xe56   : > { %2520 = vst [vmem:[#allocation3 + $0x50] sm:$0xff] %v2518_v63  ;;  %2530 = vst [vmem:[#allocation3 + $0x8] sm:$0xff] %v2528_v56 }
 0xe57   : > { %2540 = vst [vmem:[#allocation3 + $0x40] sm:$0xff] %v2538_v19  ;;  %2550 = vst [vmem:[#allocation3 + $0x10] sm:$0xff] %v2548_v44  ;;  %v2467_v27 = vrot.slane %v2460_v8, %v2466_v34  ;;  %v2497_v25 = vmul.f32 %v2495_v1, %v5441_v22  ;;  %v2507_v2 = vmul.f32 %v2495_v1, %v5483_v57 }
 0xe58   : > { %2560 = vst [vmem:[#allocation3 + $0x60] sm:$0xff] %v2558_v61  ;;  %2570 = vst [vmem:[#allocation3 + $0x78] sm:$0xff] %v2568_v26  ;;  %v2517_v33 = vmul.f32 %v2495_v1, %v5522_v46  ;;  %v2527_v18 = vmul.f32 %v2495_v1, %v5554_v29  ;;  %v2537_v35 = vmul.f32 %v2495_v1, %v5584_v13 }
 0xe59   : > { %v2547_v36 = vmul.f32 %v2495_v1, %v5616_v3  ;;  %v2557_v37 = vmul.f32 %v2495_v1, %v5646_v62  ;;  %v2474_v43 = vrot.slane %v2467_v27, %v2466_v34  ;;  %v2499_v38 = vadd.f32 %v2497_v25, %v2485_v11 }
 0xe5a   : > { %v2509_v22 = vadd.f32 %v2507_v2, %v2503_v53  ;;  %v2519_v28 = vadd.f32 %v2517_v33, %v2513_v23  ;;  %v2529_v57 = vadd.f32 %v2527_v18, %v2523_v20  ;;  %v2539_v40 = vadd.f32 %v2537_v35, %v2533_v12 }
 0xe5b   : > { %v2549_v46 = vadd.f32 %v2547_v36, %v2543_v24  ;;  %v2559_v41 = vadd.f32 %v2557_v37, %v2553_v30  ;;  %2480 = vst.msk [vmem:[%s5397_s8] sm:$0x3] %vm5700_vm3, %v2474_v43  ;;  %v2482_v42 = vadd.f32 %v2481_v39, %v2474_v43  ;;  %2501 = vst [vmem:[#allocation3] sm:$0xff] %v2499_v38 }
 0xe5c   : > { %2511 = vst [vmem:[#allocation3 + $0x18] sm:$0xff] %v2509_v22  ;;  %2521 = vst [vmem:[#allocation3 + $0x68] sm:$0xff] %v2519_v28  ;;  %v2567_v29 = vmul.f32 %v2495_v1, %v5673_v55  ;;  %2575 = sbr.rel (%p4787_p6) target bundleno = 5751 (0x1677), region = 88 }
 0xe5d   : > { %2531 = vst [vmem:[#allocation3 + $0x48] sm:$0xff] %v2529_v57  ;;  %2541 = vst [vmem:[#allocation3 + $0x20] sm:$0xff] %v2539_v40 }
 0xe5e   : > { %2551 = vst [vmem:[#allocation3 + $0x38] sm:$0xff] %v2549_v46  ;;  %2561 = vst [vmem:[#allocation3 + $0x70] sm:$0xff] %v2559_v41  ;;  %v2569_v13 = vadd.f32 %v2567_v29, %v2563_v52 }
 0xe5f   : > { %2483 = vst.msk [vmem:[#allocation4] sm:$0x3] %vm5700_vm3, %v2482_v42 }
 0xe60   : > { %2571 = vst [vmem:[#allocation3 + $0x28] sm:$0xff] %v2569_v13 }
 0xe61   : > { %v5151_v62 = vmov 0.0   ;;  %v5152_v55 = vmov 0   ;;  %v2581_v47 = vld [vmem:[%s6089_s22 + $0x8] sm:$0xff]  ;;  %v2580_v48 = vld [vmem:[%s6090_s16] sm:$0xff]  ;;  %v2595_v45 = vsub.s32 1, %v5508_v31  ;;  %v2586_v6 = vld [vmem:[#allocation3 + $0x30] sm:$0xff] }
 0xe62   : > { %2681 = vmatprep.mubr.f32.mxu0 %v5151_v62  ;;  %2770 = vmatprep.mubr.f32.mxu1 %v5151_v62  ;;  %v2587_v34 = vld [vmem:[#allocation3] sm:$0xff]  ;;  %v2862_v54 = vld [vmem:[#allocation3 + $0x58] sm:$0xff]  ;;  %v5748_v7 = vld [vmem:[%s6092_s15 + $0x8] sm:$0xff]  ;;  %s6093_s22 = sld [smem:[#allocation33_spill]]  ;;  %vm4507_vm4 = vcmask 1040384   ;;  %vm4510_vm5 = vcmask 1041408  }
 0xe63   : > { %4959 = vset.pattern.permute.xlu0 %v5152_v55  ;;  %4960 = vset.pattern.permute.xlu1 %v5152_v55  ;;  %v2863_v49 = vld [vmem:[#allocation3 + $0x18] sm:$0xff]  ;;  %v3092_v59 = vld [vmem:[#allocation3 + $0x68] sm:$0xff]  ;;  %v5738_v31 = vld [vmem:[%s6091_s25] sm:$0xff]  ;;  %vm4513_vm6 = vcmask 1042432   ;;  %vm4516_vm7 = vcmask 1043456   ;;  %vm4519_vm8 = vcmask 1044480  }
 0xe64   : > { %2608 = vperm.xlu0 %4959, %v2581_v47   ;;  %v3091_v9 = vld [vmem:[#allocation3 + $0x50] sm:$0xff]  ;;  %v3321_v58 = vld [vmem:[#allocation3 + $0x48] sm:$0xff]  ;;  %v3550_v63 = vld [vmem:[#allocation3 + $0x20] sm:$0xff]  ;;  %vm4522_vm9 = vcmask 1045504   ;;  %vm4525_vm10 = vcmask 1046528  }
 0xe65   : > { %v3320_v21 = vld [vmem:[#allocation3 + $0x8] sm:$0xff]  ;;  %v3549_v44 = vld [vmem:[#allocation3 + $0x40] sm:$0xff]  ;;  %v3779_v61 = vld [vmem:[#allocation3 + $0x38] sm:$0xff] }
 0xe66   : > { %v2576_v3 = vld [vmem:[#allocation4] sm:$0x3]  ;;  %v3778_v11 = vld [vmem:[#allocation3 + $0x10] sm:$0xff]  ;;  %v4236_v2 = vld [vmem:[#allocation3 + $0x78] sm:$0xff] }
 0xe67   : > { %4961 = vrcp.f32 %v2576_v3  ;;  %v4008_v1 = vld [vmem:[#allocation3 + $0x70] sm:$0xff]  ;;  %v4007_v23 = vld [vmem:[#allocation3 + $0x60] sm:$0xff]  ;;  %v4237_v20 = vld [vmem:[#allocation3 + $0x28] sm:$0xff] }
 0xe68   : > { %2603 = vperm.xlu0 %4959, %v2580_v48   ;;  %v2583_v12 = vld [vmem:[%s6093_s22] sm:$0xff] }
 0xe69   : > { %2700 = vperm.xlu1 %4960, %v2583_v12   ;;  %v2585_v24 = vld [vmem:[#allocation6] sm:$0x1] }
 0xe6a   : > { %v5819_v52 = vld [vmem:[%s6094_s14] sm:$0xff] }
 0xe6d   : > { %2781 = vperm.xlu1 %4960, %v2585_v24  }
 0xe74   : > { %v4962_v5 = vpop.eup %4961 }
 0xe75   : > { %v5727_v50 = vrot.slane %v4962_v5, %v2595_v45  ;;  %v5730_v51 = vrot.slane %v4962_v5, %v5511_v32 }
 0xe77   : > { %v2600_v0 = vmul.f32 %v5727_v50, %v2587_v34  ;;  %v2599_v16 = vmul.f32 %v5730_v51, %v2586_v6  ;;  %v2865_v10 = vmul.f32 %v2863_v49, %v5727_v50  ;;  %v2864_v4 = vmul.f32 %v2862_v54, %v5730_v51 }
 0xe78   : > { %v3094_v17 = vmul.f32 %v3092_v59, %v5727_v50  ;;  %v3093_v14 = vmul.f32 %v3091_v9, %v5730_v51  ;;  %v3323_v15 = vmul.f32 %v3321_v58, %v5727_v50  ;;  %v3322_v56 = vmul.f32 %v3320_v21, %v5730_v51  ;;  %v5835_v59 = vld [vmem:[%s6095_s9] sm:$0x1] }
 0xe79   : > { %2647 = vmatprep.subr.mxu0 %v2600_v0  ;;  %v3552_v19 = vmul.f32 %v3550_v63, %v5727_v50  ;;  %v3551_v26 = vmul.f32 %v3549_v44, %v5730_v51  ;;  %v3781_v8 = vmul.f32 %v3779_v61, %v5727_v50  ;;  %v3780_v60 = vmul.f32 %v3778_v11, %v5730_v51 }
 0xe7a   : > { %2648 = vmatpush1.msra.mxu0 %v2599_v16  ;;  %v4010_v53 = vmul.f32 %v4008_v1, %v5727_v50  ;;  %v4009_v27 = vmul.f32 %v4007_v23, %v5730_v51  ;;  %v4239_v25 = vmul.f32 %v4237_v20, %v5727_v50  ;;  %v4238_v33 = vmul.f32 %v4236_v2, %v5730_v51 }
 0xe7b   : > { %4788 = vmatmul.mubr.msk.f32.vlgmr.msra.gmra.mxu0 %vm824_vm2, %v5738_v31  ;;  %2896 = vmatprep.subr.mxu0 %v2865_v10 }
 0xe7c   : > { %2687 = vmatprep.mubr.f32.mxu0 %v5151_v62  ;;  %2897 = vmatpush1.msra.mxu0 %v2864_v4 }
 0xe7d   : > { %3125 = vmatprep.subr.mxu0 %v3094_v17 }
 0xe7f   : > { %4789 = vmatmul.mubr.msk.f32.gmra.mxu0 %vm824_vm2, %v5748_v7 }
 0xe80   : > { %2930 = vmatprep.mubr.f32.mxu0 %v5151_v62 }
 0xe83   : > { %4792 = vmatmul.mubr.msk.f32.vlgmr.msra.gmra.mxu0 %vm824_vm2, %v5738_v31 }
 0xe84   : > { %2936 = vmatprep.mubr.f32.mxu0 %v5151_v62  ;;  %3126 = vmatpush1.msra.mxu0 %v3093_v14 }
 0xe85   : > { %3354 = vmatprep.subr.mxu0 %v3323_v15 }
 0xe87   : > { %4793 = vmatmul.mubr.msk.f32.gmra.mxu0 %vm824_vm2, %v5748_v7 }
 0xe88   : > { %3159 = vmatprep.mubr.f32.mxu0 %v5151_v62 }
 0xe8b   : > { %4796 = vmatmul.mubr.msk.f32.vlgmr.msra.gmra.mxu0 %vm824_vm2, %v5738_v31 }
 0xe8c   : > { %3165 = vmatprep.mubr.f32.mxu0 %v5151_v62  ;;  %3355 = vmatpush1.msra.mxu0 %v3322_v56 }
 0xe8d   : > { %3583 = vmatprep.subr.mxu0 %v3552_v19 }
 0xe8f   : > { %4797 = vmatmul.mubr.msk.f32.gmra.mxu0 %vm824_vm2, %v5748_v7 }
 0xe90   : > { %3388 = vmatprep.mubr.f32.mxu0 %v5151_v62 }
 0xe93   : > { %4800 = vmatmul.mubr.msk.f32.vlgmr.msra.gmra.mxu0 %vm824_vm2, %v5738_v31 }
 0xe94   : > { %3394 = vmatprep.mubr.f32.mxu0 %v5151_v62  ;;  %3584 = vmatpush1.msra.mxu0 %v3551_v26 }
 0xe95   : > { %3812 = vmatprep.subr.mxu0 %v3781_v8 }
 0xe97   : > { %4801 = vmatmul.mubr.msk.f32.gmra.mxu0 %vm824_vm2, %v5748_v7 }
 0xe98   : > { %3617 = vmatprep.mubr.f32.mxu0 %v5151_v62 }
 0xe9b   : > { %4804 = vmatmul.mubr.msk.f32.vlgmr.msra.gmra.mxu0 %vm824_vm2, %v5738_v31 }
 0xe9c   : > { %3623 = vmatprep.mubr.f32.mxu0 %v5151_v62  ;;  %3813 = vmatpush1.msra.mxu0 %v3780_v60 }
 0xe9d   : > { %4041 = vmatprep.subr.mxu0 %v4010_v53 }
 0xe9f   : > { %4805 = vmatmul.mubr.msk.f32.gmra.mxu0 %vm824_vm2, %v5748_v7 }
 0xea0   : > { %3846 = vmatprep.mubr.f32.mxu0 %v5151_v62 }
 0xea3   : > { %4808 = vmatmul.mubr.msk.f32.vlgmr.msra.gmra.mxu0 %vm824_vm2, %v5738_v31 }
 0xea4   : > { %3852 = vmatprep.mubr.f32.mxu0 %v5151_v62  ;;  %4042 = vmatpush1.msra.mxu0 %v4009_v27 }
 0xea5   : > { %4270 = vmatprep.subr.mxu0 %v4239_v25 }
 0xea7   : > { %4809 = vmatmul.mubr.msk.f32.gmra.mxu0 %vm824_vm2, %v5748_v7 }
 0xea8   : > { %4075 = vmatprep.mubr.f32.mxu0 %v5151_v62 }
 0xeab   : > { %4812 = vmatmul.mubr.msk.f32.vlgmr.msra.gmra.mxu0 %vm824_vm2, %v5738_v31 }
 0xeac   : > { %4081 = vmatprep.mubr.f32.mxu0 %v5151_v62  ;;  %4271 = vmatpush1.msra.mxu0 %v4238_v33 }
 0xeaf   : > { %4813 = vmatmul.mubr.msk.f32.gmra.mxu0 %vm824_vm2, %v5748_v7 }
 0xeb0   : > { %4304 = vmatprep.mubr.f32.mxu0 %v5151_v62 }
 0xeb3   : > { %4816 = vmatmul.mubr.msk.f32.vlgmr.msra.gmra.mxu0 %vm824_vm2, %v5738_v31 }
 0xeb4   : > { %4310 = vmatprep.mubr.f32.mxu0 %v5151_v62 }
 0xeb7   : > { %4817 = vmatmul.mubr.msk.f32.gmra.mxu0 %vm824_vm2, %v5748_v7 }
 0xedf   : > { %v5808_v30 = vpop.permute.xlu0 %2608 }
 0xee3   : > { %v5810_v36 = vpop.permute.xlu0 %2603 }
 0xee4   : > { %v5824_v47 = vpop.permute.xlu1 %2700 }
 0xee8   : > { %v2782_v25 = vpop.permute.xlu1 %2781 }
 0xee9   : > { %v5856_v2 = vrot.slane %v2782_v25, %v5511_v32 }
 0xf3b   : > { %v2683_v39 = vpop.f32.mrf.mxu0 }
 0xf3c   : > { %v2684_v28 = vadd.f32 %v2683_v39, %v5810_v36 }
 0xf3d   : > { %v2685_v18 = vpop.f32.mrf.mxu0 }
 0xf3e   : > { %v2686_v38 = vadd.f32 %v2685_v18, %v5810_v36  ;;  %v2694_v41 = vmax.f32 %v2684_v28, 0.0 }
 0xf3f   : > { %v2689_v35 = vpop.f32.mrf.mxu0 }
 0xf40   : > { %v2690_v37 = vadd.f32 %v2689_v35, %v5808_v30  ;;  %v2695_v46 = vmax.f32 %v2686_v38, 0.0 }
 0xf41   : > { %v2691_v43 = vpop.f32.mrf.mxu0 }
 0xf42   : > { %v2692_v22 = vadd.f32 %v2691_v43, %v5808_v30  ;;  %v2696_v40 = vmax.f32 %v2690_v37, 0.0 }
 0xf43   : > { %v2932_v42 = vpop.f32.mrf.mxu0 }
 0xf44   : > { %v2697_v57 = vmax.f32 %v2692_v22, 0.0  ;;  %v2933_v51 = vadd.f32 %v2932_v42, %v5810_v36 }
 0xf45   : > { %v2934_v29 = vpop.f32.mrf.mxu0 }
 0xf46   : > { %2734 = vmatprep.subr.mxu1 %v2697_v57  ;;  %v2935_v49 = vadd.f32 %v2934_v29, %v5810_v36  ;;  %v2943_v31 = vmax.f32 %v2933_v51, 0.0 }
 0xf47   : > { %2735 = vmatpush1.msra.mxu1 %v2696_v40  ;;  %v2938_v13 = vpop.f32.mrf.mxu0 }
 0xf48   : > { %2736 = vmatprep.subr.mxu1 %v2695_v46  ;;  %v2939_v6 = vadd.f32 %v2938_v13, %v5808_v30  ;;  %v2944_v10 = vmax.f32 %v2935_v49, 0.0 }
 0xf49   : > { %2737 = vmatpush1.msra.mxu1 %v2694_v41  ;;  %v2940_v3 = vpop.f32.mrf.mxu0 }
 0xf4a   : > { %4790 = vmatmul.mubr.msk.f32.vlgmr.msra.gmra.mxu1 %vm656_vm1, %v5819_v52  ;;  %v2941_v5 = vadd.f32 %v2940_v3, %v5808_v30  ;;  %v2945_v16 = vmax.f32 %v2939_v6, 0.0 }
 0xf4b   : > { %2855 = vmatprep.mubr.f32.mxu1 %v5151_v62  ;;  %v3161_v4 = vpop.f32.mrf.mxu0 }
 0xf4c   : > { %v2946_v0 = vmax.f32 %v2941_v5, 0.0  ;;  %v3162_v8 = vadd.f32 %v3161_v4, %v5810_v36 }
 0xf4d   : > { %v3163_v17 = vpop.f32.mrf.mxu0 }
 0xf4e   : > { %v3164_v61 = vadd.f32 %v3163_v17, %v5810_v36  ;;  %v3172_v23 = vmax.f32 %v3162_v8, 0.0 }
 0xf4f   : > { %v3167_v7 = vpop.f32.mrf.mxu0 }
 0xf50   : > { %v3168_v44 = vadd.f32 %v3167_v7, %v5808_v30  ;;  %v3173_v53 = vmax.f32 %v3164_v61, 0.0 }
 0xf51   : > { %v3169_v14 = vpop.f32.mrf.mxu0 }
 0xf52   : > { %v3170_v56 = vadd.f32 %v3169_v14, %v5808_v30  ;;  %v3174_v60 = vmax.f32 %v3168_v44, 0.0 }
 0xf53   : > { %v3390_v20 = vpop.f32.mrf.mxu0 }
 0xf54   : > { %v3175_v1 = vmax.f32 %v3170_v56, 0.0 }
 0xf55   : > { %v3392_v27 = vpop.f32.mrf.mxu0 }
 0xf56   : > { %v3393_v13 = vadd.f32 %v3392_v27, %v5810_v36 }
 0xf57   : > { %v3396_v33 = vpop.f32.mrf.mxu0 }
 0xf58   : > { %v3397_v29 = vadd.f32 %v3396_v33, %v5808_v30 }
 0xf59   : > { %v3398_v43 = vpop.f32.mrf.mxu0 }
 0xf5a   : > { %v3399_v46 = vadd.f32 %v3398_v43, %v5808_v30  ;;  %v3403_v5 = vmax.f32 %v3397_v29, 0.0 }
 0xf5b   : > { %v3619_v49 = vpop.f32.mrf.mxu0 }
 0xf5c   : > { %v3620_v61 = vadd.f32 %v3619_v49, %v5810_v36 }
0x100a   : > { %v2772_v55 = vpop.f32.mrf.mxu1 }
0x100b   : > { %v2773_v48 = vadd.f32 %v2772_v55, %v5824_v47  ;;  %v3391_v55 = vadd.f32 %v3390_v20, %v5810_v36 }
0x100c   : > { %v2774_v45 = vpop.f32.mrf.mxu1 }
0x100d   : > { %v2775_v34 = vadd.f32 %v2774_v45, %v5824_v47  ;;  %v2777_v54 = vmax.f32 %v2773_v48, 0.0  ;;  %v3404_v45 = vmax.f32 %v3399_v46, 0.0  ;;  %v3401_v6 = vmax.f32 %v3391_v55, 0.0 }
0x100f   : > { %v2778_v50 = vmax.f32 %v2775_v34, 0.0  ;;  %v3402_v34 = vmax.f32 %v3393_v13, 0.0 }
0x1011   : > { %2821 = vmatprep.subr.mxu1 %v2778_v50  ;;  %v3621_v50 = vpop.f32.mrf.mxu0 }
0x1012   : > { %2822 = vmatpush1.msra.mxu1 %v2777_v54 }
0x1013   : > { %4791 = vmatmul.mubr.msk.f32.vlgmr.msra.gmra.mxu1 %vm824_vm2, %v5835_v59  ;;  %2975 = vmatprep.subr.mxu1 %v2946_v0  ;;  %v3625_v51 = vpop.f32.mrf.mxu0 }
0x1014   : > { %2976 = vmatpush1.msra.mxu1 %v2945_v16  ;;  %3011 = vmatprep.mubr.f32.mxu1 %v5151_v62  ;;  %v3626_v56 = vadd.f32 %v3625_v51, %v5808_v30 }
0x1015   : > { %2977 = vmatprep.subr.mxu1 %v2944_v10  ;;  %v3627_v4 = vpop.f32.mrf.mxu0 }
0x1016   : > { %2978 = vmatpush1.msra.mxu1 %v2943_v31 }
0x1017   : > { %4794 = vmatmul.mubr.msk.f32.vlgmr.msra.gmra.mxu1 %vm656_vm1, %v5819_v52 }
0x1018   : > { %3084 = vmatprep.mubr.f32.mxu1 %v5151_v62 }
0x10d3   : > { %v2857_v9 = vpop.f32.mrf.mxu1 }
0x10d4   : > { %v2858_v18 = vadd.f32 %v2857_v9, %v5856_v2 }
0x10d5   : > { %v2859_v58 = vpop.f32.mrf.mxu1 }
0x10d6   : > { %v2860_v22 = vadd.f32 %v2859_v58, %v5856_v2 }
0x10d7   : > { %v3013_v15 = vpop.f32.mrf.mxu1 }
0x10d8   : > { %v3014_v21 = vadd.f32 %v3013_v15, %v5824_v47  ;;  %v3628_v15 = vadd.f32 %v3627_v4, %v5808_v30 }
0x10d9   : > { %v3015_v63 = vpop.f32.mrf.mxu1 }
0x10da   : > { %v3016_v19 = vadd.f32 %v3015_v63, %v5824_v47  ;;  %v3018_v11 = vmax.f32 %v3014_v21, 0.0  ;;  %v3633_v8 = vmax.f32 %v3628_v15, 0.0 }
0x10dc   : > { %v3019_v26 = vmax.f32 %v3016_v19, 0.0  ;;  %v3622_v19 = vadd.f32 %v3621_v50, %v5810_v36 }
0x10de   : > { %3050 = vmatprep.subr.mxu1 %v3019_v26 }
0x10df   : > { %3051 = vmatpush1.msra.mxu1 %v3018_v11  ;;  %v3632_v11 = vmax.f32 %v3626_v56, 0.0 }
0x10e0   : > { %4795 = vmatmul.mubr.msk.f32.vlgmr.msra.gmra.mxu1 %vm824_vm2, %v5835_v59  ;;  %3204 = vmatprep.subr.mxu1 %v3175_v1  ;;  %v3631_v1 = vmax.f32 %v3622_v19, 0.0 }
0x10e1   : > { %3205 = vmatpush1.msra.mxu1 %v3174_v60  ;;  %3240 = vmatprep.mubr.f32.mxu1 %v5151_v62  ;;  %v3630_v60 = vmax.f32 %v3620_v61, 0.0 }
0x10e2   : > { %3206 = vmatprep.subr.mxu1 %v3173_v53  ;;  %v3848_v53 = vpop.f32.mrf.mxu0 }
0x10e3   : > { %3207 = vmatpush1.msra.mxu1 %v3172_v23 }
0x10e4   : > { %4798 = vmatmul.mubr.msk.f32.vlgmr.msra.gmra.mxu1 %vm656_vm1, %v5819_v52  ;;  %v3850_v23 = vpop.f32.mrf.mxu0 }
0x10e5   : > { %3313 = vmatprep.mubr.f32.mxu1 %v5151_v62 }
0x10e6   : > { %v3854_v20 = vpop.f32.mrf.mxu0 }
0x11a0   : > { %v3086_v12 = vpop.f32.mrf.mxu1 }
0x11a1   : > { %v3087_v24 = vadd.f32 %v3086_v12, %v5856_v2 }
0x11a2   : > { %v3088_v39 = vpop.f32.mrf.mxu1 }
0x11a3   : > { %v4467_v35 = vrot.slane %v3087_v24, 7  ;;  %v3089_v37 = vadd.f32 %v3088_v39, %v5856_v2  ;;  %v3856_v39 = vpop.f32.mrf.mxu0 }
0x11a4   : > { %v3242_v38 = vpop.f32.mrf.mxu1 }
0x11a5   : > { %v4508_v28 = vsel %vm4507_vm4, %v2858_v18, %v4467_v35  ;;  %v4468_v57 = vrot.slane %v3089_v37, 7  ;;  %v3243_v32 = vadd.f32 %v3242_v38, %v5824_v47 }
0x11a6   : > { %v3244_v40 = vpop.f32.mrf.mxu1 }
0x11a7   : > { %v4509_v41 = vsel %vm4507_vm4, %v2860_v22, %v4468_v57  ;;  %v3245_v42 = vadd.f32 %v3244_v40, %v5824_v47  ;;  %v3247_v48 = vmax.f32 %v3243_v32, 0.0  ;;  %v3857_v22 = vadd.f32 %v3856_v39, %v5808_v30 }
0x11a8   : > { %v3855_v32 = vadd.f32 %v3854_v20, %v5808_v30  ;;  %v3851_v40 = vadd.f32 %v3850_v23, %v5810_v36 }
0x11a9   : > { %v3248_v3 = vmax.f32 %v3245_v42, 0.0  ;;  %v3862_v29 = vmax.f32 %v3857_v22, 0.0 }
0x11aa   : > { %v3861_v13 = vmax.f32 %v3855_v32, 0.0 }
0x11ab   : > { %3279 = vmatprep.subr.mxu1 %v3248_v3  ;;  %v3860_v3 = vmax.f32 %v3851_v40, 0.0 }
0x11ac   : > { %3280 = vmatpush1.msra.mxu1 %v3247_v48  ;;  %v4077_v48 = vpop.f32.mrf.mxu0 }
0x11ad   : > { %4799 = vmatmul.mubr.msk.f32.vlgmr.msra.gmra.mxu1 %vm824_vm2, %v5835_v59  ;;  %3433 = vmatprep.subr.mxu1 %v3404_v45 }
0x11ae   : > { %3434 = vmatpush1.msra.mxu1 %v3403_v5  ;;  %3469 = vmatprep.mubr.f32.mxu1 %v5151_v62  ;;  %v4079_v45 = vpop.f32.mrf.mxu0 }
0x11af   : > { %3435 = vmatprep.subr.mxu1 %v3402_v34 }
0x11b0   : > { %3436 = vmatpush1.msra.mxu1 %v3401_v6  ;;  %v4083_v5 = vpop.f32.mrf.mxu0 }
0x11b1   : > { %4802 = vmatmul.mubr.msk.f32.vlgmr.msra.gmra.mxu1 %vm656_vm1, %v5819_v52 }
0x11b2   : > { %3542 = vmatprep.mubr.f32.mxu1 %v5151_v62 }
0x126d   : > { %v3315_v54 = vpop.f32.mrf.mxu1 }
0x126e   : > { %v3316_v0 = vadd.f32 %v3315_v54, %v5856_v2  ;;  %v4085_v54 = vpop.f32.mrf.mxu0 }
0x126f   : > { %v3317_v16 = vpop.f32.mrf.mxu1 }
0x1270   : > { %v4473_v10 = vrot.slane %v3316_v0, 6  ;;  %v3318_v31 = vadd.f32 %v3317_v16, %v5856_v2 }
0x1271   : > { %v3471_v17 = vpop.f32.mrf.mxu1 }
0x1272   : > { %v4511_v7 = vsel %vm4510_vm5, %v4508_v28, %v4473_v10  ;;  %v4474_v9 = vrot.slane %v3318_v31, 6  ;;  %v3472_v58 = vadd.f32 %v3471_v17, %v5824_v47  ;;  %v4086_v17 = vadd.f32 %v4085_v54, %v5808_v30 }
0x1273   : > { %v3473_v14 = vpop.f32.mrf.mxu1 }
0x1274   : > { %v4512_v21 = vsel %vm4510_vm5, %v4509_v41, %v4474_v9  ;;  %v3474_v63 = vadd.f32 %v3473_v14, %v5824_v47  ;;  %v3476_v26 = vmax.f32 %v3472_v58, 0.0  ;;  %v3849_v41 = vadd.f32 %v3848_v53, %v5810_v36 }
0x1275   : > { %v4084_v58 = vadd.f32 %v4083_v5, %v5808_v30  ;;  %v4080_v14 = vadd.f32 %v4079_v45, %v5810_v36  ;;  %v4091_v56 = vmax.f32 %v4086_v17, 0.0 }
0x1276   : > { %v3477_v44 = vmax.f32 %v3474_v63, 0.0  ;;  %v3859_v55 = vmax.f32 %v3849_v41, 0.0 }
0x1277   : > { %v4090_v19 = vmax.f32 %v4084_v58, 0.0 }
0x1278   : > { %3508 = vmatprep.subr.mxu1 %v3477_v44  ;;  %v4089_v44 = vmax.f32 %v4080_v14, 0.0 }
0x1279   : > { %3509 = vmatpush1.msra.mxu1 %v3476_v26  ;;  %v4306_v26 = vpop.f32.mrf.mxu0 }
0x127a   : > { %4803 = vmatmul.mubr.msk.f32.vlgmr.msra.gmra.mxu1 %vm824_vm2, %v5835_v59  ;;  %3662 = vmatprep.subr.mxu1 %v3633_v8 }
0x127b   : > { %3663 = vmatpush1.msra.mxu1 %v3632_v11  ;;  %3698 = vmatprep.mubr.f32.mxu1 %v5151_v62  ;;  %v4308_v8 = vpop.f32.mrf.mxu0 }
0x127c   : > { %3664 = vmatprep.subr.mxu1 %v3631_v1 }
0x127d   : > { %3665 = vmatpush1.msra.mxu1 %v3630_v60  ;;  %v4312_v11 = vpop.f32.mrf.mxu0 }
0x127e   : > { %4806 = vmatmul.mubr.msk.f32.vlgmr.msra.gmra.mxu1 %vm656_vm1, %v5819_v52 }
0x127f   : > { %3771 = vmatprep.mubr.f32.mxu1 %v5151_v62 }
0x133a   : > { %v3544_v27 = vpop.f32.mrf.mxu1 }
0x133b   : > { %v3545_v25 = vadd.f32 %v3544_v27, %v5856_v2  ;;  %v4314_v27 = vpop.f32.mrf.mxu0 }
0x133c   : > { %v3546_v33 = vpop.f32.mrf.mxu1 }
0x133d   : > { %v4479_v12 = vrot.slane %v3545_v25, 5  ;;  %v3547_v24 = vadd.f32 %v3546_v33, %v5856_v2 }
0x133e   : > { %v3700_v18 = vpop.f32.mrf.mxu1 }
0x133f   : > { %v4514_v35 = vsel %vm4513_vm6, %v4511_v7, %v4479_v12  ;;  %v4480_v37 = vrot.slane %v3547_v24, 5  ;;  %v3701_v43 = vadd.f32 %v3700_v18, %v5824_v47  ;;  %v4315_v18 = vadd.f32 %v4314_v27, %v5808_v30 }
0x1340   : > { %v3702_v38 = vpop.f32.mrf.mxu1 }
0x1341   : > { %v4515_v28 = vsel %vm4513_vm6, %v4512_v21, %v4480_v37  ;;  %v3703_v57 = vadd.f32 %v3702_v38, %v5824_v47  ;;  %v3705_v42 = vmax.f32 %v3701_v43, 0.0  ;;  %v4078_v21 = vadd.f32 %v4077_v48, %v5810_v36 }
0x1342   : > { %v4313_v43 = vadd.f32 %v4312_v11, %v5808_v30  ;;  %v4309_v38 = vadd.f32 %v4308_v8, %v5810_v36  ;;  %v4320_v32 = vmax.f32 %v4315_v18, 0.0 }
0x1343   : > { %v3706_v46 = vmax.f32 %v3703_v57, 0.0  ;;  %v4088_v61 = vmax.f32 %v4078_v21, 0.0 }
0x1344   : > { %v4319_v40 = vmax.f32 %v4313_v43, 0.0 }
0x1345   : > { %3737 = vmatprep.subr.mxu1 %v3706_v46  ;;  %v4318_v46 = vmax.f32 %v4309_v38, 0.0 }
0x1346   : > { %3738 = vmatpush1.msra.mxu1 %v3705_v42 }
0x1347   : > { %4807 = vmatmul.mubr.msk.f32.vlgmr.msra.gmra.mxu1 %vm824_vm2, %v5835_v59  ;;  %3891 = vmatprep.subr.mxu1 %v3862_v29 }
0x1348   : > { %3892 = vmatpush1.msra.mxu1 %v3861_v13  ;;  %3927 = vmatprep.mubr.f32.mxu1 %v5151_v62 }
0x1349   : > { %3893 = vmatprep.subr.mxu1 %v3860_v3 }
0x134a   : > { %3894 = vmatpush1.msra.mxu1 %v3859_v55 }
0x134b   : > { %4810 = vmatmul.mubr.msk.f32.vlgmr.msra.gmra.mxu1 %vm656_vm1, %v5819_v52 }
0x134c   : > { %4000 = vmatprep.mubr.f32.mxu1 %v5151_v62 }
0x1407   : > { %v3773_v34 = vpop.f32.mrf.mxu1 }
0x1408   : > { %v3774_v6 = vadd.f32 %v3773_v34, %v5856_v2 }
0x1409   : > { %v3775_v49 = vpop.f32.mrf.mxu1 }
0x140a   : > { %v4485_v50 = vrot.slane %v3774_v6, 4  ;;  %v3776_v51 = vadd.f32 %v3775_v49, %v5856_v2 }
0x140b   : > { %v3929_v0 = vpop.f32.mrf.mxu1 }
0x140c   : > { %v4517_v16 = vsel %vm4516_vm7, %v4514_v35, %v4485_v50  ;;  %v4486_v10 = vrot.slane %v3776_v51, 4  ;;  %v3930_v31 = vadd.f32 %v3929_v0, %v5824_v47 }
0x140d   : > { %v3931_v4 = vpop.f32.mrf.mxu1 }
0x140e   : > { %v4518_v7 = vsel %vm4516_vm7, %v4515_v28, %v4486_v10  ;;  %v3932_v9 = vadd.f32 %v3931_v4, %v5824_v47  ;;  %v3934_v63 = vmax.f32 %v3930_v31, 0.0  ;;  %v4307_v28 = vadd.f32 %v4306_v26, %v5810_v36 }
0x1410   : > { %v3935_v15 = vmax.f32 %v3932_v9, 0.0  ;;  %v4317_v41 = vmax.f32 %v4307_v28, 0.0 }
0x1412   : > { %3966 = vmatprep.subr.mxu1 %v3935_v15 }
0x1413   : > { %3967 = vmatpush1.msra.mxu1 %v3934_v63 }
0x1414   : > { %4811 = vmatmul.mubr.msk.f32.vlgmr.msra.gmra.mxu1 %vm824_vm2, %v5835_v59  ;;  %4120 = vmatprep.subr.mxu1 %v4091_v56 }
0x1415   : > { %4121 = vmatpush1.msra.mxu1 %v4090_v19  ;;  %4156 = vmatprep.mubr.f32.mxu1 %v5151_v62 }
0x1416   : > { %4122 = vmatprep.subr.mxu1 %v4089_v44 }
0x1417   : > { %4123 = vmatpush1.msra.mxu1 %v4088_v61 }
0x1418   : > { %4814 = vmatmul.mubr.msk.f32.vlgmr.msra.gmra.mxu1 %vm656_vm1, %v5819_v52 }
0x1419   : > { %4229 = vmatprep.mubr.f32.mxu1 %v5151_v62 }
0x14d4   : > { %v4002_v1 = vpop.f32.mrf.mxu1 }
0x14d5   : > { %v4003_v60 = vadd.f32 %v4002_v1, %v5856_v2 }
0x14d6   : > { %v4004_v53 = vpop.f32.mrf.mxu1 }
0x14d7   : > { %v4491_v23 = vrot.slane %v4003_v60, 3  ;;  %v4005_v20 = vadd.f32 %v4004_v53, %v5856_v2 }
0x14d8   : > { %v4158_v25 = vpop.f32.mrf.mxu1 }
0x14d9   : > { %v4520_v33 = vsel %vm4519_vm8, %v4517_v16, %v4491_v23  ;;  %v4492_v12 = vrot.slane %v4005_v20, 3  ;;  %v4159_v24 = vadd.f32 %v4158_v25, %v5824_v47 }
0x14da   : > { %v4160_v39 = vpop.f32.mrf.mxu1 }
0x14db   : > { %v4521_v35 = vsel %vm4519_vm8, %v4518_v7, %v4492_v12  ;;  %v4161_v37 = vadd.f32 %v4160_v39, %v5824_v47  ;;  %v4163_v57 = vmax.f32 %v4159_v24, 0.0 }
0x14dd   : > { %v4164_v22 = vmax.f32 %v4161_v37, 0.0 }
0x14df   : > { %4195 = vmatprep.subr.mxu1 %v4164_v22 }
0x14e0   : > { %4196 = vmatpush1.msra.mxu1 %v4163_v57 }
0x14e1   : > { %4815 = vmatmul.mubr.msk.f32.vlgmr.msra.gmra.mxu1 %vm824_vm2, %v5835_v59  ;;  %4349 = vmatprep.subr.mxu1 %v4320_v32 }
0x14e2   : > { %4350 = vmatpush1.msra.mxu1 %v4319_v40  ;;  %4385 = vmatprep.mubr.f32.mxu1 %v5151_v62 }
0x14e3   : > { %4351 = vmatprep.subr.mxu1 %v4318_v46 }
0x14e4   : > { %4352 = vmatpush1.msra.mxu1 %v4317_v41 }
0x14e5   : > { %4818 = vmatmul.mubr.msk.f32.vlgmr.msra.gmra.mxu1 %vm656_vm1, %v5819_v52 }
0x14e6   : > { %4458 = vmatprep.mubr.f32.mxu1 %v5151_v62 }
0x15a1   : > { %v4231_v30 = vpop.f32.mrf.mxu1 }
0x15a2   : > { %v4232_v36 = vadd.f32 %v4231_v30, %v5856_v2 }
0x15a3   : > { %v4233_v42 = vpop.f32.mrf.mxu1 }
0x15a4   : > { %v4497_v29 = vrot.slane %v4232_v36, 2  ;;  %v4234_v13 = vadd.f32 %v4233_v42, %v5856_v2 }
0x15a5   : > { %v4387_v3 = vpop.f32.mrf.mxu1 }
0x15a6   : > { %v4523_v55 = vsel %vm4522_vm9, %v4520_v33, %v4497_v29  ;;  %v4498_v48 = vrot.slane %v4234_v13, 2  ;;  %v4388_v45 = vadd.f32 %v4387_v3, %v5824_v47 }
0x15a7   : > { %v4389_v5 = vpop.f32.mrf.mxu1 }
0x15a8   : > { %v4524_v34 = vsel %vm4522_vm9, %v4521_v35, %v4498_v48  ;;  %v4390_v52 = vadd.f32 %v4389_v5, %v5824_v47  ;;  %v4392_v6 = vmax.f32 %v4388_v45, 0.0 }
0x15aa   : > { %v4393_v62 = vmax.f32 %v4390_v52, 0.0 }
0x15ac   : > { %4424 = vmatprep.subr.mxu1 %v4393_v62 }
0x15ad   : > { %4425 = vmatpush1.msra.mxu1 %v4392_v6 }
0x15ae   : > { %4819 = vmatmul.mubr.msk.f32.vlgmr.msra.gmra.mxu1 %vm824_vm2, %v5835_v59 }
0x166e   : > { %v4460_v49 = vpop.f32.mrf.mxu1 }
0x166f   : > { %v4461_v50 = vadd.f32 %v4460_v49, %v5856_v2 }
0x1670   : > { %v4462_v51 = vpop.f32.mrf.mxu1 }
0x1671   : > { %v4503_v54 = vrot.slane %v4461_v50, 1  ;;  %v4463_v0 = vadd.f32 %v4462_v51, %v5856_v2 }
0x1673   : > { %v4526_v16 = vsel %vm4525_vm10, %v4523_v55, %v4503_v54  ;;  %v4504_v10 = vrot.slane %v4463_v0, 1 }
0x1674   : > { %4528 = vst [vmem:[%s5399_s18] sm:$0xff] %v4526_v16 }
0x1675   : > { %v4527_v47 = vsel %vm4525_vm10, %v4524_v34, %v4504_v10 }
0x1676   : > { %4529 = vst [vmem:[%s5399_s18 + $0x8] sm:$0xff] %v4527_v47 }
0x1677 PF: > { %s4822_s21 = sshll.u32 %s5125_s13, 1  ;;  %s4823_s17 = sshll.u32 %s5129_s27, 2 }
0x1678   : > { %s4554_s22 = sshll.u32 %s5397_s8, 4  ;;  %s4550_s20 = sadd.s32 %s4823_s17, %s4822_s21  ;;  %s5943_s22 = int_to_ptr.vmem [resolvable:$true] %s4554_s22 }
0x1679   : > { %s4824_s11 = sshll.u32 %s4550_s20, 4  ;;  %s6097_s25 = sld [smem:[#allocation35_spill]] }
0x167a   : > { %s4830_s0 = sshll.u32 %s5129_s27, 8  ;;  %s4531_s1 = scalar_lea.sflag [#allocation9], %s5378_s24 }
0x167b   : > { %s4991_s2 = scalar_lea.vmem %s5943_s22, 32  ;;  %s5153_s13 = smov [#allocation10]  }
0x167c   : > { %p4992_p5 = scmp.ne.s32.totalorder %s5943_s22, %s4991_s2  ;;  %s4995_s8 = sshll.u32 %s5153_s13, 4  ;;  %s4996_s8 = int_to_ptr.vmem [resolvable:$false] %s4995_s8 }
0x167d   : > { %s4997_s21 = scalar_lea.vmem %s4996_s8, 64  ;;  %p4998_p12 = scmp.lt.s32.totalorder %s5943_s22, %s4996_s8 }
0x167e   : > { %p4993_p10 = pnand %p4992_p5, %p5327_p9  ;;  %p4999_p3 = scmp.lt.s32.totalorder %s4997_s21, %s4991_s2 }
0x167f   : > { %s6098_s9 = smov %s6097_s25  ;;  %s4552_s12 = scalar_lea.hbm %s6097_s25, %s4824_s11 }
0x1680   : > { %p4994_p11 = pneg %p4993_p10  ;;  %p5000_p0 = por %p4999_p3, %p4998_p12 }
0x1682   : > { %p5001_p2 = pnand %p5000_p0, %p4994_p11 }
0x1684   : > { %5004 = shalt.err (!%p5001_p2)
}
0x1685   : > { %s5005_s17 = scalar_lea.hbm %s4552_s12, 32  ;;  %s5009_s20 = scalar_lea.hbm %s6098_s9, 128 }
0x1686   : > { %p5006_p4 = scmp.ne.s32.totalorder %s4552_s12, %s5005_s17  ;;  %p5010_p8 = scmp.lt.s32.totalorder %s4552_s12, %s6098_s9 }
0x1687   : > { %p5011_p6 = scmp.lt.s32.totalorder %s5009_s20, %s5005_s17 }
0x1688   : > { %p5007_p7 = pnand %p5006_p4, %p5327_p9 }
0x1689   : > { %p5012_p5 = por %p5011_p6, %p5010_p8 }
0x168a   : > { %p5008_p13 = pneg %p5007_p7 }
0x168c   : > { %p5013_p10 = pnand %p5012_p5, %p5008_p13 }
0x168e   : > { %5016 = shalt.err (!%p5013_p10)
}
0x168f   : > { %4833 = dma.vmem_to_hbm [thread:$0]  (%p5327_p9), %s5943_s22, 32, %s4552_s12, %s4531_s1  }
0x1690   : > { %s6099_s25 = sld [smem:[#allocation36_spill]]  ;;  %s4570_s21 = sshll.u32 %s5399_s18, 4  ;;  %s4571_s21 = int_to_ptr.vmem [resolvable:$true] %s4570_s21 }
0x1691   : > { %s6101_s27 = sand.u32 1, %s5105_s23   ;;  %s5017_s11 = scalar_lea.vmem %s4571_s21, 256 }
0x1692   : > { %s4536_s24 = scalar_lea.sflag [#allocation12], %s6101_s27  ;;  %p5018_p11 = scmp.ne.s32.totalorder %s4571_s21, %s5017_s11 }
0x1693   : > { %s5154_s17 = smov [#allocation11]  }
0x1694   : > { %p5019_p12 = pnand %p5018_p11, %p5348_p1  ;;  %s5021_s28 = sshll.u32 %s5154_s17, 4  ;;  %s5022_s28 = int_to_ptr.vmem [resolvable:$false] %s5021_s28 }
0x1695   : > { %s5023_s20 = scalar_lea.vmem %s5022_s28, 512  ;;  %p5024_p0 = scmp.lt.s32.totalorder %s4571_s21, %s5022_s28 }
0x1696   : > { %s6100_s8 = smov %s6099_s25  ;;  %s4568_s13 = scalar_lea.hbm %s6099_s25, %s4830_s0 }
0x1697   : > { %p5020_p3 = pneg %p5019_p12  ;;  %p5025_p2 = scmp.lt.s32.totalorder %s5023_s20, %s5017_s11 }
0x1699   : > { %p5026_p9 = por %p5025_p2, %p5024_p0 }
0x169b   : > { %p5027_p4 = pnand %p5026_p9, %p5020_p3 }
0x169d   : > { %5030 = shalt.err (!%p5027_p4)
}
0x169e   : > { %s5031_s1 = scalar_lea.hbm %s4568_s13, 256  ;;  %s5035_s18 = scalar_lea.hbm %s6100_s8, 512 }
0x169f   : > { %p5032_p7 = scmp.ne.s32.totalorder %s4568_s13, %s5031_s1  ;;  %p5036_p6 = scmp.lt.s32.totalorder %s4568_s13, %s6100_s8 }
0x16a0   : > { %p5037_p5 = scmp.lt.s32.totalorder %s5035_s18, %s5031_s1 }
0x16a1   : > { %p5033_p13 = pnand %p5032_p7, %p5348_p1 }
0x16a2   : > { %p5038_p10 = por %p5037_p5, %p5036_p6 }
0x16a3   : > { %p5034_p8 = pneg %p5033_p13 }
0x16a5   : > { %p5039_p11 = pnand %p5038_p10, %p5034_p8 }
0x16a7   : > { %5042 = shalt.err (!%p5039_p11)
}
0x16a8   : > { %4834 = dma.vmem_to_hbm [thread:$0]  (%p5348_p1), %s4571_s21, 256, %s4568_s13, %s4536_s24  }
0x16a9 PF: > { %s6102_s2 = sld [smem:[#allocation18_spill]]  ;;  %p4849_p12 = scmp.ge.s32.totalorder %s5141_s30, 2 }
0x16aa   : > { %s6103_s10 = sld [smem:[#allocation23_spill]] }
0x16af   : > { %s4582_s25 = sand.u32 1, %s6102_s2  }
0x16b0   : > { %p6104_p3 = scmp.ne.s32.totalorder %s6103_s10, 0  ;;  %s4583_s27 = scalar_lea.sflag [#allocation9], %s4582_s25 }
0x16b2   : > { %p4842_p0 = pnand %p4849_p12, %p6104_p3 }
0x16b4   : > { %p4843_p2 = pneg %p4842_p0 }
0x16b6   : > { %5092 = dma.done.wait (%p4843_p2), %s4583_s27, 32  }
0x16b7   : > { %5094 = vsyncadd (%p4843_p2), %s4583_s27, 4294967264  ;;  %s6105_s11 = sld [smem:[#allocation16_spill]] }
0x16b8   : > { %s6106_s17 = sld [smem:[#allocation26_spill]] }
0x16bd   : > { %s4591_s28 = sand.u32 1, %s6105_s11  }
0x16be   : > { %p6107_p9 = scmp.ne.s32.totalorder %s6106_s17, 0  ;;  %s4592_s19 = scalar_lea.sflag [#allocation12], %s4591_s28 }
0x16c0   : > { %p4845_p4 = pnand %p4849_p12, %p6107_p9 }
0x16c2   : > { %p4846_p7 = pneg %p4845_p4 }
0x16c4   : > { %5096 = dma.done.wait (%p4846_p7), %s4592_s19, 256  }
0x16c5   : > { %5098 = vsyncadd (%p4846_p7), %s4592_s19, 4294967040  ;;  %s39_s30 = sadd.s32 1, %s5141_s30   ;;  %s6108_s13 = sld [smem:[#allocation17_spill]] }
0x16c6   : > { %p36_p1 = scmp.ge.s32.totalorder %s39_s30, 6   ;;  %s6109_s24 = sld [smem:[#allocation25_spill]] }
0x16c7   : > { %s6110_s21 = sld [smem:[#allocation24_spill]]  ;;  %s6114_s22 = smov %s5105_s23 }
0x16c8   : > { %s6111_s20 = sld [smem:[#allocation19_spill]]  ;;  %s6116_s25 = smov %s5117_s7 }
0x16c9   : > { %s6112_s28 = sld [smem:[#allocation20_spill]]  ;;  %s6117_s7 = smov %s5121_s26 }
0x16ca   : > { %s6113_s1 = sld [smem:[#allocation21_spill]]  ;;  %s6120_s27 = smov %s5137_s29 }
0x16cb   : > { %s6115_s23 = smov %s6108_s13 }
0x16cc   :  { %38 = sbr.rel (!%p36_p1) target bundleno = 22 (0x16), region = 149 }
0x16cd   : > { %s6118_s26 = smov %s6110_s21 }
0x16ce   : > { %s6119_s13 = smov %s6111_s20 }
0x16d0   : > { %s6121_s29 = smov %s6113_s1 }
0x16d1   :  { %4597 = vsyncpa [#allocation8], 1 }
0x16d2   :  { %4599 = vsyncpa [#allocation8 + $0x1], 1 }
0x16d3   :  { %4600 = vsyncpa [#allocation9], 1 }
0x16d4   :  { %4602 = vsyncpa [#allocation9 + $0x1], 1 }
0x16d5   :  { %4603 = vsyncpa [#allocation12], 1 }
0x16d6   :  { %4605 = vsyncpa [#allocation12 + $0x1], 1 }

</bundles_post_ra>
